<compile_context>
chip_gen: v7x
topology: tpu7x:2x2x1
jax: 0.10.0
libtpu: 0.0.40
codegen_flags: <defaults>
</compile_context>

<pallas_src>
import jax
import jax.numpy as jnp
from jax.experimental import pallas as pl
from jax.experimental.pallas import tpu as pltpu

_SUBLANE = 8     # minimal batch tile (sublane width)
_LANE = 128      # lane width
_CT_MAX = 64     # max time steps per grid chunk


def _round_up(x, m):
    return (x + m - 1) // m * m


def _vmem_capacity_bytes():
    try:
        return int(pltpu.get_tpu_info().vmem_capacity_bytes)
    except Exception:
        return 64 * 1024 * 1024          # v7x-safe fallback


def _choose_batch_tile(bs):
    """Batch tile: as large as the padded batch, capped at 128.  Tiles > 8 are
    multiples of 16 (bf16 tile alignment) and the batch is split into >= 2 tiles
    when it would otherwise land on a single tile (feeds both TCs on v7x)."""
    if bs <= _SUBLANE:
        return _SUBLANE
    if bs <= 256:
        return _round_up((bs + 1) // 2, 16)
    return 128


def _choose_time_chunk(T, BT, Dp, Hp, budget):
    """Largest CT such that weights + bf16 gx scratch + double-buffered bf16
    x/out chunk windows fit the per-generation VMEM budget."""
    fixed = 2 * 2 * ((Dp + Hp) * 4 * Hp * 2 + 4 * Hp * 4)   # weights+bias, 2 dirs, 2 bufs
    fixed += 4 * BT * Hp * 4                                 # h/c state (f32)
    fixed += 2 * 2 * BT * Hp * 4                             # hidden output (f32, 2 bufs)
    per_ct = BT * (16 * Hp + 8 * Dp + 8 * Hp)                # gx bf16 + x/out streams bf16
    ct = (budget - fixed) // max(per_ct, 1)
    return int(max(1, min(_CT_MAX, T, ct)))


def pblstm_kernel(maxlen_ref, lens_ref, xf_ref, xb_ref,
                  wih_f_ref, whh_f_ref, b_f_ref,
                  wih_b_ref, whh_b_ref, b_b_ref,
                  out_f_ref, out_b_ref, hid_ref,
                  gx_f_ref, gx_b_ref, h_f, c_f, h_b, c_b):
    CT, BT, Dp = xf_ref.shape
    Hp = h_f.shape[1]
    b = pl.program_id(0)
    c = pl.program_id(1)
    nc = pl.num_programs(1)

    # ---- init recurrent state at the first time-chunk of every batch tile ----
    @pl.when(c == 0)
    def _():
        h_f[...] = jnp.zeros_like(h_f)
        c_f[...] = jnp.zeros_like(c_f)
        h_b[...] = jnp.zeros_like(h_b)
        c_b[...] = jnp.zeros_like(c_b)

    ml = maxlen_ref[b]                               # max valid length in this batch tile (SMEM)
    fwd_alive = (c * CT) < ml
    bwd_alive = ((nc - 1 - c) * CT) < ml
    alive = jnp.logical_or(fwd_alive, bwd_alive)

    lens = lens_ref[...]                             # [BT, 1] int32

    @pl.when(alive)
    def _():
        # ---- hoisted input projection: one big bf16 MXU matmul per direction ----
        xf = xf_ref[...].reshape(CT * BT, Dp)
        xb = xb_ref[...].reshape(CT * BT, Dp)
        gx_f_ref[...] = (jnp.dot(xf, wih_f_ref[...],
                                 preferred_element_type=jnp.float32)
                         + b_f_ref[...]).astype(jnp.bfloat16).reshape(CT, BT, 4 * Hp)
        gx_b_ref[...] = (jnp.dot(xb, wih_b_ref[...],
                                 preferred_element_type=jnp.float32)
                         + b_b_ref[...]).astype(jnp.bfloat16).reshape(CT, BT, 4 * Hp)

        def gates(g, c_prev):                        # PyTorch gate order i, f, g, o
            i = jax.nn.sigmoid(g[:, 0 * Hp:1 * Hp])
            f = jax.nn.sigmoid(g[:, 1 * Hp:2 * Hp])
            gg = jnp.tanh(g[:, 2 * Hp:3 * Hp])
            o = jax.nn.sigmoid(g[:, 3 * Hp:4 * Hp])
            c_new = f * c_prev + i * gg
            return o * jnp.tanh(c_new), c_new

        # TODO(synk): keep W_hh resident in MXU weight registers across the time
        # loop (pltpu.matmul_push_rhs / matmul_acc_lhs) instead of re-streaming it.
        def step(t, carry):
            # ---- forward direction: global time c*CT + t ----
            m_f = (c * CT + t) < lens
            g_f = gx_f_ref[t].astype(jnp.float32) + jnp.dot(
                h_f[...].astype(jnp.bfloat16), whh_f_ref[...],
                preferred_element_type=jnp.float32)
            hn_f, cn_f = gates(g_f, c_f[...])
            h_f[...] = jnp.where(m_f, hn_f, h_f[...])
            c_f[...] = jnp.where(m_f, cn_f, c_f[...])
            out_f_ref[t] = jnp.where(m_f, hn_f, 0.0).astype(jnp.bfloat16)

            # ---- backward direction: mirrored chunk, local index CT-1-t ----
            s = CT - 1 - t
            m_b = ((nc - 1 - c) * CT + s) < lens
            g_b = gx_b_ref[s].astype(jnp.float32) + jnp.dot(
                h_b[...].astype(jnp.bfloat16), whh_b_ref[...],
                preferred_element_type=jnp.float32)
            hn_b, cn_b = gates(g_b, c_b[...])
            h_b[...] = jnp.where(m_b, hn_b, h_b[...])
            c_b[...] = jnp.where(m_b, cn_b, c_b[...])
            out_b_ref[s] = jnp.where(m_b, hn_b, 0.0).astype(jnp.bfloat16)
            return carry

        jax.lax.fori_loop(0, CT, step, 0, unroll=min(CT, 8))

    @pl.when(jnp.logical_not(alive))
    def _():
        # chunk lies entirely in the padded region for both directions
        out_f_ref[...] = jnp.zeros_like(out_f_ref)
        out_b_ref[...] = jnp.zeros_like(out_b_ref)

    # final hidden states (PyTorch h_n layout [2, B, H]); written every chunk for
    # robustness -- the value surviving the last time chunk is the final state.
    hid_ref[0] = h_f[...]
    hid_ref[1] = h_b[...]


def pblstm_forward(x, inp_lens, params, *, time_chunk=None):
    """Equivalent of pBLSTM.forward: x [B, S, I], inp_lens [B] ->
    (out [B, S//2, 2H], out_lens [B], hidden [2, B, H])."""
    bs, seq_len, idim = x.shape
    factor = 2
    if seq_len % factor != 0:
        x = x[:, :-(seq_len % factor), :]
        seq_len = x.shape[1]
    out_lens = (inp_lens // factor).astype(jnp.int32)

    T = seq_len // factor
    Din = factor * idim
    H = params["whh_f"].shape[0]

    # -------- padded geometry (per-generation VMEM budget) --------
    cap = _vmem_capacity_bytes()
    BT = _choose_batch_tile(bs)
    Bp = _round_up(bs, BT)
    Dp = _round_up(Din, _LANE)
    Hp = _round_up(H, _LANE)
    CT = time_chunk if time_chunk is not None else _choose_time_chunk(
        T, BT, Dp, Hp, int(cap * 0.6))
    CT = max(1, min(CT, T))
    Tp = _round_up(T, CT)
    nb = Bp // BT
    nc = Tp // CT

    # -------- pyramid reshape -> time-major, padded, bf16 --------
    new_x = x.reshape(bs, T, Din)
    xt = jnp.transpose(new_x, (1, 0, 2))                       # [T, bs, Din]
    xt = jnp.pad(xt.astype(jnp.bfloat16),
                 ((0, Tp - T), (0, Bp - bs), (0, Dp - Din)))

    lens = jnp.zeros((Bp, 1), jnp.int32).at[:bs, 0].set(out_lens)
    maxlen = jnp.max(lens[:, 0].reshape(nb, BT), axis=1).astype(jnp.int32)

    # -------- pad parameters: each H-wide gate block -> Hp (lane aligned) ----
    def pad_cols(w):
        blocks = [jnp.pad(w[:, k * H:(k + 1) * H], ((0, 0), (0, Hp - H)))
                  for k in range(4)]
        return jnp.concatenate(blocks, axis=1)

    wih_f = jnp.pad(pad_cols(params["wih_f"]),
                    ((0, Dp - Din), (0, 0))).astype(jnp.bfloat16)
    wih_b = jnp.pad(pad_cols(params["wih_b"]),
                    ((0, Dp - Din), (0, 0))).astype(jnp.bfloat16)
    whh_f = jnp.pad(pad_cols(params["whh_f"]),
                    ((0, Hp - H), (0, 0))).astype(jnp.bfloat16)
    whh_b = jnp.pad(pad_cols(params["whh_b"]),
                    ((0, Hp - H), (0, 0))).astype(jnp.bfloat16)
    b_f = pad_cols(params["b_f"]).astype(jnp.float32)
    b_b = pad_cols(params["b_b"]).astype(jnp.float32)

    out_shapes = (
        jax.ShapeDtypeStruct((Tp, Bp, Hp), jnp.bfloat16),   # forward outputs
        jax.ShapeDtypeStruct((Tp, Bp, Hp), jnp.bfloat16),   # backward outputs
        jax.ShapeDtypeStruct((2, Bp, Hp), jnp.float32),     # final hidden states
    )

    # index_maps receive the scalar-prefetch ref (maxlen) as a trailing arg
    def im_fwd(b, c, ml): return (c, b, 0)
    def im_bwd(b, c, ml): return (nc - 1 - c, b, 0)
    def im_w(b, c, ml): return (0, 0)

    grid_spec = pltpu.PrefetchScalarGridSpec(
        num_scalar_prefetch=1,
        grid=(nb, nc),
        in_specs=[
            pl.BlockSpec((BT, 1), lambda b, c, ml: (b, 0)),    # lengths
            pl.BlockSpec((CT, BT, Dp), im_fwd),                # x, forward chunks
            pl.BlockSpec((CT, BT, Dp), im_bwd),                # x, backward chunks
            # TODO(synk): pipeline_mode=pl.Buffered(1) on these constant-index
            # weight blocks would reclaim one VMEM buffer copy per weight.
            pl.BlockSpec((Dp, 4 * Hp), im_w),                  # W_ih forward
            pl.BlockSpec((Hp, 4 * Hp), im_w),                  # W_hh forward
            pl.BlockSpec((1, 4 * Hp), im_w),                   # bias forward
            pl.BlockSpec((Dp, 4 * Hp), im_w),                  # W_ih backward
            pl.BlockSpec((Hp, 4 * Hp), im_w),                  # W_hh backward
            pl.BlockSpec((1, 4 * Hp), im_w),                   # bias backward
        ],
        out_specs=(
            pl.BlockSpec((CT, BT, Hp), im_fwd),
            pl.BlockSpec((CT, BT, Hp), im_bwd),
            pl.BlockSpec((2, BT, Hp), lambda b, c, ml: (0, b, 0)),
        ),
        scratch_shapes=[
            pltpu.VMEM((CT, BT, 4 * Hp), jnp.bfloat16),   # gx forward (per chunk)
            pltpu.VMEM((CT, BT, 4 * Hp), jnp.bfloat16),   # gx backward (per chunk)
            pltpu.VMEM((BT, Hp), jnp.float32),            # h forward
            pltpu.VMEM((BT, Hp), jnp.float32),            # c forward
            pltpu.VMEM((BT, Hp), jnp.float32),            # h backward
            pltpu.VMEM((BT, Hp), jnp.float32),            # c backward
        ],
    )

    out_f, out_b, hidden = pl.pallas_call(
        pblstm_kernel,
        out_shape=out_shapes,
        grid_spec=grid_spec,
        compiler_params=pltpu.CompilerParams(
            dimension_semantics=("parallel", "arbitrary"),
            vmem_limit_bytes=int(cap * 0.8),
        ),
    )(maxlen, lens, xt, xt, wih_f, whh_f, b_f, wih_b, whh_b, b_b)

    # TODO(synk): the fwd/bwd feature concat (and time-major transposes) stay in
    # the wrapper; fusing them into the kernel would need per-step strided stores.
    out = jnp.concatenate([out_f[:T, :bs, :H], out_b[:T, :bs, :H]], axis=-1)
    out = jnp.transpose(out, (1, 0, 2)).astype(jnp.float32)    # [B, T, 2H]
    hidden = hidden[:, :bs, :H]
    return out, out_lens, hidden


def init_params(key, input_dim, hidden_dim, factor=2):
    """Deterministic synthetic parameters matching torch.nn.LSTM(2*input_dim,
    hidden_dim, num_layers=1, bidirectional=True). Weights are pre-transposed
    ([Din,4H], [H,4H]); the two PyTorch biases (b_ih, b_hh) are pre-summed."""
    Din = factor * input_dim
    H = hidden_dim
    bound = 1.0 / float(H) ** 0.5
    keys = jax.random.split(key, 8)

    def u(k_, shape):
        return jax.random.uniform(k_, shape, jnp.float32, -bound, bound)

    return dict(
        wih_f=u(keys[0], (Din, 4 * H)),
        whh_f=u(keys[1], (H, 4 * H)),
        b_f=u(keys[2], (1, 4 * H)) + u(keys[3], (1, 4 * H)),
        wih_b=u(keys[4], (Din, 4 * H)),
        whh_b=u(keys[5], (H, 4 * H)),
        b_b=u(keys[6], (1, 4 * H)) + u(keys[7], (1, 4 * H)),
    )


def _pblstm_reference(x, inp_lens, params):
    """Pure-JAX f32 reference with identical packed-sequence semantics."""
    bs, seq_len, _ = x.shape
    if seq_len % 2 != 0:
        x = x[:, :-(seq_len % 2), :]
    lens = (inp_lens // 2).astype(jnp.int32)
    T = x.shape[1] // 2
    xs = x.reshape(bs, T, -1).astype(jnp.float32)
    H = params["whh_f"].shape[0]

    def cell(x_t, h, c, wih, whh, b):
        g = x_t @ wih + h @ whh + b
        i = jax.nn.sigmoid(g[:, 0 * H:1 * H])
        f = jax.nn.sigmoid(g[:, 1 * H:2 * H])
        gg = jnp.tanh(g[:, 2 * H:3 * H])
        o = jax.nn.sigmoid(g[:, 3 * H:4 * H])
        c_new = f * c + i * gg
        return o * jnp.tanh(c_new), c_new

    h_f = jnp.zeros((bs, H)); c_f = jnp.zeros((bs, H))
    h_b = jnp.zeros((bs, H)); c_b = jnp.zeros((bs, H))
    out_f, out_b = [], [None] * T
    for t in range(T):
        m = (t < lens)[:, None]
        hn, cn = cell(xs[:, t], h_f, c_f,
                      params["wih_f"], params["whh_f"], params["b_f"])
        h_f = jnp.where(m, hn, h_f); c_f = jnp.where(m, cn, c_f)
        out_f.append(jnp.where(m, hn, 0.0))
    for t in range(T - 1, -1, -1):
        m = (t < lens)[:, None]
        hn, cn = cell(xs[:, t], h_b, c_b,
                      params["wih_b"], params["whh_b"], params["b_b"])
        h_b = jnp.where(m, hn, h_b); c_b = jnp.where(m, cn, c_b)
        out_b[t] = jnp.where(m, hn, 0.0)
    out = jnp.concatenate([jnp.stack(out_f, 1), jnp.stack(out_b, 1)], axis=-1)
    hidden = jnp.stack([h_f, h_b], axis=0)
    return out, lens, hidden


if __name__ == "__main__":
    key = jax.random.PRNGKey(0)
    bs, seq_len, input_dim, hidden_dim = 2, 8, 16, 32

    kx, kp = jax.random.split(key)
    x = jax.random.normal(kx, (bs, seq_len, input_dim), jnp.float32)
    # lengths must be descending (pack_padded_sequence enforce_sorted=True default)
    inp_lens = jnp.array([8, 6], dtype=jnp.int32)
    params = init_params(kp, input_dim, hidden_dim)

    fwd = jax.jit(pblstm_forward, static_argnames=("time_chunk",))
    out, out_lens, hidden = fwd(x, inp_lens, params)
    jax.block_until_ready((out, out_lens, hidden))

    assert out.shape == (bs, seq_len // 2, 2 * hidden_dim)
    assert hidden.shape == (2, bs, hidden_dim)
    assert out_lens.shape == (bs,)

    # loose-tolerance check against a pure-JAX f32 reference (kernel matmuls,
    # gate-projection scratch and outputs are bf16)
    ref_out, ref_lens, ref_hid = _pblstm_reference(x, inp_lens, params)
    assert float(jnp.max(jnp.abs(out - ref_out))) < 5e-2
    assert float(jnp.max(jnp.abs(hidden - ref_hid))) < 5e-2
    assert bool(jnp.all(out_lens == ref_lens))

    # second config: ragged lengths + forced multi-chunk grid to exercise the
    # cross-chunk state carry and the dead-chunk skip path.
    bs2, seq2 = 4, 16
    x2 = jax.random.normal(jax.random.PRNGKey(1), (bs2, seq2, input_dim), jnp.float32)
    inp_lens2 = jnp.array([4, 4, 3, 2], dtype=jnp.int32)
    out2, lens2, hid2 = fwd(x2, inp_lens2, params, time_chunk=2)
    jax.block_until_ready((out2, lens2, hid2))
    ref_out2, ref_lens2, ref_hid2 = _pblstm_reference(x2, inp_lens2, params)
    assert float(jnp.max(jnp.abs(out2 - ref_out2))) < 5e-2
    assert float(jnp.max(jnp.abs(hid2 - ref_hid2))) < 5e-2
    assert bool(jnp.all(lens2 == ref_lens2))

    print("KERNEL_OK")
</pallas_src>

<mosaic_0001>
module attributes {stable_mosaic.version = 11 : i64} {
  func.func @pblstm_kernel(%arg0: i32, %arg1: i32, %arg2: memref<1xi32, #tpu.memory_space<smem>>, %arg3: memref<8x1xi32, #tpu.memory_space<vmem>>, %arg4: memref<4x8x128xbf16, #tpu.memory_space<vmem>>, %arg5: memref<4x8x128xbf16, #tpu.memory_space<vmem>>, %arg6: memref<128x512xbf16, #tpu.memory_space<vmem>>, %arg7: memref<128x512xbf16, #tpu.memory_space<vmem>>, %arg8: memref<1x512xf32, #tpu.memory_space<vmem>>, %arg9: memref<128x512xbf16, #tpu.memory_space<vmem>>, %arg10: memref<128x512xbf16, #tpu.memory_space<vmem>>, %arg11: memref<1x512xf32, #tpu.memory_space<vmem>>, %arg12: memref<4x8x128xbf16, #tpu.memory_space<vmem>>, %arg13: memref<4x8x128xbf16, #tpu.memory_space<vmem>>, %arg14: memref<2x8x128xf32, #tpu.memory_space<vmem>>, %arg15: memref<4x8x512xbf16, #tpu.memory_space<vmem>>, %arg16: memref<4x8x512xbf16, #tpu.memory_space<vmem>>, %arg17: memref<8x128xf32, #tpu.memory_space<vmem>>, %arg18: memref<8x128xf32, #tpu.memory_space<vmem>>, %arg19: memref<8x128xf32, #tpu.memory_space<vmem>>, %arg20: memref<8x128xf32, #tpu.memory_space<vmem>>) attributes {dimension_semantics = [#tpu.dimension_semantics<parallel>, #tpu.dimension_semantics<arbitrary>], iteration_bounds = array<i64: 1, 1>, scalar_prefetch = 1 : i64, scratch_operands = 6 : i64, tpu.core_type = #tpu.core_type<tc>, window_params = [{transform_indices = @transform_0, window_bounds = array<i64: 8, 1>}, {transform_indices = @transform_1, window_bounds = array<i64: 4, 8, 128>}, {transform_indices = @transform_2, window_bounds = array<i64: 4, 8, 128>}, {pipeline_mode = #tpu.pipeline_mode<synchronous>, transform_indices = @transform_3, window_bounds = array<i64: 128, 512>}, {pipeline_mode = #tpu.pipeline_mode<synchronous>, transform_indices = @transform_4, window_bounds = array<i64: 128, 512>}, {pipeline_mode = #tpu.pipeline_mode<synchronous>, transform_indices = @transform_5, window_bounds = array<i64: 1, 512>}, {pipeline_mode = #tpu.pipeline_mode<synchronous>, transform_indices = @transform_6, window_bounds = array<i64: 128, 512>}, {pipeline_mode = #tpu.pipeline_mode<synchronous>, transform_indices = @transform_7, window_bounds = array<i64: 128, 512>}, {pipeline_mode = #tpu.pipeline_mode<synchronous>, transform_indices = @transform_8, window_bounds = array<i64: 1, 512>}, {transform_indices = @transform_9, window_bounds = array<i64: 4, 8, 128>}, {transform_indices = @transform_10, window_bounds = array<i64: 4, 8, 128>}, {transform_indices = @transform_11, window_bounds = array<i64: 2, 8, 128>}]} {
    %c0_i32 = arith.constant 0 : i32
    %0 = arith.cmpi eq, %arg1, %c0_i32 : i32
    %1 = arith.extui %0 : i1 to i32
    %c0_i32_0 = arith.constant 0 : i32
    %2 = arith.cmpi ne, %1, %c0_i32_0 : i32
    scf.if %2 {
      %cst = arith.constant 0.000000e+00 : f32
      %25 = vector.broadcast %cst : f32 to vector<8x128xf32>
      %c0_15 = arith.constant 0 : index
      %c0_16 = arith.constant 0 : index
      %26 = vector.load %arg17[%c0_15, %c0_16] : memref<8x128xf32, #tpu.memory_space<vmem>>, vector<8x128xf32>
      tpu.vector_store %arg17[%c0_15, %c0_16], %25 {strides = array<i32>} : memref<8x128xf32, #tpu.memory_space<vmem>>, vector<8x128xf32>,
      %cst_17 = arith.constant 0.000000e+00 : f32
      %27 = vector.broadcast %cst_17 : f32 to vector<8x128xf32>
      %c0_18 = arith.constant 0 : index
      %c0_19 = arith.constant 0 : index
      %28 = vector.load %arg18[%c0_18, %c0_19] : memref<8x128xf32, #tpu.memory_space<vmem>>, vector<8x128xf32>
      tpu.vector_store %arg18[%c0_18, %c0_19], %27 {strides = array<i32>} : memref<8x128xf32, #tpu.memory_space<vmem>>, vector<8x128xf32>,
      %cst_20 = arith.constant 0.000000e+00 : f32
      %29 = vector.broadcast %cst_20 : f32 to vector<8x128xf32>
      %c0_21 = arith.constant 0 : index
      %c0_22 = arith.constant 0 : index
      %30 = vector.load %arg19[%c0_21, %c0_22] : memref<8x128xf32, #tpu.memory_space<vmem>>, vector<8x128xf32>
      tpu.vector_store %arg19[%c0_21, %c0_22], %29 {strides = array<i32>} : memref<8x128xf32, #tpu.memory_space<vmem>>, vector<8x128xf32>,
      %cst_23 = arith.constant 0.000000e+00 : f32
      %31 = vector.broadcast %cst_23 : f32 to vector<8x128xf32>
      %c0_24 = arith.constant 0 : index
      %c0_25 = arith.constant 0 : index
      %32 = vector.load %arg20[%c0_24, %c0_25] : memref<8x128xf32, #tpu.memory_space<vmem>>, vector<8x128xf32>
      tpu.vector_store %arg20[%c0_24, %c0_25], %31 {strides = array<i32>} : memref<8x128xf32, #tpu.memory_space<vmem>>, vector<8x128xf32>,
    } else {
    }
    %3 = arith.index_cast %arg0 : i32 to index
    %4 = memref.load %arg2[%3] : memref<1xi32, #tpu.memory_space<smem>>
    %c4_i32 = arith.constant 4 : i32
    %5 = arith.muli %arg1, %c4_i32 : i32
    %6 = arith.cmpi slt, %5, %4 : i32
    %c0_i32_1 = arith.constant 0 : i32
    %7 = arith.subi %c0_i32_1, %arg1 : i32
    %c4_i32_2 = arith.constant 4 : i32
    %8 = arith.muli %7, %c4_i32_2 : i32
    %9 = arith.cmpi slt, %8, %4 : i32
    %10 = arith.ori %6, %9 : i1
    %c0 = arith.constant 0 : index
    %c0_3 = arith.constant 0 : index
    %11 = vector.load %arg3[%c0, %c0_3] : memref<8x1xi32, #tpu.memory_space<vmem>>, vector<8x1xi32>
    %12 = arith.extui %10 : i1 to i32
    %c0_i32_4 = arith.constant 0 : i32
    %13 = arith.cmpi ne, %12, %c0_i32_4 : i32
    scf.if %13 {
      %c0_15 = arith.constant 0 : index
      %c0_16 = arith.constant 0 : index
      %c0_17 = arith.constant 0 : index
      %25 = vector.load %arg4[%c0_15, %c0_16, %c0_17] : memref<4x8x128xbf16, #tpu.memory_space<vmem>>, vector<4x8x128xbf16>
      %26 = vector.shape_cast %25 : vector<4x8x128xbf16> to vector<32x128xbf16>
      %c0_18 = arith.constant 0 : index
      %c0_19 = arith.constant 0 : index
      %c0_20 = arith.constant 0 : index
      %27 = vector.load %arg5[%c0_18, %c0_19, %c0_20] : memref<4x8x128xbf16, #tpu.memory_space<vmem>>, vector<4x8x128xbf16>
      %28 = vector.shape_cast %27 : vector<4x8x128xbf16> to vector<32x128xbf16>
      %c0_21 = arith.constant 0 : index
      %c0_22 = arith.constant 0 : index
      %29 = vector.load %arg6[%c0_21, %c0_22] : memref<128x512xbf16, #tpu.memory_space<vmem>>, vector<128x512xbf16>
      %cst = arith.constant dense<0.000000e+00> : vector<32x512xf32>
      %30 = tpu.matmul %26, %29, %cst {dimension_numbers = #tpu.dot_dimension_numbers<[1], [0], [0], [1], [0, 0, 1, 1], [], []>} : vector<32x128xbf16>, vector<128x512xbf16>, vector<32x512xf32> -> vector<32x512xf32>
      %c0_23 = arith.constant 0 : index
      %c0_24 = arith.constant 0 : index
      %31 = vector.load %arg8[%c0_23, %c0_24] : memref<1x512xf32, #tpu.memory_space<vmem>>, vector<1x512xf32>
      %32 = vector.broadcast %31 : vector<1x512xf32> to vector<32x512xf32>
      %33 = arith.addf %30, %32 : vector<32x512xf32>
      %34 = arith.truncf %33 : vector<32x512xf32> to vector<32x512xbf16>
      %35 = vector.shape_cast %34 : vector<32x512xbf16> to vector<4x8x512xbf16>
      %c0_25 = arith.constant 0 : index
      %c0_26 = arith.constant 0 : index
      %c0_27 = arith.constant 0 : index
      %36 = vector.load %arg15[%c0_25, %c0_26, %c0_27] : memref<4x8x512xbf16, #tpu.memory_space<vmem>>, vector<4x8x512xbf16>
      tpu.vector_store %arg15[%c0_25, %c0_26, %c0_27], %35 {strides = array<i32>} : memref<4x8x512xbf16, #tpu.memory_space<vmem>>, vector<4x8x512xbf16>,
      %c0_28 = arith.constant 0 : index
      %c0_29 = arith.constant 0 : index
      %37 = vector.load %arg9[%c0_28, %c0_29] : memref<128x512xbf16, #tpu.memory_space<vmem>>, vector<128x512xbf16>
      %cst_30 = arith.constant dense<0.000000e+00> : vector<32x512xf32>
      %38 = tpu.matmul %28, %37, %cst_30 {dimension_numbers = #tpu.dot_dimension_numbers<[1], [0], [0], [1], [0, 0, 1, 1], [], []>} : vector<32x128xbf16>, vector<128x512xbf16>, vector<32x512xf32> -> vector<32x512xf32>
      %c0_31 = arith.constant 0 : index
      %c0_32 = arith.constant 0 : index
      %39 = vector.load %arg11[%c0_31, %c0_32] : memref<1x512xf32, #tpu.memory_space<vmem>>, vector<1x512xf32>
      %40 = vector.broadcast %39 : vector<1x512xf32> to vector<32x512xf32>
      %41 = arith.addf %38, %40 : vector<32x512xf32>
      %42 = arith.truncf %41 : vector<32x512xf32> to vector<32x512xbf16>
      %43 = vector.shape_cast %42 : vector<32x512xbf16> to vector<4x8x512xbf16>
      %c0_33 = arith.constant 0 : index
      %c0_34 = arith.constant 0 : index
      %c0_35 = arith.constant 0 : index
      %44 = vector.load %arg16[%c0_33, %c0_34, %c0_35] : memref<4x8x512xbf16, #tpu.memory_space<vmem>>, vector<4x8x512xbf16>
      tpu.vector_store %arg16[%c0_33, %c0_34, %c0_35], %43 {strides = array<i32>} : memref<4x8x512xbf16, #tpu.memory_space<vmem>>, vector<4x8x512xbf16>,
      %c0_i32_36 = arith.constant 0 : i32
      %c4_i32_37 = arith.constant 4 : i32
      %45 = arith.muli %arg1, %c4_i32_37 : i32
      %46 = arith.addi %45, %c0_i32_36 : i32
      %47 = vector.broadcast %46 : i32 to vector<8x1xi32>
      %48 = arith.cmpi slt, %47, %11 : vector<8x1xi32>
      %49 = arith.index_cast %c0_i32_36 : i32 to index
      %c0_38 = arith.constant 0 : index
      %c0_39 = arith.constant 0 : index
      %50 = vector.load %arg15[%49, %c0_38, %c0_39] : memref<4x8x512xbf16, #tpu.memory_space<vmem>>, vector<1x8x512xbf16>
      %51 = vector.shape_cast %50 : vector<1x8x512xbf16> to vector<8x512xbf16>
      %52 = arith.extf %51 : vector<8x512xbf16> to vector<8x512xf32>
      %c0_40 = arith.constant 0 : index
      %c0_41 = arith.constant 0 : index
      %53 = vector.load %arg17[%c0_40, %c0_41] : memref<8x128xf32, #tpu.memory_space<vmem>>, vector<8x128xf32>
      %54 = arith.truncf %53 : vector<8x128xf32> to vector<8x128xbf16>
      %c0_42 = arith.constant 0 : index
      %c0_43 = arith.constant 0 : index
      %55 = vector.load %arg7[%c0_42, %c0_43] : memref<128x512xbf16, #tpu.memory_space<vmem>>, vector<128x512xbf16>
      %cst_44 = arith.constant dense<0.000000e+00> : vector<8x512xf32>
      %56 = tpu.matmul %54, %55, %cst_44 {dimension_numbers = #tpu.dot_dimension_numbers<[1], [0], [0], [1], [0, 0, 1, 1], [], []>} : vector<8x128xbf16>, vector<128x512xbf16>, vector<8x512xf32> -> vector<8x512xf32>
      %57 = arith.addf %52, %56 : vector<8x512xf32>
      %c0_45 = arith.constant 0 : index
      %c0_46 = arith.constant 0 : index
      %58 = vector.load %arg18[%c0_45, %c0_46] : memref<8x128xf32, #tpu.memory_space<vmem>>, vector<8x128xf32>
      %59 = vector.extract_strided_slice %57 {offsets = [0, 0], sizes = [8, 128], strides = [1, 1]} : vector<8x512xf32> to vector<8x128xf32>
      %60 = arith.negf %59 : vector<8x128xf32>
      %61 = math.exp %60 : vector<8x128xf32>
      %cst_47 = arith.constant 1.000000e+00 : f32
      %62 = vector.broadcast %cst_47 : f32 to vector<8x128xf32>
      %63 = arith.addf %62, %61 : vector<8x128xf32>
      %64 = arith.divf %62, %63 : vector<8x128xf32>
      %65 = vector.extract_strided_slice %57 {offsets = [0, 128], sizes = [8, 128], strides = [1, 1]} : vector<8x512xf32> to vector<8x128xf32>
      %66 = arith.negf %65 : vector<8x128xf32>
      %67 = math.exp %66 : vector<8x128xf32>
      %cst_48 = arith.constant 1.000000e+00 : f32
      %68 = vector.broadcast %cst_48 : f32 to vector<8x128xf32>
      %69 = arith.addf %68, %67 : vector<8x128xf32>
      %70 = arith.divf %68, %69 : vector<8x128xf32>
      %71 = vector.extract_strided_slice %57 {offsets = [0, 256], sizes = [8, 128], strides = [1, 1]} : vector<8x512xf32> to vector<8x128xf32>
      %72 = math.tanh %71 : vector<8x128xf32>
      %73 = vector.extract_strided_slice %57 {offsets = [0, 384], sizes = [8, 128], strides = [1, 1]} : vector<8x512xf32> to vector<8x128xf32>
      %74 = arith.negf %73 : vector<8x128xf32>
      %75 = math.exp %74 : vector<8x128xf32>
      %cst_49 = arith.constant 1.000000e+00 : f32
      %76 = vector.broadcast %cst_49 : f32 to vector<8x128xf32>
      %77 = arith.addf %76, %75 : vector<8x128xf32>
      %78 = arith.divf %76, %77 : vector<8x128xf32>
      %79 = arith.mulf %70, %58 : vector<8x128xf32>
      %80 = arith.mulf %64, %72 : vector<8x128xf32>
      %81 = arith.addf %79, %80 : vector<8x128xf32>
      %82 = math.tanh %81 : vector<8x128xf32>
      %83 = arith.mulf %78, %82 : vector<8x128xf32>
      %c0_50 = arith.constant 0 : index
      %c0_51 = arith.constant 0 : index
      %84 = vector.load %arg17[%c0_50, %c0_51] : memref<8x128xf32, #tpu.memory_space<vmem>>, vector<8x128xf32>
      %85 = vector.shape_cast %48 : vector<8x1xi1> to vector<8x1xi1>
      %86 = vector.broadcast %85 : vector<8x1xi1> to vector<8x128xi1>
      %87 = arith.select %86, %83, %84 : vector<8x128xi1>, vector<8x128xf32>
      %c0_52 = arith.constant 0 : index
      %c0_53 = arith.constant 0 : index
      %88 = vector.load %arg17[%c0_52, %c0_53] : memref<8x128xf32, #tpu.memory_space<vmem>>, vector<8x128xf32>
      tpu.vector_store %arg17[%c0_52, %c0_53], %87 {strides = array<i32>} : memref<8x128xf32, #tpu.memory_space<vmem>>, vector<8x128xf32>,
      %c0_54 = arith.constant 0 : index
      %c0_55 = arith.constant 0 : index
      %89 = vector.load %arg18[%c0_54, %c0_55] : memref<8x128xf32, #tpu.memory_space<vmem>>, vector<8x128xf32>
      %90 = vector.shape_cast %48 : vector<8x1xi1> to vector<8x1xi1>
      %91 = vector.broadcast %90 : vector<8x1xi1> to vector<8x128xi1>
      %92 = arith.select %91, %81, %89 : vector<8x128xi1>, vector<8x128xf32>
      %c0_56 = arith.constant 0 : index
      %c0_57 = arith.constant 0 : index
      %93 = vector.load %arg18[%c0_56, %c0_57] : memref<8x128xf32, #tpu.memory_space<vmem>>, vector<8x128xf32>
      tpu.vector_store %arg18[%c0_56, %c0_57], %92 {strides = array<i32>} : memref<8x128xf32, #tpu.memory_space<vmem>>, vector<8x128xf32>,
      %cst_58 = arith.constant 0.000000e+00 : f32
      %94 = vector.shape_cast %48 : vector<8x1xi1> to vector<8x1xi1>
      %95 = vector.broadcast %94 : vector<8x1xi1> to vector<8x128xi1>
      %96 = vector.broadcast %cst_58 : f32 to vector<8x128xf32>
      %97 = arith.select %95, %83, %96 : vector<8x128xi1>, vector<8x128xf32>
      %98 = arith.truncf %97 : vector<8x128xf32> to vector<8x128xbf16>
      %99 = arith.index_cast %c0_i32_36 : i32 to index
      %c0_59 = arith.constant 0 : index
      %c0_60 = arith.constant 0 : index
      %100 = vector.load %arg12[%99, %c0_59, %c0_60] : memref<4x8x128xbf16, #tpu.memory_space<vmem>>, vector<1x8x128xbf16>
      %101 = vector.shape_cast %100 : vector<1x8x128xbf16> to vector<8x128xbf16>
      %102 = vector.shape_cast %98 : vector<8x128xbf16> to vector<1x8x128xbf16>
      tpu.vector_store %arg12[%99, %c0_59, %c0_60], %102 {strides = array<i32>} : memref<4x8x128xbf16, #tpu.memory_space<vmem>>, vector<1x8x128xbf16>,
      %c3_i32 = arith.constant 3 : i32
      %103 = arith.subi %c3_i32, %c0_i32_36 : i32
      %c0_i32_61 = arith.constant 0 : i32
      %104 = arith.subi %c0_i32_61, %arg1 : i32
      %c4_i32_62 = arith.constant 4 : i32
      %105 = arith.muli %104, %c4_i32_62 : i32
      %106 = arith.addi %105, %103 : i32
      %107 = vector.broadcast %106 : i32 to vector<8x1xi32>
      %108 = arith.cmpi slt, %107, %11 : vector<8x1xi32>
      %109 = arith.index_cast %103 : i32 to index
      %c0_63 = arith.constant 0 : index
      %c0_64 = arith.constant 0 : index
      %110 = vector.load %arg16[%109, %c0_63, %c0_64] : memref<4x8x512xbf16, #tpu.memory_space<vmem>>, vector<1x8x512xbf16>
      %111 = vector.shape_cast %110 : vector<1x8x512xbf16> to vector<8x512xbf16>
      %112 = arith.extf %111 : vector<8x512xbf16> to vector<8x512xf32>
      %c0_65 = arith.constant 0 : index
      %c0_66 = arith.constant 0 : index
      %113 = vector.load %arg19[%c0_65, %c0_66] : memref<8x128xf32, #tpu.memory_space<vmem>>, vector<8x128xf32>
      %114 = arith.truncf %113 : vector<8x128xf32> to vector<8x128xbf16>
      %c0_67 = arith.constant 0 : index
      %c0_68 = arith.constant 0 : index
      %115 = vector.load %arg10[%c0_67, %c0_68] : memref<128x512xbf16, #tpu.memory_space<vmem>>, vector<128x512xbf16>
      %cst_69 = arith.constant dense<0.000000e+00> : vector<8x512xf32>
      %116 = tpu.matmul %114, %115, %cst_69 {dimension_numbers = #tpu.dot_dimension_numbers<[1], [0], [0], [1], [0, 0, 1, 1], [], []>} : vector<8x128xbf16>, vector<128x512xbf16>, vector<8x512xf32> -> vector<8x512xf32>
      %117 = arith.addf %112, %116 : vector<8x512xf32>
      %c0_70 = arith.constant 0 : index
      %c0_71 = arith.constant 0 : index
      %118 = vector.load %arg20[%c0_70, %c0_71] : memref<8x128xf32, #tpu.memory_space<vmem>>, vector<8x128xf32>
      %119 = vector.extract_strided_slice %117 {offsets = [0, 0], sizes = [8, 128], strides = [1, 1]} : vector<8x512xf32> to vector<8x128xf32>
      %120 = arith.negf %119 : vector<8x128xf32>
      %121 = math.exp %120 : vector<8x128xf32>
      %cst_72 = arith.constant 1.000000e+00 : f32
      %122 = vector.broadcast %cst_72 : f32 to vector<8x128xf32>
      %123 = arith.addf %122, %121 : vector<8x128xf32>
      %124 = arith.divf %122, %123 : vector<8x128xf32>
      %125 = vector.extract_strided_slice %117 {offsets = [0, 128], sizes = [8, 128], strides = [1, 1]} : vector<8x512xf32> to vector<8x128xf32>
      %126 = arith.negf %125 : vector<8x128xf32>
      %127 = math.exp %126 : vector<8x128xf32>
      %cst_73 = arith.constant 1.000000e+00 : f32
      %128 = vector.broadcast %cst_73 : f32 to vector<8x128xf32>
      %129 = arith.addf %128, %127 : vector<8x128xf32>
      %130 = arith.divf %128, %129 : vector<8x128xf32>
      %131 = vector.extract_strided_slice %117 {offsets = [0, 256], sizes = [8, 128], strides = [1, 1]} : vector<8x512xf32> to vector<8x128xf32>
      %132 = math.tanh %131 : vector<8x128xf32>
      %133 = vector.extract_strided_slice %117 {offsets = [0, 384], sizes = [8, 128], strides = [1, 1]} : vector<8x512xf32> to vector<8x128xf32>
      %134 = arith.negf %133 : vector<8x128xf32>
      %135 = math.exp %134 : vector<8x128xf32>
      %cst_74 = arith.constant 1.000000e+00 : f32
      %136 = vector.broadcast %cst_74 : f32 to vector<8x128xf32>
      %137 = arith.addf %136, %135 : vector<8x128xf32>
      %138 = arith.divf %136, %137 : vector<8x128xf32>
      %139 = arith.mulf %130, %118 : vector<8x128xf32>
      %140 = arith.mulf %124, %132 : vector<8x128xf32>
      %141 = arith.addf %139, %140 : vector<8x128xf32>
      %142 = math.tanh %141 : vector<8x128xf32>
      %143 = arith.mulf %138, %142 : vector<8x128xf32>
      %c0_75 = arith.constant 0 : index
      %c0_76 = arith.constant 0 : index
      %144 = vector.load %arg19[%c0_75, %c0_76] : memref<8x128xf32, #tpu.memory_space<vmem>>, vector<8x128xf32>
      %145 = vector.shape_cast %108 : vector<8x1xi1> to vector<8x1xi1>
      %146 = vector.broadcast %145 : vector<8x1xi1> to vector<8x128xi1>
      %147 = arith.select %146, %143, %144 : vector<8x128xi1>, vector<8x128xf32>
      %c0_77 = arith.constant 0 : index
      %c0_78 = arith.constant 0 : index
      %148 = vector.load %arg19[%c0_77, %c0_78] : memref<8x128xf32, #tpu.memory_space<vmem>>, vector<8x128xf32>
      tpu.vector_store %arg19[%c0_77, %c0_78], %147 {strides = array<i32>} : memref<8x128xf32, #tpu.memory_space<vmem>>, vector<8x128xf32>,
      %c0_79 = arith.constant 0 : index
      %c0_80 = arith.constant 0 : index
      %149 = vector.load %arg20[%c0_79, %c0_80] : memref<8x128xf32, #tpu.memory_space<vmem>>, vector<8x128xf32>
      %150 = vector.shape_cast %108 : vector<8x1xi1> to vector<8x1xi1>
      %151 = vector.broadcast %150 : vector<8x1xi1> to vector<8x128xi1>
      %152 = arith.select %151, %141, %149 : vector<8x128xi1>, vector<8x128xf32>
      %c0_81 = arith.constant 0 : index
      %c0_82 = arith.constant 0 : index
      %153 = vector.load %arg20[%c0_81, %c0_82] : memref<8x128xf32, #tpu.memory_space<vmem>>, vector<8x128xf32>
      tpu.vector_store %arg20[%c0_81, %c0_82], %152 {strides = array<i32>} : memref<8x128xf32, #tpu.memory_space<vmem>>, vector<8x128xf32>,
      %cst_83 = arith.constant 0.000000e+00 : f32
      %154 = vector.shape_cast %108 : vector<8x1xi1> to vector<8x1xi1>
      %155 = vector.broadcast %154 : vector<8x1xi1> to vector<8x128xi1>
      %156 = vector.broadcast %cst_83 : f32 to vector<8x128xf32>
      %157 = arith.select %155, %143, %156 : vector<8x128xi1>, vector<8x128xf32>
      %158 = arith.truncf %157 : vector<8x128xf32> to vector<8x128xbf16>
      %159 = arith.index_cast %103 : i32 to index
      %c0_84 = arith.constant 0 : index
      %c0_85 = arith.constant 0 : index
      %160 = vector.load %arg13[%159, %c0_84, %c0_85] : memref<4x8x128xbf16, #tpu.memory_space<vmem>>, vector<1x8x128xbf16>
      %161 = vector.shape_cast %160 : vector<1x8x128xbf16> to vector<8x128xbf16>
      %162 = vector.shape_cast %158 : vector<8x128xbf16> to vector<1x8x128xbf16>
      tpu.vector_store %arg13[%159, %c0_84, %c0_85], %162 {strides = array<i32>} : memref<4x8x128xbf16, #tpu.memory_space<vmem>>, vector<1x8x128xbf16>,
      %c1_i32 = arith.constant 1 : i32
      %c4_i32_86 = arith.constant 4 : i32
      %163 = arith.muli %arg1, %c4_i32_86 : i32
      %164 = arith.addi %163, %c1_i32 : i32
      %165 = vector.broadcast %164 : i32 to vector<8x1xi32>
      %166 = arith.cmpi slt, %165, %11 : vector<8x1xi32>
      %167 = arith.index_cast %c1_i32 : i32 to index
      %c0_87 = arith.constant 0 : index
      %c0_88 = arith.constant 0 : index
      %168 = vector.load %arg15[%167, %c0_87, %c0_88] : memref<4x8x512xbf16, #tpu.memory_space<vmem>>, vector<1x8x512xbf16>
      %169 = vector.shape_cast %168 : vector<1x8x512xbf16> to vector<8x512xbf16>
      %170 = arith.extf %169 : vector<8x512xbf16> to vector<8x512xf32>
      %c0_89 = arith.constant 0 : index
      %c0_90 = arith.constant 0 : index
      %171 = vector.load %arg17[%c0_89, %c0_90] : memref<8x128xf32, #tpu.memory_space<vmem>>, vector<8x128xf32>
      %172 = arith.truncf %171 : vector<8x128xf32> to vector<8x128xbf16>
      %c0_91 = arith.constant 0 : index
      %c0_92 = arith.constant 0 : index
      %173 = vector.load %arg7[%c0_91, %c0_92] : memref<128x512xbf16, #tpu.memory_space<vmem>>, vector<128x512xbf16>
      %cst_93 = arith.constant dense<0.000000e+00> : vector<8x512xf32>
      %174 = tpu.matmul %172, %173, %cst_93 {dimension_numbers = #tpu.dot_dimension_numbers<[1], [0], [0], [1], [0, 0, 1, 1], [], []>} : vector<8x128xbf16>, vector<128x512xbf16>, vector<8x512xf32> -> vector<8x512xf32>
      %175 = arith.addf %170, %174 : vector<8x512xf32>
      %c0_94 = arith.constant 0 : index
      %c0_95 = arith.constant 0 : index
      %176 = vector.load %arg18[%c0_94, %c0_95] : memref<8x128xf32, #tpu.memory_space<vmem>>, vector<8x128xf32>
      %177 = vector.extract_strided_slice %175 {offsets = [0, 0], sizes = [8, 128], strides = [1, 1]} : vector<8x512xf32> to vector<8x128xf32>
      %178 = arith.negf %177 : vector<8x128xf32>
      %179 = math.exp %178 : vector<8x128xf32>
      %cst_96 = arith.constant 1.000000e+00 : f32
      %180 = vector.broadcast %cst_96 : f32 to vector<8x128xf32>
      %181 = arith.addf %180, %179 : vector<8x128xf32>
      %182 = arith.divf %180, %181 : vector<8x128xf32>
      %183 = vector.extract_strided_slice %175 {offsets = [0, 128], sizes = [8, 128], strides = [1, 1]} : vector<8x512xf32> to vector<8x128xf32>
      %184 = arith.negf %183 : vector<8x128xf32>
      %185 = math.exp %184 : vector<8x128xf32>
      %cst_97 = arith.constant 1.000000e+00 : f32
      %186 = vector.broadcast %cst_97 : f32 to vector<8x128xf32>
      %187 = arith.addf %186, %185 : vector<8x128xf32>
      %188 = arith.divf %186, %187 : vector<8x128xf32>
      %189 = vector.extract_strided_slice %175 {offsets = [0, 256], sizes = [8, 128], strides = [1, 1]} : vector<8x512xf32> to vector<8x128xf32>
      %190 = math.tanh %189 : vector<8x128xf32>
      %191 = vector.extract_strided_slice %175 {offsets = [0, 384], sizes = [8, 128], strides = [1, 1]} : vector<8x512xf32> to vector<8x128xf32>
      %192 = arith.negf %191 : vector<8x128xf32>
      %193 = math.exp %192 : vector<8x128xf32>
      %cst_98 = arith.constant 1.000000e+00 : f32
      %194 = vector.broadcast %cst_98 : f32 to vector<8x128xf32>
      %195 = arith.addf %194, %193 : vector<8x128xf32>
      %196 = arith.divf %194, %195 : vector<8x128xf32>
      %197 = arith.mulf %188, %176 : vector<8x128xf32>
      %198 = arith.mulf %182, %190 : vector<8x128xf32>
      %199 = arith.addf %197, %198 : vector<8x128xf32>
      %200 = math.tanh %199 : vector<8x128xf32>
      %201 = arith.mulf %196, %200 : vector<8x128xf32>
      %c0_99 = arith.constant 0 : index
      %c0_100 = arith.constant 0 : index
      %202 = vector.load %arg17[%c0_99, %c0_100] : memref<8x128xf32, #tpu.memory_space<vmem>>, vector<8x128xf32>
      %203 = vector.shape_cast %166 : vector<8x1xi1> to vector<8x1xi1>
      %204 = vector.broadcast %203 : vector<8x1xi1> to vector<8x128xi1>
      %205 = arith.select %204, %201, %202 : vector<8x128xi1>, vector<8x128xf32>
      %c0_101 = arith.constant 0 : index
      %c0_102 = arith.constant 0 : index
      %206 = vector.load %arg17[%c0_101, %c0_102] : memref<8x128xf32, #tpu.memory_space<vmem>>, vector<8x128xf32>
      tpu.vector_store %arg17[%c0_101, %c0_102], %205 {strides = array<i32>} : memref<8x128xf32, #tpu.memory_space<vmem>>, vector<8x128xf32>,
      %c0_103 = arith.constant 0 : index
      %c0_104 = arith.constant 0 : index
      %207 = vector.load %arg18[%c0_103, %c0_104] : memref<8x128xf32, #tpu.memory_space<vmem>>, vector<8x128xf32>
      %208 = vector.shape_cast %166 : vector<8x1xi1> to vector<8x1xi1>
      %209 = vector.broadcast %208 : vector<8x1xi1> to vector<8x128xi1>
      %210 = arith.select %209, %199, %207 : vector<8x128xi1>, vector<8x128xf32>
      %c0_105 = arith.constant 0 : index
      %c0_106 = arith.constant 0 : index
      %211 = vector.load %arg18[%c0_105, %c0_106] : memref<8x128xf32, #tpu.memory_space<vmem>>, vector<8x128xf32>
      tpu.vector_store %arg18[%c0_105, %c0_106], %210 {strides = array<i32>} : memref<8x128xf32, #tpu.memory_space<vmem>>, vector<8x128xf32>,
      %cst_107 = arith.constant 0.000000e+00 : f32
      %212 = vector.shape_cast %166 : vector<8x1xi1> to vector<8x1xi1>
      %213 = vector.broadcast %212 : vector<8x1xi1> to vector<8x128xi1>
      %214 = vector.broadcast %cst_107 : f32 to vector<8x128xf32>
      %215 = arith.select %213, %201, %214 : vector<8x128xi1>, vector<8x128xf32>
      %216 = arith.truncf %215 : vector<8x128xf32> to vector<8x128xbf16>
      %217 = arith.index_cast %c1_i32 : i32 to index
      %c0_108 = arith.constant 0 : index
      %c0_109 = arith.constant 0 : index
      %218 = vector.load %arg12[%217, %c0_108, %c0_109] : memref<4x8x128xbf16, #tpu.memory_space<vmem>>, vector<1x8x128xbf16>
      %219 = vector.shape_cast %218 : vector<1x8x128xbf16> to vector<8x128xbf16>
      %220 = vector.shape_cast %216 : vector<8x128xbf16> to vector<1x8x128xbf16>
      tpu.vector_store %arg12[%217, %c0_108, %c0_109], %220 {strides = array<i32>} : memref<4x8x128xbf16, #tpu.memory_space<vmem>>, vector<1x8x128xbf16>,
      %c3_i32_110 = arith.constant 3 : i32
      %221 = arith.subi %c3_i32_110, %c1_i32 : i32
      %c0_i32_111 = arith.constant 0 : i32
      %222 = arith.subi %c0_i32_111, %arg1 : i32
      %c4_i32_112 = arith.constant 4 : i32
      %223 = arith.muli %222, %c4_i32_112 : i32
      %224 = arith.addi %223, %221 : i32
      %225 = vector.broadcast %224 : i32 to vector<8x1xi32>
      %226 = arith.cmpi slt, %225, %11 : vector<8x1xi32>
      %227 = arith.index_cast %221 : i32 to index
      %c0_113 = arith.constant 0 : index
      %c0_114 = arith.constant 0 : index
      %228 = vector.load %arg16[%227, %c0_113, %c0_114] : memref<4x8x512xbf16, #tpu.memory_space<vmem>>, vector<1x8x512xbf16>
      %229 = vector.shape_cast %228 : vector<1x8x512xbf16> to vector<8x512xbf16>
      %230 = arith.extf %229 : vector<8x512xbf16> to vector<8x512xf32>
      %c0_115 = arith.constant 0 : index
      %c0_116 = arith.constant 0 : index
      %231 = vector.load %arg19[%c0_115, %c0_116] : memref<8x128xf32, #tpu.memory_space<vmem>>, vector<8x128xf32>
      %232 = arith.truncf %231 : vector<8x128xf32> to vector<8x128xbf16>
      %c0_117 = arith.constant 0 : index
      %c0_118 = arith.constant 0 : index
      %233 = vector.load %arg10[%c0_117, %c0_118] : memref<128x512xbf16, #tpu.memory_space<vmem>>, vector<128x512xbf16>
      %cst_119 = arith.constant dense<0.000000e+00> : vector<8x512xf32>
      %234 = tpu.matmul %232, %233, %cst_119 {dimension_numbers = #tpu.dot_dimension_numbers<[1], [0], [0], [1], [0, 0, 1, 1], [], []>} : vector<8x128xbf16>, vector<128x512xbf16>, vector<8x512xf32> -> vector<8x512xf32>
      %235 = arith.addf %230, %234 : vector<8x512xf32>
      %c0_120 = arith.constant 0 : index
      %c0_121 = arith.constant 0 : index
      %236 = vector.load %arg20[%c0_120, %c0_121] : memref<8x128xf32, #tpu.memory_space<vmem>>, vector<8x128xf32>
      %237 = vector.extract_strided_slice %235 {offsets = [0, 0], sizes = [8, 128], strides = [1, 1]} : vector<8x512xf32> to vector<8x128xf32>
      %238 = arith.negf %237 : vector<8x128xf32>
      %239 = math.exp %238 : vector<8x128xf32>
      %cst_122 = arith.constant 1.000000e+00 : f32
      %240 = vector.broadcast %cst_122 : f32 to vector<8x128xf32>
      %241 = arith.addf %240, %239 : vector<8x128xf32>
      %242 = arith.divf %240, %241 : vector<8x128xf32>
      %243 = vector.extract_strided_slice %235 {offsets = [0, 128], sizes = [8, 128], strides = [1, 1]} : vector<8x512xf32> to vector<8x128xf32>
      %244 = arith.negf %243 : vector<8x128xf32>
      %245 = math.exp %244 : vector<8x128xf32>
      %cst_123 = arith.constant 1.000000e+00 : f32
      %246 = vector.broadcast %cst_123 : f32 to vector<8x128xf32>
      %247 = arith.addf %246, %245 : vector<8x128xf32>
      %248 = arith.divf %246, %247 : vector<8x128xf32>
      %249 = vector.extract_strided_slice %235 {offsets = [0, 256], sizes = [8, 128], strides = [1, 1]} : vector<8x512xf32> to vector<8x128xf32>
      %250 = math.tanh %249 : vector<8x128xf32>
      %251 = vector.extract_strided_slice %235 {offsets = [0, 384], sizes = [8, 128], strides = [1, 1]} : vector<8x512xf32> to vector<8x128xf32>
      %252 = arith.negf %251 : vector<8x128xf32>
      %253 = math.exp %252 : vector<8x128xf32>
      %cst_124 = arith.constant 1.000000e+00 : f32
      %254 = vector.broadcast %cst_124 : f32 to vector<8x128xf32>
      %255 = arith.addf %254, %253 : vector<8x128xf32>
      %256 = arith.divf %254, %255 : vector<8x128xf32>
      %257 = arith.mulf %248, %236 : vector<8x128xf32>
      %258 = arith.mulf %242, %250 : vector<8x128xf32>
      %259 = arith.addf %257, %258 : vector<8x128xf32>
      %260 = math.tanh %259 : vector<8x128xf32>
      %261 = arith.mulf %256, %260 : vector<8x128xf32>
      %c0_125 = arith.constant 0 : index
      %c0_126 = arith.constant 0 : index
      %262 = vector.load %arg19[%c0_125, %c0_126] : memref<8x128xf32, #tpu.memory_space<vmem>>, vector<8x128xf32>
      %263 = vector.shape_cast %226 : vector<8x1xi1> to vector<8x1xi1>
      %264 = vector.broadcast %263 : vector<8x1xi1> to vector<8x128xi1>
      %265 = arith.select %264, %261, %262 : vector<8x128xi1>, vector<8x128xf32>
      %c0_127 = arith.constant 0 : index
      %c0_128 = arith.constant 0 : index
      %266 = vector.load %arg19[%c0_127, %c0_128] : memref<8x128xf32, #tpu.memory_space<vmem>>, vector<8x128xf32>
      tpu.vector_store %arg19[%c0_127, %c0_128], %265 {strides = array<i32>} : memref<8x128xf32, #tpu.memory_space<vmem>>, vector<8x128xf32>,
      %c0_129 = arith.constant 0 : index
      %c0_130 = arith.constant 0 : index
      %267 = vector.load %arg20[%c0_129, %c0_130] : memref<8x128xf32, #tpu.memory_space<vmem>>, vector<8x128xf32>
      %268 = vector.shape_cast %226 : vector<8x1xi1> to vector<8x1xi1>
      %269 = vector.broadcast %268 : vector<8x1xi1> to vector<8x128xi1>
      %270 = arith.select %269, %259, %267 : vector<8x128xi1>, vector<8x128xf32>
      %c0_131 = arith.constant 0 : index
      %c0_132 = arith.constant 0 : index
      %271 = vector.load %arg20[%c0_131, %c0_132] : memref<8x128xf32, #tpu.memory_space<vmem>>, vector<8x128xf32>
      tpu.vector_store %arg20[%c0_131, %c0_132], %270 {strides = array<i32>} : memref<8x128xf32, #tpu.memory_space<vmem>>, vector<8x128xf32>,
      %cst_133 = arith.constant 0.000000e+00 : f32
      %272 = vector.shape_cast %226 : vector<8x1xi1> to vector<8x1xi1>
      %273 = vector.broadcast %272 : vector<8x1xi1> to vector<8x128xi1>
      %274 = vector.broadcast %cst_133 : f32 to vector<8x128xf32>
      %275 = arith.select %273, %261, %274 : vector<8x128xi1>, vector<8x128xf32>
      %276 = arith.truncf %275 : vector<8x128xf32> to vector<8x128xbf16>
      %277 = arith.index_cast %221 : i32 to index
      %c0_134 = arith.constant 0 : index
      %c0_135 = arith.constant 0 : index
      %278 = vector.load %arg13[%277, %c0_134, %c0_135] : memref<4x8x128xbf16, #tpu.memory_space<vmem>>, vector<1x8x128xbf16>
      %279 = vector.shape_cast %278 : vector<1x8x128xbf16> to vector<8x128xbf16>
      %280 = vector.shape_cast %276 : vector<8x128xbf16> to vector<1x8x128xbf16>
      tpu.vector_store %arg13[%277, %c0_134, %c0_135], %280 {strides = array<i32>} : memref<4x8x128xbf16, #tpu.memory_space<vmem>>, vector<1x8x128xbf16>,
      %c2_i32 = arith.constant 2 : i32
      %c4_i32_136 = arith.constant 4 : i32
      %281 = arith.muli %arg1, %c4_i32_136 : i32
      %282 = arith.addi %281, %c2_i32 : i32
      %283 = vector.broadcast %282 : i32 to vector<8x1xi32>
      %284 = arith.cmpi slt, %283, %11 : vector<8x1xi32>
      %285 = arith.index_cast %c2_i32 : i32 to index
      %c0_137 = arith.constant 0 : index
      %c0_138 = arith.constant 0 : index
      %286 = vector.load %arg15[%285, %c0_137, %c0_138] : memref<4x8x512xbf16, #tpu.memory_space<vmem>>, vector<1x8x512xbf16>
      %287 = vector.shape_cast %286 : vector<1x8x512xbf16> to vector<8x512xbf16>
      %288 = arith.extf %287 : vector<8x512xbf16> to vector<8x512xf32>
      %c0_139 = arith.constant 0 : index
      %c0_140 = arith.constant 0 : index
      %289 = vector.load %arg17[%c0_139, %c0_140] : memref<8x128xf32, #tpu.memory_space<vmem>>, vector<8x128xf32>
      %290 = arith.truncf %289 : vector<8x128xf32> to vector<8x128xbf16>
      %c0_141 = arith.constant 0 : index
      %c0_142 = arith.constant 0 : index
      %291 = vector.load %arg7[%c0_141, %c0_142] : memref<128x512xbf16, #tpu.memory_space<vmem>>, vector<128x512xbf16>
      %cst_143 = arith.constant dense<0.000000e+00> : vector<8x512xf32>
      %292 = tpu.matmul %290, %291, %cst_143 {dimension_numbers = #tpu.dot_dimension_numbers<[1], [0], [0], [1], [0, 0, 1, 1], [], []>} : vector<8x128xbf16>, vector<128x512xbf16>, vector<8x512xf32> -> vector<8x512xf32>
      %293 = arith.addf %288, %292 : vector<8x512xf32>
      %c0_144 = arith.constant 0 : index
      %c0_145 = arith.constant 0 : index
      %294 = vector.load %arg18[%c0_144, %c0_145] : memref<8x128xf32, #tpu.memory_space<vmem>>, vector<8x128xf32>
      %295 = vector.extract_strided_slice %293 {offsets = [0, 0], sizes = [8, 128], strides = [1, 1]} : vector<8x512xf32> to vector<8x128xf32>
      %296 = arith.negf %295 : vector<8x128xf32>
      %297 = math.exp %296 : vector<8x128xf32>
      %cst_146 = arith.constant 1.000000e+00 : f32
      %298 = vector.broadcast %cst_146 : f32 to vector<8x128xf32>
      %299 = arith.addf %298, %297 : vector<8x128xf32>
      %300 = arith.divf %298, %299 : vector<8x128xf32>
      %301 = vector.extract_strided_slice %293 {offsets = [0, 128], sizes = [8, 128], strides = [1, 1]} : vector<8x512xf32> to vector<8x128xf32>
      %302 = arith.negf %301 : vector<8x128xf32>
      %303 = math.exp %302 : vector<8x128xf32>
      %cst_147 = arith.constant 1.000000e+00 : f32
      %304 = vector.broadcast %cst_147 : f32 to vector<8x128xf32>
      %305 = arith.addf %304, %303 : vector<8x128xf32>
      %306 = arith.divf %304, %305 : vector<8x128xf32>
      %307 = vector.extract_strided_slice %293 {offsets = [0, 256], sizes = [8, 128], strides = [1, 1]} : vector<8x512xf32> to vector<8x128xf32>
      %308 = math.tanh %307 : vector<8x128xf32>
      %309 = vector.extract_strided_slice %293 {offsets = [0, 384], sizes = [8, 128], strides = [1, 1]} : vector<8x512xf32> to vector<8x128xf32>
      %310 = arith.negf %309 : vector<8x128xf32>
      %311 = math.exp %310 : vector<8x128xf32>
      %cst_148 = arith.constant 1.000000e+00 : f32
      %312 = vector.broadcast %cst_148 : f32 to vector<8x128xf32>
      %313 = arith.addf %312, %311 : vector<8x128xf32>
      %314 = arith.divf %312, %313 : vector<8x128xf32>
      %315 = arith.mulf %306, %294 : vector<8x128xf32>
      %316 = arith.mulf %300, %308 : vector<8x128xf32>
      %317 = arith.addf %315, %316 : vector<8x128xf32>
      %318 = math.tanh %317 : vector<8x128xf32>
      %319 = arith.mulf %314, %318 : vector<8x128xf32>
      %c0_149 = arith.constant 0 : index
      %c0_150 = arith.constant 0 : index
      %320 = vector.load %arg17[%c0_149, %c0_150] : memref<8x128xf32, #tpu.memory_space<vmem>>, vector<8x128xf32>
      %321 = vector.shape_cast %284 : vector<8x1xi1> to vector<8x1xi1>
      %322 = vector.broadcast %321 : vector<8x1xi1> to vector<8x128xi1>
      %323 = arith.select %322, %319, %320 : vector<8x128xi1>, vector<8x128xf32>
      %c0_151 = arith.constant 0 : index
      %c0_152 = arith.constant 0 : index
      %324 = vector.load %arg17[%c0_151, %c0_152] : memref<8x128xf32, #tpu.memory_space<vmem>>, vector<8x128xf32>
      tpu.vector_store %arg17[%c0_151, %c0_152], %323 {strides = array<i32>} : memref<8x128xf32, #tpu.memory_space<vmem>>, vector<8x128xf32>,
      %c0_153 = arith.constant 0 : index
      %c0_154 = arith.constant 0 : index
      %325 = vector.load %arg18[%c0_153, %c0_154] : memref<8x128xf32, #tpu.memory_space<vmem>>, vector<8x128xf32>
      %326 = vector.shape_cast %284 : vector<8x1xi1> to vector<8x1xi1>
      %327 = vector.broadcast %326 : vector<8x1xi1> to vector<8x128xi1>
      %328 = arith.select %327, %317, %325 : vector<8x128xi1>, vector<8x128xf32>
      %c0_155 = arith.constant 0 : index
      %c0_156 = arith.constant 0 : index
      %329 = vector.load %arg18[%c0_155, %c0_156] : memref<8x128xf32, #tpu.memory_space<vmem>>, vector<8x128xf32>
      tpu.vector_store %arg18[%c0_155, %c0_156], %328 {strides = array<i32>} : memref<8x128xf32, #tpu.memory_space<vmem>>, vector<8x128xf32>,
      %cst_157 = arith.constant 0.000000e+00 : f32
      %330 = vector.shape_cast %284 : vector<8x1xi1> to vector<8x1xi1>
      %331 = vector.broadcast %330 : vector<8x1xi1> to vector<8x128xi1>
      %332 = vector.broadcast %cst_157 : f32 to vector<8x128xf32>
      %333 = arith.select %331, %319, %332 : vector<8x128xi1>, vector<8x128xf32>
      %334 = arith.truncf %333 : vector<8x128xf32> to vector<8x128xbf16>
      %335 = arith.index_cast %c2_i32 : i32 to index
      %c0_158 = arith.constant 0 : index
      %c0_159 = arith.constant 0 : index
      %336 = vector.load %arg12[%335, %c0_158, %c0_159] : memref<4x8x128xbf16, #tpu.memory_space<vmem>>, vector<1x8x128xbf16>
      %337 = vector.shape_cast %336 : vector<1x8x128xbf16> to vector<8x128xbf16>
      %338 = vector.shape_cast %334 : vector<8x128xbf16> to vector<1x8x128xbf16>
      tpu.vector_store %arg12[%335, %c0_158, %c0_159], %338 {strides = array<i32>} : memref<4x8x128xbf16, #tpu.memory_space<vmem>>, vector<1x8x128xbf16>,
      %c3_i32_160 = arith.constant 3 : i32
      %339 = arith.subi %c3_i32_160, %c2_i32 : i32
      %c0_i32_161 = arith.constant 0 : i32
      %340 = arith.subi %c0_i32_161, %arg1 : i32
      %c4_i32_162 = arith.constant 4 : i32
      %341 = arith.muli %340, %c4_i32_162 : i32
      %342 = arith.addi %341, %339 : i32
      %343 = vector.broadcast %342 : i32 to vector<8x1xi32>
      %344 = arith.cmpi slt, %343, %11 : vector<8x1xi32>
      %345 = arith.index_cast %339 : i32 to index
      %c0_163 = arith.constant 0 : index
      %c0_164 = arith.constant 0 : index
      %346 = vector.load %arg16[%345, %c0_163, %c0_164] : memref<4x8x512xbf16, #tpu.memory_space<vmem>>, vector<1x8x512xbf16>
      %347 = vector.shape_cast %346 : vector<1x8x512xbf16> to vector<8x512xbf16>
      %348 = arith.extf %347 : vector<8x512xbf16> to vector<8x512xf32>
      %c0_165 = arith.constant 0 : index
      %c0_166 = arith.constant 0 : index
      %349 = vector.load %arg19[%c0_165, %c0_166] : memref<8x128xf32, #tpu.memory_space<vmem>>, vector<8x128xf32>
      %350 = arith.truncf %349 : vector<8x128xf32> to vector<8x128xbf16>
      %c0_167 = arith.constant 0 : index
      %c0_168 = arith.constant 0 : index
      %351 = vector.load %arg10[%c0_167, %c0_168] : memref<128x512xbf16, #tpu.memory_space<vmem>>, vector<128x512xbf16>
      %cst_169 = arith.constant dense<0.000000e+00> : vector<8x512xf32>
      %352 = tpu.matmul %350, %351, %cst_169 {dimension_numbers = #tpu.dot_dimension_numbers<[1], [0], [0], [1], [0, 0, 1, 1], [], []>} : vector<8x128xbf16>, vector<128x512xbf16>, vector<8x512xf32> -> vector<8x512xf32>
      %353 = arith.addf %348, %352 : vector<8x512xf32>
      %c0_170 = arith.constant 0 : index
      %c0_171 = arith.constant 0 : index
      %354 = vector.load %arg20[%c0_170, %c0_171] : memref<8x128xf32, #tpu.memory_space<vmem>>, vector<8x128xf32>
      %355 = vector.extract_strided_slice %353 {offsets = [0, 0], sizes = [8, 128], strides = [1, 1]} : vector<8x512xf32> to vector<8x128xf32>
      %356 = arith.negf %355 : vector<8x128xf32>
      %357 = math.exp %356 : vector<8x128xf32>
      %cst_172 = arith.constant 1.000000e+00 : f32
      %358 = vector.broadcast %cst_172 : f32 to vector<8x128xf32>
      %359 = arith.addf %358, %357 : vector<8x128xf32>
      %360 = arith.divf %358, %359 : vector<8x128xf32>
      %361 = vector.extract_strided_slice %353 {offsets = [0, 128], sizes = [8, 128], strides = [1, 1]} : vector<8x512xf32> to vector<8x128xf32>
      %362 = arith.negf %361 : vector<8x128xf32>
      %363 = math.exp %362 : vector<8x128xf32>
      %cst_173 = arith.constant 1.000000e+00 : f32
      %364 = vector.broadcast %cst_173 : f32 to vector<8x128xf32>
      %365 = arith.addf %364, %363 : vector<8x128xf32>
      %366 = arith.divf %364, %365 : vector<8x128xf32>
      %367 = vector.extract_strided_slice %353 {offsets = [0, 256], sizes = [8, 128], strides = [1, 1]} : vector<8x512xf32> to vector<8x128xf32>
      %368 = math.tanh %367 : vector<8x128xf32>
      %369 = vector.extract_strided_slice %353 {offsets = [0, 384], sizes = [8, 128], strides = [1, 1]} : vector<8x512xf32> to vector<8x128xf32>
      %370 = arith.negf %369 : vector<8x128xf32>
      %371 = math.exp %370 : vector<8x128xf32>
      %cst_174 = arith.constant 1.000000e+00 : f32
      %372 = vector.broadcast %cst_174 : f32 to vector<8x128xf32>
      %373 = arith.addf %372, %371 : vector<8x128xf32>
      %374 = arith.divf %372, %373 : vector<8x128xf32>
      %375 = arith.mulf %366, %354 : vector<8x128xf32>
      %376 = arith.mulf %360, %368 : vector<8x128xf32>
      %377 = arith.addf %375, %376 : vector<8x128xf32>
      %378 = math.tanh %377 : vector<8x128xf32>
      %379 = arith.mulf %374, %378 : vector<8x128xf32>
      %c0_175 = arith.constant 0 : index
      %c0_176 = arith.constant 0 : index
      %380 = vector.load %arg19[%c0_175, %c0_176] : memref<8x128xf32, #tpu.memory_space<vmem>>, vector<8x128xf32>
      %381 = vector.shape_cast %344 : vector<8x1xi1> to vector<8x1xi1>
      %382 = vector.broadcast %381 : vector<8x1xi1> to vector<8x128xi1>
      %383 = arith.select %382, %379, %380 : vector<8x128xi1>, vector<8x128xf32>
      %c0_177 = arith.constant 0 : index
      %c0_178 = arith.constant 0 : index
      %384 = vector.load %arg19[%c0_177, %c0_178] : memref<8x128xf32, #tpu.memory_space<vmem>>, vector<8x128xf32>
      tpu.vector_store %arg19[%c0_177, %c0_178], %383 {strides = array<i32>} : memref<8x128xf32, #tpu.memory_space<vmem>>, vector<8x128xf32>,
      %c0_179 = arith.constant 0 : index
      %c0_180 = arith.constant 0 : index
      %385 = vector.load %arg20[%c0_179, %c0_180] : memref<8x128xf32, #tpu.memory_space<vmem>>, vector<8x128xf32>
      %386 = vector.shape_cast %344 : vector<8x1xi1> to vector<8x1xi1>
      %387 = vector.broadcast %386 : vector<8x1xi1> to vector<8x128xi1>
      %388 = arith.select %387, %377, %385 : vector<8x128xi1>, vector<8x128xf32>
      %c0_181 = arith.constant 0 : index
      %c0_182 = arith.constant 0 : index
      %389 = vector.load %arg20[%c0_181, %c0_182] : memref<8x128xf32, #tpu.memory_space<vmem>>, vector<8x128xf32>
      tpu.vector_store %arg20[%c0_181, %c0_182], %388 {strides = array<i32>} : memref<8x128xf32, #tpu.memory_space<vmem>>, vector<8x128xf32>,
      %cst_183 = arith.constant 0.000000e+00 : f32
      %390 = vector.shape_cast %344 : vector<8x1xi1> to vector<8x1xi1>
      %391 = vector.broadcast %390 : vector<8x1xi1> to vector<8x128xi1>
      %392 = vector.broadcast %cst_183 : f32 to vector<8x128xf32>
      %393 = arith.select %391, %379, %392 : vector<8x128xi1>, vector<8x128xf32>
      %394 = arith.truncf %393 : vector<8x128xf32> to vector<8x128xbf16>
      %395 = arith.index_cast %339 : i32 to index
      %c0_184 = arith.constant 0 : index
      %c0_185 = arith.constant 0 : index
      %396 = vector.load %arg13[%395, %c0_184, %c0_185] : memref<4x8x128xbf16, #tpu.memory_space<vmem>>, vector<1x8x128xbf16>
      %397 = vector.shape_cast %396 : vector<1x8x128xbf16> to vector<8x128xbf16>
      %398 = vector.shape_cast %394 : vector<8x128xbf16> to vector<1x8x128xbf16>
      tpu.vector_store %arg13[%395, %c0_184, %c0_185], %398 {strides = array<i32>} : memref<4x8x128xbf16, #tpu.memory_space<vmem>>, vector<1x8x128xbf16>,
      %c3_i32_186 = arith.constant 3 : i32
      %c4_i32_187 = arith.constant 4 : i32
      %399 = arith.muli %arg1, %c4_i32_187 : i32
      %400 = arith.addi %399, %c3_i32_186 : i32
      %401 = vector.broadcast %400 : i32 to vector<8x1xi32>
      %402 = arith.cmpi slt, %401, %11 : vector<8x1xi32>
      %403 = arith.index_cast %c3_i32_186 : i32 to index
      %c0_188 = arith.constant 0 : index
      %c0_189 = arith.constant 0 : index
      %404 = vector.load %arg15[%403, %c0_188, %c0_189] : memref<4x8x512xbf16, #tpu.memory_space<vmem>>, vector<1x8x512xbf16>
      %405 = vector.shape_cast %404 : vector<1x8x512xbf16> to vector<8x512xbf16>
      %406 = arith.extf %405 : vector<8x512xbf16> to vector<8x512xf32>
      %c0_190 = arith.constant 0 : index
      %c0_191 = arith.constant 0 : index
      %407 = vector.load %arg17[%c0_190, %c0_191] : memref<8x128xf32, #tpu.memory_space<vmem>>, vector<8x128xf32>
      %408 = arith.truncf %407 : vector<8x128xf32> to vector<8x128xbf16>
      %c0_192 = arith.constant 0 : index
      %c0_193 = arith.constant 0 : index
      %409 = vector.load %arg7[%c0_192, %c0_193] : memref<128x512xbf16, #tpu.memory_space<vmem>>, vector<128x512xbf16>
      %cst_194 = arith.constant dense<0.000000e+00> : vector<8x512xf32>
      %410 = tpu.matmul %408, %409, %cst_194 {dimension_numbers = #tpu.dot_dimension_numbers<[1], [0], [0], [1], [0, 0, 1, 1], [], []>} : vector<8x128xbf16>, vector<128x512xbf16>, vector<8x512xf32> -> vector<8x512xf32>
      %411 = arith.addf %406, %410 : vector<8x512xf32>
      %c0_195 = arith.constant 0 : index
      %c0_196 = arith.constant 0 : index
      %412 = vector.load %arg18[%c0_195, %c0_196] : memref<8x128xf32, #tpu.memory_space<vmem>>, vector<8x128xf32>
      %413 = vector.extract_strided_slice %411 {offsets = [0, 0], sizes = [8, 128], strides = [1, 1]} : vector<8x512xf32> to vector<8x128xf32>
      %414 = arith.negf %413 : vector<8x128xf32>
      %415 = math.exp %414 : vector<8x128xf32>
      %cst_197 = arith.constant 1.000000e+00 : f32
      %416 = vector.broadcast %cst_197 : f32 to vector<8x128xf32>
      %417 = arith.addf %416, %415 : vector<8x128xf32>
      %418 = arith.divf %416, %417 : vector<8x128xf32>
      %419 = vector.extract_strided_slice %411 {offsets = [0, 128], sizes = [8, 128], strides = [1, 1]} : vector<8x512xf32> to vector<8x128xf32>
      %420 = arith.negf %419 : vector<8x128xf32>
      %421 = math.exp %420 : vector<8x128xf32>
      %cst_198 = arith.constant 1.000000e+00 : f32
      %422 = vector.broadcast %cst_198 : f32 to vector<8x128xf32>
      %423 = arith.addf %422, %421 : vector<8x128xf32>
      %424 = arith.divf %422, %423 : vector<8x128xf32>
      %425 = vector.extract_strided_slice %411 {offsets = [0, 256], sizes = [8, 128], strides = [1, 1]} : vector<8x512xf32> to vector<8x128xf32>
      %426 = math.tanh %425 : vector<8x128xf32>
      %427 = vector.extract_strided_slice %411 {offsets = [0, 384], sizes = [8, 128], strides = [1, 1]} : vector<8x512xf32> to vector<8x128xf32>
      %428 = arith.negf %427 : vector<8x128xf32>
      %429 = math.exp %428 : vector<8x128xf32>
      %cst_199 = arith.constant 1.000000e+00 : f32
      %430 = vector.broadcast %cst_199 : f32 to vector<8x128xf32>
      %431 = arith.addf %430, %429 : vector<8x128xf32>
      %432 = arith.divf %430, %431 : vector<8x128xf32>
      %433 = arith.mulf %424, %412 : vector<8x128xf32>
      %434 = arith.mulf %418, %426 : vector<8x128xf32>
      %435 = arith.addf %433, %434 : vector<8x128xf32>
      %436 = math.tanh %435 : vector<8x128xf32>
      %437 = arith.mulf %432, %436 : vector<8x128xf32>
      %c0_200 = arith.constant 0 : index
      %c0_201 = arith.constant 0 : index
      %438 = vector.load %arg17[%c0_200, %c0_201] : memref<8x128xf32, #tpu.memory_space<vmem>>, vector<8x128xf32>
      %439 = vector.shape_cast %402 : vector<8x1xi1> to vector<8x1xi1>
      %440 = vector.broadcast %439 : vector<8x1xi1> to vector<8x128xi1>
      %441 = arith.select %440, %437, %438 : vector<8x128xi1>, vector<8x128xf32>
      %c0_202 = arith.constant 0 : index
      %c0_203 = arith.constant 0 : index
      %442 = vector.load %arg17[%c0_202, %c0_203] : memref<8x128xf32, #tpu.memory_space<vmem>>, vector<8x128xf32>
      tpu.vector_store %arg17[%c0_202, %c0_203], %441 {strides = array<i32>} : memref<8x128xf32, #tpu.memory_space<vmem>>, vector<8x128xf32>,
      %c0_204 = arith.constant 0 : index
      %c0_205 = arith.constant 0 : index
      %443 = vector.load %arg18[%c0_204, %c0_205] : memref<8x128xf32, #tpu.memory_space<vmem>>, vector<8x128xf32>
      %444 = vector.shape_cast %402 : vector<8x1xi1> to vector<8x1xi1>
      %445 = vector.broadcast %444 : vector<8x1xi1> to vector<8x128xi1>
      %446 = arith.select %445, %435, %443 : vector<8x128xi1>, vector<8x128xf32>
      %c0_206 = arith.constant 0 : index
      %c0_207 = arith.constant 0 : index
      %447 = vector.load %arg18[%c0_206, %c0_207] : memref<8x128xf32, #tpu.memory_space<vmem>>, vector<8x128xf32>
      tpu.vector_store %arg18[%c0_206, %c0_207], %446 {strides = array<i32>} : memref<8x128xf32, #tpu.memory_space<vmem>>, vector<8x128xf32>,
      %cst_208 = arith.constant 0.000000e+00 : f32
      %448 = vector.shape_cast %402 : vector<8x1xi1> to vector<8x1xi1>
      %449 = vector.broadcast %448 : vector<8x1xi1> to vector<8x128xi1>
      %450 = vector.broadcast %cst_208 : f32 to vector<8x128xf32>
      %451 = arith.select %449, %437, %450 : vector<8x128xi1>, vector<8x128xf32>
      %452 = arith.truncf %451 : vector<8x128xf32> to vector<8x128xbf16>
      %453 = arith.index_cast %c3_i32_186 : i32 to index
      %c0_209 = arith.constant 0 : index
      %c0_210 = arith.constant 0 : index
      %454 = vector.load %arg12[%453, %c0_209, %c0_210] : memref<4x8x128xbf16, #tpu.memory_space<vmem>>, vector<1x8x128xbf16>
      %455 = vector.shape_cast %454 : vector<1x8x128xbf16> to vector<8x128xbf16>
      %456 = vector.shape_cast %452 : vector<8x128xbf16> to vector<1x8x128xbf16>
      tpu.vector_store %arg12[%453, %c0_209, %c0_210], %456 {strides = array<i32>} : memref<4x8x128xbf16, #tpu.memory_space<vmem>>, vector<1x8x128xbf16>,
      %c3_i32_211 = arith.constant 3 : i32
      %457 = arith.subi %c3_i32_211, %c3_i32_186 : i32
      %c0_i32_212 = arith.constant 0 : i32
      %458 = arith.subi %c0_i32_212, %arg1 : i32
      %c4_i32_213 = arith.constant 4 : i32
      %459 = arith.muli %458, %c4_i32_213 : i32
      %460 = arith.addi %459, %457 : i32
      %461 = vector.broadcast %460 : i32 to vector<8x1xi32>
      %462 = arith.cmpi slt, %461, %11 : vector<8x1xi32>
      %463 = arith.index_cast %457 : i32 to index
      %c0_214 = arith.constant 0 : index
      %c0_215 = arith.constant 0 : index
      %464 = vector.load %arg16[%463, %c0_214, %c0_215] : memref<4x8x512xbf16, #tpu.memory_space<vmem>>, vector<1x8x512xbf16>
      %465 = vector.shape_cast %464 : vector<1x8x512xbf16> to vector<8x512xbf16>
      %466 = arith.extf %465 : vector<8x512xbf16> to vector<8x512xf32>
      %c0_216 = arith.constant 0 : index
      %c0_217 = arith.constant 0 : index
      %467 = vector.load %arg19[%c0_216, %c0_217] : memref<8x128xf32, #tpu.memory_space<vmem>>, vector<8x128xf32>
      %468 = arith.truncf %467 : vector<8x128xf32> to vector<8x128xbf16>
      %c0_218 = arith.constant 0 : index
      %c0_219 = arith.constant 0 : index
      %469 = vector.load %arg10[%c0_218, %c0_219] : memref<128x512xbf16, #tpu.memory_space<vmem>>, vector<128x512xbf16>
      %cst_220 = arith.constant dense<0.000000e+00> : vector<8x512xf32>
      %470 = tpu.matmul %468, %469, %cst_220 {dimension_numbers = #tpu.dot_dimension_numbers<[1], [0], [0], [1], [0, 0, 1, 1], [], []>} : vector<8x128xbf16>, vector<128x512xbf16>, vector<8x512xf32> -> vector<8x512xf32>
      %471 = arith.addf %466, %470 : vector<8x512xf32>
      %c0_221 = arith.constant 0 : index
      %c0_222 = arith.constant 0 : index
      %472 = vector.load %arg20[%c0_221, %c0_222] : memref<8x128xf32, #tpu.memory_space<vmem>>, vector<8x128xf32>
      %473 = vector.extract_strided_slice %471 {offsets = [0, 0], sizes = [8, 128], strides = [1, 1]} : vector<8x512xf32> to vector<8x128xf32>
      %474 = arith.negf %473 : vector<8x128xf32>
      %475 = math.exp %474 : vector<8x128xf32>
      %cst_223 = arith.constant 1.000000e+00 : f32
      %476 = vector.broadcast %cst_223 : f32 to vector<8x128xf32>
      %477 = arith.addf %476, %475 : vector<8x128xf32>
      %478 = arith.divf %476, %477 : vector<8x128xf32>
      %479 = vector.extract_strided_slice %471 {offsets = [0, 128], sizes = [8, 128], strides = [1, 1]} : vector<8x512xf32> to vector<8x128xf32>
      %480 = arith.negf %479 : vector<8x128xf32>
      %481 = math.exp %480 : vector<8x128xf32>
      %cst_224 = arith.constant 1.000000e+00 : f32
      %482 = vector.broadcast %cst_224 : f32 to vector<8x128xf32>
      %483 = arith.addf %482, %481 : vector<8x128xf32>
      %484 = arith.divf %482, %483 : vector<8x128xf32>
      %485 = vector.extract_strided_slice %471 {offsets = [0, 256], sizes = [8, 128], strides = [1, 1]} : vector<8x512xf32> to vector<8x128xf32>
      %486 = math.tanh %485 : vector<8x128xf32>
      %487 = vector.extract_strided_slice %471 {offsets = [0, 384], sizes = [8, 128], strides = [1, 1]} : vector<8x512xf32> to vector<8x128xf32>
      %488 = arith.negf %487 : vector<8x128xf32>
      %489 = math.exp %488 : vector<8x128xf32>
      %cst_225 = arith.constant 1.000000e+00 : f32
      %490 = vector.broadcast %cst_225 : f32 to vector<8x128xf32>
      %491 = arith.addf %490, %489 : vector<8x128xf32>
      %492 = arith.divf %490, %491 : vector<8x128xf32>
      %493 = arith.mulf %484, %472 : vector<8x128xf32>
      %494 = arith.mulf %478, %486 : vector<8x128xf32>
      %495 = arith.addf %493, %494 : vector<8x128xf32>
      %496 = math.tanh %495 : vector<8x128xf32>
      %497 = arith.mulf %492, %496 : vector<8x128xf32>
      %c0_226 = arith.constant 0 : index
      %c0_227 = arith.constant 0 : index
      %498 = vector.load %arg19[%c0_226, %c0_227] : memref<8x128xf32, #tpu.memory_space<vmem>>, vector<8x128xf32>
      %499 = vector.shape_cast %462 : vector<8x1xi1> to vector<8x1xi1>
      %500 = vector.broadcast %499 : vector<8x1xi1> to vector<8x128xi1>
      %501 = arith.select %500, %497, %498 : vector<8x128xi1>, vector<8x128xf32>
      %c0_228 = arith.constant 0 : index
      %c0_229 = arith.constant 0 : index
      %502 = vector.load %arg19[%c0_228, %c0_229] : memref<8x128xf32, #tpu.memory_space<vmem>>, vector<8x128xf32>
      tpu.vector_store %arg19[%c0_228, %c0_229], %501 {strides = array<i32>} : memref<8x128xf32, #tpu.memory_space<vmem>>, vector<8x128xf32>,
      %c0_230 = arith.constant 0 : index
      %c0_231 = arith.constant 0 : index
      %503 = vector.load %arg20[%c0_230, %c0_231] : memref<8x128xf32, #tpu.memory_space<vmem>>, vector<8x128xf32>
      %504 = vector.shape_cast %462 : vector<8x1xi1> to vector<8x1xi1>
      %505 = vector.broadcast %504 : vector<8x1xi1> to vector<8x128xi1>
      %506 = arith.select %505, %495, %503 : vector<8x128xi1>, vector<8x128xf32>
      %c0_232 = arith.constant 0 : index
      %c0_233 = arith.constant 0 : index
      %507 = vector.load %arg20[%c0_232, %c0_233] : memref<8x128xf32, #tpu.memory_space<vmem>>, vector<8x128xf32>
      tpu.vector_store %arg20[%c0_232, %c0_233], %506 {strides = array<i32>} : memref<8x128xf32, #tpu.memory_space<vmem>>, vector<8x128xf32>,
      %cst_234 = arith.constant 0.000000e+00 : f32
      %508 = vector.shape_cast %462 : vector<8x1xi1> to vector<8x1xi1>
      %509 = vector.broadcast %508 : vector<8x1xi1> to vector<8x128xi1>
      %510 = vector.broadcast %cst_234 : f32 to vector<8x128xf32>
      %511 = arith.select %509, %497, %510 : vector<8x128xi1>, vector<8x128xf32>
      %512 = arith.truncf %511 : vector<8x128xf32> to vector<8x128xbf16>
      %513 = arith.index_cast %457 : i32 to index
      %c0_235 = arith.constant 0 : index
      %c0_236 = arith.constant 0 : index
      %514 = vector.load %arg13[%513, %c0_235, %c0_236] : memref<4x8x128xbf16, #tpu.memory_space<vmem>>, vector<1x8x128xbf16>
      %515 = vector.shape_cast %514 : vector<1x8x128xbf16> to vector<8x128xbf16>
      %516 = vector.shape_cast %512 : vector<8x128xbf16> to vector<1x8x128xbf16>
      tpu.vector_store %arg13[%513, %c0_235, %c0_236], %516 {strides = array<i32>} : memref<4x8x128xbf16, #tpu.memory_space<vmem>>, vector<1x8x128xbf16>,
      %c4_i32_237 = arith.constant 4 : i32
    } else {
    }
    %true = arith.constant true
    %14 = arith.xori %10, %true : i1
    %15 = arith.extui %14 : i1 to i32
    %c0_i32_5 = arith.constant 0 : i32
    %16 = arith.cmpi ne, %15, %c0_i32_5 : i32
    scf.if %16 {
      %cst = arith.constant 0.000000e+00 : bf16
      %25 = vector.broadcast %cst : bf16 to vector<4x8x128xbf16>
      %c0_15 = arith.constant 0 : index
      %c0_16 = arith.constant 0 : index
      %c0_17 = arith.constant 0 : index
      %26 = vector.load %arg12[%c0_15, %c0_16, %c0_17] : memref<4x8x128xbf16, #tpu.memory_space<vmem>>, vector<4x8x128xbf16>
      tpu.vector_store %arg12[%c0_15, %c0_16, %c0_17], %25 {strides = array<i32>} : memref<4x8x128xbf16, #tpu.memory_space<vmem>>, vector<4x8x128xbf16>,
      %cst_18 = arith.constant 0.000000e+00 : bf16
      %27 = vector.broadcast %cst_18 : bf16 to vector<4x8x128xbf16>
      %c0_19 = arith.constant 0 : index
      %c0_20 = arith.constant 0 : index
      %c0_21 = arith.constant 0 : index
      %28 = vector.load %arg13[%c0_19, %c0_20, %c0_21] : memref<4x8x128xbf16, #tpu.memory_space<vmem>>, vector<4x8x128xbf16>
      tpu.vector_store %arg13[%c0_19, %c0_20, %c0_21], %27 {strides = array<i32>} : memref<4x8x128xbf16, #tpu.memory_space<vmem>>, vector<4x8x128xbf16>,
    } else {
    }
    %c0_6 = arith.constant 0 : index
    %c0_7 = arith.constant 0 : index
    %17 = vector.load %arg17[%c0_6, %c0_7] : memref<8x128xf32, #tpu.memory_space<vmem>>, vector<8x128xf32>
    %c0_8 = arith.constant 0 : index
    %c0_9 = arith.constant 0 : index
    %c0_10 = arith.constant 0 : index
    %18 = vector.load %arg14[%c0_8, %c0_9, %c0_10] : memref<2x8x128xf32, #tpu.memory_space<vmem>>, vector<1x8x128xf32>
    %19 = vector.shape_cast %18 : vector<1x8x128xf32> to vector<8x128xf32>
    %20 = vector.shape_cast %17 : vector<8x128xf32> to vector<1x8x128xf32>
    tpu.vector_store %arg14[%c0_8, %c0_9, %c0_10], %20 {strides = array<i32>} : memref<2x8x128xf32, #tpu.memory_space<vmem>>, vector<1x8x128xf32>,
    %c0_11 = arith.constant 0 : index
    %c0_12 = arith.constant 0 : index
    %21 = vector.load %arg19[%c0_11, %c0_12] : memref<8x128xf32, #tpu.memory_space<vmem>>, vector<8x128xf32>
    %c1 = arith.constant 1 : index
    %c0_13 = arith.constant 0 : index
    %c0_14 = arith.constant 0 : index
    %22 = vector.load %arg14[%c1, %c0_13, %c0_14] : memref<2x8x128xf32, #tpu.memory_space<vmem>>, vector<1x8x128xf32>
    %23 = vector.shape_cast %22 : vector<1x8x128xf32> to vector<8x128xf32>
    %24 = vector.shape_cast %21 : vector<8x128xf32> to vector<1x8x128xf32>
    tpu.vector_store %arg14[%c1, %c0_13, %c0_14], %24 {strides = array<i32>} : memref<2x8x128xf32, #tpu.memory_space<vmem>>, vector<1x8x128xf32>,
    return
  }
  func.func @transform_0(%arg0: i32, %arg1: i32, %arg2: memref<1xi32, #tpu.memory_space<smem>>) -> (i32, i32) {
    %c0_i32 = arith.constant 0 : i32
    %c0_i32_0 = arith.constant 0 : i32
    return %arg0, %c0_i32 : i32, i32
  }
  func.func @transform_1(%arg0: i32, %arg1: i32, %arg2: memref<1xi32, #tpu.memory_space<smem>>) -> (i32, i32, i32) {
    %c0_i32 = arith.constant 0 : i32
    %c0_i32_0 = arith.constant 0 : i32
    return %arg1, %arg0, %c0_i32 : i32, i32, i32
  }
  func.func @transform_2(%arg0: i32, %arg1: i32, %arg2: memref<1xi32, #tpu.memory_space<smem>>) -> (i32, i32, i32) {
    %c0_i32 = arith.constant 0 : i32
    %0 = arith.subi %c0_i32, %arg1 : i32
    %c0_i32_0 = arith.constant 0 : i32
    %c0_i32_1 = arith.constant 0 : i32
    return %0, %arg0, %c0_i32_0 : i32, i32, i32
  }
  func.func @transform_3(%arg0: i32, %arg1: i32, %arg2: memref<1xi32, #tpu.memory_space<smem>>) -> (i32, i32) {
    %c0_i32 = arith.constant 0 : i32
    %c0_i32_0 = arith.constant 0 : i32
    %c0_i32_1 = arith.constant 0 : i32
    return %c0_i32, %c0_i32_0 : i32, i32
  }
  func.func @transform_4(%arg0: i32, %arg1: i32, %arg2: memref<1xi32, #tpu.memory_space<smem>>) -> (i32, i32) {
    %c0_i32 = arith.constant 0 : i32
    %c0_i32_0 = arith.constant 0 : i32
    %c0_i32_1 = arith.constant 0 : i32
    return %c0_i32, %c0_i32_0 : i32, i32
  }
  func.func @transform_5(%arg0: i32, %arg1: i32, %arg2: memref<1xi32, #tpu.memory_space<smem>>) -> (i32, i32) {
    %c0_i32 = arith.constant 0 : i32
    %c0_i32_0 = arith.constant 0 : i32
    %c0_i32_1 = arith.constant 0 : i32
    return %c0_i32, %c0_i32_0 : i32, i32
  }
  func.func @transform_6(%arg0: i32, %arg1: i32, %arg2: memref<1xi32, #tpu.memory_space<smem>>) -> (i32, i32) {
    %c0_i32 = arith.constant 0 : i32
    %c0_i32_0 = arith.constant 0 : i32
    %c0_i32_1 = arith.constant 0 : i32
    return %c0_i32, %c0_i32_0 : i32, i32
  }
  func.func @transform_7(%arg0: i32, %arg1: i32, %arg2: memref<1xi32, #tpu.memory_space<smem>>) -> (i32, i32) {
    %c0_i32 = arith.constant 0 : i32
    %c0_i32_0 = arith.constant 0 : i32
    %c0_i32_1 = arith.constant 0 : i32
    return %c0_i32, %c0_i32_0 : i32, i32
  }
  func.func @transform_8(%arg0: i32, %arg1: i32, %arg2: memref<1xi32, #tpu.memory_space<smem>>) -> (i32, i32) {
    %c0_i32 = arith.constant 0 : i32
    %c0_i32_0 = arith.constant 0 : i32
    %c0_i32_1 = arith.constant 0 : i32
    return %c0_i32, %c0_i32_0 : i32, i32
  }
  func.func @transform_9(%arg0: i32, %arg1: i32, %arg2: memref<1xi32, #tpu.memory_space<smem>>) -> (i32, i32, i32) {
    %c0_i32 = arith.constant 0 : i32
    %c0_i32_0 = arith.constant 0 : i32
    return %arg1, %arg0, %c0_i32 : i32, i32, i32
  }
  func.func @transform_10(%arg0: i32, %arg1: i32, %arg2: memref<1xi32, #tpu.memory_space<smem>>) -> (i32, i32, i32) {
    %c0_i32 = arith.constant 0 : i32
    %0 = arith.subi %c0_i32, %arg1 : i32
    %c0_i32_0 = arith.constant 0 : i32
    %c0_i32_1 = arith.constant 0 : i32
    return %0, %arg0, %c0_i32_0 : i32, i32, i32
  }
  func.func @transform_11(%arg0: i32, %arg1: i32, %arg2: memref<1xi32, #tpu.memory_space<smem>>) -> (i32, i32, i32) {
    %c0_i32 = arith.constant 0 : i32
    %c0_i32_0 = arith.constant 0 : i32
    %c0_i32_1 = arith.constant 0 : i32
    return %c0_i32, %arg0, %c0_i32_0 : i32, i32, i32
  }
}

</mosaic_0001>

<bundles_post_ra>
// kernel: pblstm_forward.1
= control target key start
LH: loop header
LB: loop body
LE: loop exit
PB: predicated region body
PF: predicated region fallthrough
CT: control target
= control target key end

     0   :  { %v4381_v0 = vmov 0.0   ;;  %s5808_s0 = inlined_call_operand.<no memory space> [shape: s32[1], index: 0, kind: input, shape index: {}]   ;;  %s5809_s1 = inlined_call_operand.vmem [shape: s32[8,1], index: 1, kind: input, shape index: {}]   ;;  %s5810_s2 = inlined_call_operand.vmem [shape: bf16[4,8,128], index: 2, kind: input, shape index: {}, may-alias: {2,3}]   ;;  %s5811_s3 = inlined_call_operand.vmem [shape: bf16[4,8,128], index: 3, kind: input, shape index: {}, may-alias: {2,3}]   ;;  %s5812_s4 = inlined_call_operand.vmem [shape: bf16[128,512], index: 4, kind: input, shape index: {}]   ;;  %s5813_s5 = inlined_call_operand.vmem [shape: bf16[128,512], index: 5, kind: input, shape index: {}]   ;;  %s5814_s6 = inlined_call_operand.vmem [shape: f32[1,512], index: 6, kind: input, shape index: {}]   ;;  %s5815_s7 = inlined_call_operand.vmem [shape: bf16[128,512], index: 7, kind: input, shape index: {}]   ;;  %s5816_s8 = inlined_call_operand.vmem [shape: bf16[128,512], index: 8, kind: input, shape index: {}]   ;;  %s5817_s9 = inlined_call_operand.vmem [shape: f32[1,512], index: 9, kind: input, shape index: {}]   ;;  %s5818_s10 = inlined_call_operand.vmem [shape: bf16[4,8,128], index: 10, kind: output, shape index: {0}]   ;;  %s5819_s11 = inlined_call_operand.vmem [shape: bf16[4,8,128], index: 11, kind: output, shape index: {1}]   ;;  %s5820_s12 = inlined_call_operand.vmem [shape: f32[2,8,128], index: 12, kind: output, shape index: {2}]  }
   0x1   :  { %78 = vst [vmem:[#allocation4] sm:$0xff] %v4381_v0  ;;  %79 = vst [vmem:[#allocation5] sm:$0xff] %v4381_v0  ;;  %p3559_p0 = scmp.gt.s32.totalorder %s5808_s0, 0  ;;  %v4455_v1 = vld [vmem:[%s5809_s1] sm:$0xff] }
   0x2   :  { %80 = vst [vmem:[#allocation6] sm:$0xff] %v4381_v0  ;;  %81 = vst [vmem:[#allocation7] sm:$0xff] %v4381_v0 }
   0x3   :  { %p4457_p1 = por %p3559_p0, %p3559_p0 }
   0x5   :  { %92 = sbr.rel (!%p4457_p1) target bundleno = 1188 (0x4a4), region = 45 }
   0xc   :  { %v3961_v2 = vld [vmem:[%s5812_s4 + $0x4] ss:$16 sps:$4 sm:$0xff]   ;;  %v3963_v3 = vld [vmem:[%s5812_s4 + $0xc] ss:$16 sps:$4 sm:$0xff]   ;;  %v5821_v4 = vmov 0   ;;  %vm3645_vm0 = vcmp.gt.s32.totalorder %v4455_v1, 0 }
   0xd   :  { %359 = vmatprep.mubr.bf16.mxu0 %v5821_v4  ;;  %412 = vmatprep.mubr.bf16.mxu1 %v5821_v4  ;;  %v3965_v5 = vld [vmem:[%s5812_s4] ss:$16 sps:$4 sm:$0xff]   ;;  %v3966_v6 = vld [vmem:[%s5812_s4 + $0x8] ss:$16 sps:$4 sm:$0xff]   ;;  %v3967_v7 = vld [vmem:[%s5812_s4 + $0x24] ss:$16 sps:$4 sm:$0xff]  }
   0xe   :  { %327 = vmatprep.subr.bf16.mxu0 %v3961_v2  ;;  %3959 = vset.pattern.permute.xlu0 %v5821_v4  ;;  %vm3681_vm1 = vcmp.gt.s32.totalorder %v4455_v1, 3  ;;  %v3969_v8 = vld [vmem:[%s5812_s4 + $0x2c] ss:$16 sps:$4 sm:$0xff]   ;;  %v3971_v9 = vld [vmem:[%s5812_s4 + $0x20] ss:$16 sps:$4 sm:$0xff]   ;;  %v4491_v10 = vsel %vm3645_vm0, 1, %v5821_v4 }
   0xf   :  { %380 = vmatprep.subr.bf16.mxu1 %v3963_v3  ;;  %3960 = vset.pattern.permute.xlu1 %v5821_v4  ;;  %v3972_v11 = vld [vmem:[%s5812_s4 + $0x28] ss:$16 sps:$4 sm:$0xff]   ;;  %v3973_v12 = vld [vmem:[%s5812_s4 + $0x44] ss:$16 sps:$4 sm:$0xff]   ;;  %v1518_v13 = vsel %vm3681_vm1, 1, %v5821_v4  ;;  %vm3755_vm2 = vcmp.gt.s32.totalorder %v4455_v1, 2 }
  0x10   :  { %328 = vmatpush1.bf16.msra.mxu0 %v3965_v5  ;;  %381 = vmatpush1.bf16.msra.mxu1 %v3966_v6  ;;  %v3975_v14 = vld [vmem:[%s5812_s4 + $0x4c] ss:$16 sps:$4 sm:$0xff]   ;;  %v3977_v15 = vld [vmem:[%s5812_s4 + $0x40] ss:$16 sps:$4 sm:$0xff]   ;;  %v3978_v16 = vld [vmem:[%s5812_s4 + $0x48] ss:$16 sps:$4 sm:$0xff]  }
  0x11   :  { %329 = vmatprep.subr.bf16.mxu0 %v3967_v7  ;;  %1192 = vperm.xlu0 %3959, %v4491_v10   ;;  %v3979_v17 = vld [vmem:[%s5812_s4 + $0x64] ss:$16 sps:$4 sm:$0xff]   ;;  %v3981_v18 = vld [vmem:[%s5812_s4 + $0x6c] ss:$16 sps:$4 sm:$0xff]   ;;  %v3983_v19 = vld [vmem:[%s5812_s4 + $0x60] ss:$16 sps:$4 sm:$0xff]  }
  0x12   :  { %382 = vmatprep.subr.bf16.mxu1 %v3969_v8  ;;  %v4521_v20 = vsel %vm3755_vm2, 1, %v5821_v4  ;;  %v3984_v21 = vld [vmem:[%s5812_s4 + $0x68] ss:$16 sps:$4 sm:$0xff]   ;;  %v3985_v22 = vld [vmem:[%s5812_s4 + $0x84] ss:$16 sps:$4 sm:$0xff]   ;;  %vm3718_vm3 = vcmp.gt.s32.totalorder %v4455_v1, 1 }
  0x13   :  { %v3987_v23 = vld [vmem:[%s5812_s4 + $0x8c] ss:$16 sps:$4 sm:$0xff]   ;;  %v3989_v24 = vld [vmem:[%s5812_s4 + $0x80] ss:$16 sps:$4 sm:$0xff]   ;;  %v3990_v25 = vld [vmem:[%s5812_s4 + $0x88] ss:$16 sps:$4 sm:$0xff]  }
  0x14   :  { %330 = vmatpush1.bf16.msra.mxu0 %v3971_v9  ;;  %383 = vmatpush1.bf16.msra.mxu1 %v3972_v11  ;;  %v3991_v26 = vld [vmem:[%s5812_s4 + $0xa4] ss:$16 sps:$4 sm:$0xff]   ;;  %v3993_v27 = vld [vmem:[%s5812_s4 + $0xac] ss:$16 sps:$4 sm:$0xff]   ;;  %v3995_v28 = vld [vmem:[%s5812_s4 + $0xa0] ss:$16 sps:$4 sm:$0xff]  }
  0x15   :  { %331 = vmatprep.subr.bf16.mxu0 %v3973_v12  ;;  %384 = vmatprep.subr.bf16.mxu1 %v3975_v14  ;;  %v3996_v29 = vld [vmem:[%s5812_s4 + $0xa8] ss:$16 sps:$4 sm:$0xff]   ;;  %v3997_v30 = vld [vmem:[%s5812_s4 + $0xc4] ss:$16 sps:$4 sm:$0xff]   ;;  %v3999_v31 = vld [vmem:[%s5812_s4 + $0xcc] ss:$16 sps:$4 sm:$0xff]  }
  0x16   :  { %1520 = vperm.xlu0 %3959, %v1518_v13   ;;  %v4001_v32 = vld [vmem:[%s5812_s4 + $0xc0] ss:$16 sps:$4 sm:$0xff]   ;;  %v4002_v33 = vld [vmem:[%s5812_s4 + $0xc8] ss:$16 sps:$4 sm:$0xff]   ;;  %v4003_v34 = vld [vmem:[%s5812_s4 + $0xe4] ss:$16 sps:$4 sm:$0xff]  }
  0x17   :  { %v4005_v35 = vld [vmem:[%s5812_s4 + $0xec] ss:$16 sps:$4 sm:$0xff]   ;;  %v4007_v36 = vld [vmem:[%s5812_s4 + $0xe0] ss:$16 sps:$4 sm:$0xff]   ;;  %v4008_v37 = vld [vmem:[%s5812_s4 + $0xe8] ss:$16 sps:$4 sm:$0xff]  }
  0x18   :  { %332 = vmatpush1.bf16.msra.mxu0 %v3977_v15  ;;  %385 = vmatpush1.bf16.msra.mxu1 %v3978_v16  ;;  %v4012_v38 = vld [vmem:[%s5815_s7 + $0x4] ss:$16 sps:$4 sm:$0xff]   ;;  %v4015_v39 = vld [vmem:[%s5815_s7 + $0xc] ss:$16 sps:$4 sm:$0xff]   ;;  %v4010_v41 = vld [vmem:[%s5815_s7] ss:$16 sps:$4 sm:$0xff]  }
  0x19   :  { %333 = vmatprep.subr.bf16.mxu0 %v3979_v17  ;;  %386 = vmatprep.subr.bf16.mxu1 %v3981_v18  ;;  %v4009_v40 = vld [vmem:[%s5810_s2] sm:$0xff]   ;;  %v4013_v42 = vld [vmem:[%s5815_s7 + $0x8] ss:$16 sps:$4 sm:$0xff]   ;;  %v4021_v44 = vld [vmem:[%s5815_s7 + $0x2c] ss:$16 sps:$4 sm:$0xff]  }
  0x1a   :  { %2507 = vperm.xlu0 %3959, %v4521_v20   ;;  %v4018_v43 = vld [vmem:[%s5815_s7 + $0x24] ss:$16 sps:$4 sm:$0xff]   ;;  %v4016_v45 = vld [vmem:[%s5815_s7 + $0x20] ss:$16 sps:$4 sm:$0xff]   ;;  %v4019_v46 = vld [vmem:[%s5815_s7 + $0x28] ss:$16 sps:$4 sm:$0xff]  }
  0x1b   :  { %v4024_v47 = vld [vmem:[%s5815_s7 + $0x44] ss:$16 sps:$4 sm:$0xff]   ;;  %v4027_v48 = vld [vmem:[%s5815_s7 + $0x4c] ss:$16 sps:$4 sm:$0xff]   ;;  %v4022_v50 = vld [vmem:[%s5815_s7 + $0x40] ss:$16 sps:$4 sm:$0xff]  }
  0x1c   :  { %334 = vmatpush1.bf16.msra.mxu0 %v3983_v19  ;;  %387 = vmatpush1.bf16.msra.mxu1 %v3984_v21  ;;  %v4046_v49 = vld [vmem:[%s5810_s2 + $0x8] sm:$0xff]   ;;  %v4030_v52 = vld [vmem:[%s5815_s7 + $0x64] ss:$16 sps:$4 sm:$0xff]   ;;  %v4028_v54 = vld [vmem:[%s5815_s7 + $0x60] ss:$16 sps:$4 sm:$0xff]  }
  0x1d   :  { %335 = vmatprep.subr.bf16.mxu0 %v3985_v22  ;;  %388 = vmatprep.subr.bf16.mxu1 %v3987_v23  ;;  %v4025_v51 = vld [vmem:[%s5815_s7 + $0x48] ss:$16 sps:$4 sm:$0xff]   ;;  %v4033_v53 = vld [vmem:[%s5815_s7 + $0x6c] ss:$16 sps:$4 sm:$0xff]   ;;  %v4036_v56 = vld [vmem:[%s5815_s7 + $0x84] ss:$16 sps:$4 sm:$0xff]  }
  0x1e   :  { %3165 = vperm.xlu0 %3959, %v1518_v13   ;;  %v4031_v55 = vld [vmem:[%s5815_s7 + $0x68] ss:$16 sps:$4 sm:$0xff]   ;;  %v4039_v57 = vld [vmem:[%s5815_s7 + $0x8c] ss:$16 sps:$4 sm:$0xff]   ;;  %v4034_v58 = vld [vmem:[%s5815_s7 + $0x80] ss:$16 sps:$4 sm:$0xff]  }
  0x1f   :  { %v4037_v59 = vld [vmem:[%s5815_s7 + $0x88] ss:$16 sps:$4 sm:$0xff]   ;;  %v4042_v60 = vld [vmem:[%s5815_s7 + $0xa4] ss:$16 sps:$4 sm:$0xff]   ;;  %v4045_v61 = vld [vmem:[%s5815_s7 + $0xac] ss:$16 sps:$4 sm:$0xff]  }
  0x20   :  { %336 = vmatpush1.bf16.msra.mxu0 %v3989_v24  ;;  %389 = vmatpush1.bf16.msra.mxu1 %v3990_v25  ;;  %v4040_v62 = vld [vmem:[%s5815_s7 + $0xa0] ss:$16 sps:$4 sm:$0xff]   ;;  %v4043_v63 = vld [vmem:[%s5815_s7 + $0xa8] ss:$16 sps:$4 sm:$0xff]   ;;  %v4049_v0 = vld [vmem:[%s5815_s7 + $0xc4] ss:$16 sps:$4 sm:$0xff]  }
  0x21   :  { %337 = vmatprep.subr.bf16.mxu0 %v3991_v26  ;;  %390 = vmatprep.subr.bf16.mxu1 %v3993_v27  ;;  %v4052_v2 = vld [vmem:[%s5815_s7 + $0xcc] ss:$16 sps:$4 sm:$0xff]   ;;  %v4047_v3 = vld [vmem:[%s5815_s7 + $0xc0] ss:$16 sps:$4 sm:$0xff]   ;;  %v4050_v5 = vld [vmem:[%s5815_s7 + $0xc8] ss:$16 sps:$4 sm:$0xff]  }
  0x22   :  { %v4055_v6 = vld [vmem:[%s5815_s7 + $0xe4] ss:$16 sps:$4 sm:$0xff]   ;;  %v4058_v7 = vld [vmem:[%s5815_s7 + $0xec] ss:$16 sps:$4 sm:$0xff]   ;;  %v4053_v8 = vld [vmem:[%s5815_s7 + $0xe0] ss:$16 sps:$4 sm:$0xff]  }
  0x23   :  { %v4056_v9 = vld [vmem:[%s5815_s7 + $0xe8] ss:$16 sps:$4 sm:$0xff]   ;;  %v4684_v11 = vld [vmem:[%s5813_s5 + $0x4] ss:$16 sps:$4 sm:$0xff]   ;;  %v4689_v12 = vld [vmem:[%s5813_s5 + $0xc] ss:$16 sps:$4 sm:$0xff]  }
  0x24   :  { %338 = vmatpush1.bf16.msra.mxu0 %v3995_v28  ;;  %391 = vmatpush1.bf16.msra.mxu1 %v3996_v29  ;;  %v4059_v13 = vld [vmem:[%s5811_s3] sm:$0xff]   ;;  %v4702_v15 = vld [vmem:[%s5813_s5 + $0x8] ss:$16 sps:$4 sm:$0xff]   ;;  %v4714_v17 = vld [vmem:[%s5813_s5 + $0x2c] ss:$16 sps:$4 sm:$0xff]  }
  0x25   :  { %339 = vmatprep.subr.bf16.mxu0 %v3997_v30  ;;  %392 = vmatprep.subr.bf16.mxu1 %v3999_v31  ;;  %v4697_v14 = vld [vmem:[%s5813_s5] ss:$16 sps:$4 sm:$0xff]   ;;  %v4707_v16 = vld [vmem:[%s5813_s5 + $0x24] ss:$16 sps:$4 sm:$0xff]   ;;  %v4726_v19 = vld [vmem:[%s5813_s5 + $0x28] ss:$16 sps:$4 sm:$0xff]  }
  0x26   :  { %v4719_v18 = vld [vmem:[%s5813_s5 + $0x20] ss:$16 sps:$4 sm:$0xff]   ;;  %v4733_v21 = vld [vmem:[%s5813_s5 + $0x44] ss:$16 sps:$4 sm:$0xff]   ;;  %v4738_v22 = vld [vmem:[%s5813_s5 + $0x4c] ss:$16 sps:$4 sm:$0xff]  }
  0x27   :  { %v4743_v23 = vld [vmem:[%s5813_s5 + $0x40] ss:$16 sps:$4 sm:$0xff]   ;;  %v4096_v24 = vld [vmem:[%s5811_s3 + $0x8] sm:$0xff]   ;;  %v4762_v26 = vld [vmem:[%s5813_s5 + $0x64] ss:$16 sps:$4 sm:$0xff]  }
  0x28   :  { %340 = vmatpush1.bf16.msra.mxu0 %v4001_v32  ;;  %393 = vmatpush1.bf16.msra.mxu1 %v4002_v33  ;;  %v4755_v25 = vld [vmem:[%s5813_s5 + $0x48] ss:$16 sps:$4 sm:$0xff]   ;;  %v4767_v27 = vld [vmem:[%s5813_s5 + $0x6c] ss:$16 sps:$4 sm:$0xff]   ;;  %v4772_v28 = vld [vmem:[%s5813_s5 + $0x60] ss:$16 sps:$4 sm:$0xff]  }
  0x29   :  { %341 = vmatprep.subr.bf16.mxu0 %v4003_v34  ;;  %394 = vmatprep.subr.bf16.mxu1 %v4005_v35  ;;  %v4779_v29 = vld [vmem:[%s5813_s5 + $0x68] ss:$16 sps:$4 sm:$0xff]   ;;  %v4786_v30 = vld [vmem:[%s5813_s5 + $0x84] ss:$16 sps:$4 sm:$0xff]   ;;  %v4791_v31 = vld [vmem:[%s5813_s5 + $0x8c] ss:$16 sps:$4 sm:$0xff]  }
  0x2a   :  { %v4798_v32 = vld [vmem:[%s5813_s5 + $0x80] ss:$16 sps:$4 sm:$0xff]   ;;  %v4805_v33 = vld [vmem:[%s5813_s5 + $0x88] ss:$16 sps:$4 sm:$0xff]   ;;  %v4812_v34 = vld [vmem:[%s5813_s5 + $0xa4] ss:$16 sps:$4 sm:$0xff]  }
  0x2b   :  { %v4817_v35 = vld [vmem:[%s5813_s5 + $0xac] ss:$16 sps:$4 sm:$0xff]  }
  0x2c   :  { %342 = vmatpush1.bf16.msra.mxu0 %v4007_v36  ;;  %395 = vmatpush1.bf16.msra.mxu1 %v4008_v37  ;;  %v4822_v36 = vld [vmem:[%s5813_s5 + $0xa0] ss:$16 sps:$4 sm:$0xff]   ;;  %v4829_v37 = vld [vmem:[%s5813_s5 + $0xa8] ss:$16 sps:$4 sm:$0xff]  }
  0x2d   :  { %715 = vmatprep.subr.bf16.mxu0 %v4012_v38  ;;  %768 = vmatprep.subr.bf16.mxu1 %v4015_v39  ;;  %v4836_v38 = vld [vmem:[%s5813_s5 + $0xc4] ss:$16 sps:$4 sm:$0xff]   ;;  %v4841_v39 = vld [vmem:[%s5813_s5 + $0xcc] ss:$16 sps:$4 sm:$0xff]  }
  0x2f   :  { %360 = vmatmul.mubr.bf16.vlgmr.msra.gmra.mrb[0].mxu0 %v4009_v40  ;;  %413 = vmatmul.mubr.bf16.vlgmr.msra.gmra.mrb[0].mxu1 %v4009_v40  ;;  %v4846_v40 = vld [vmem:[%s5813_s5 + $0xc0] ss:$16 sps:$4 sm:$0xff]  }
  0x30   :  { %716 = vmatpush1.bf16.msra.mxu0 %v4010_v41  ;;  %769 = vmatpush1.bf16.msra.mxu1 %v4013_v42  ;;  %v4853_v41 = vld [vmem:[%s5813_s5 + $0xc8] ss:$16 sps:$4 sm:$0xff]   ;;  %v4860_v42 = vld [vmem:[%s5813_s5 + $0xe4] ss:$16 sps:$4 sm:$0xff]  }
  0x31   :  { %717 = vmatprep.subr.bf16.mxu0 %v4018_v43  ;;  %770 = vmatprep.subr.bf16.mxu1 %v4021_v44  ;;  %v4865_v43 = vld [vmem:[%s5813_s5 + $0xec] ss:$16 sps:$4 sm:$0xff]   ;;  %v4870_v44 = vld [vmem:[%s5813_s5 + $0xe0] ss:$16 sps:$4 sm:$0xff]  }
  0x32   :  { %369 = vmatprep.mubr.bf16.mxu0 %v5821_v4  ;;  %422 = vmatprep.mubr.bf16.mxu1 %v5821_v4 }
  0x34   :  { %718 = vmatpush1.bf16.msra.mxu0 %v4016_v45  ;;  %771 = vmatpush1.bf16.msra.mxu1 %v4019_v46  ;;  %v4875_v45 = vld [vmem:[%s5813_s5 + $0xe8] ss:$16 sps:$4 sm:$0xff]   ;;  %v4877_v46 = vld [vmem:[#allocation4] sm:$0xff] }
  0x35   :  { %719 = vmatprep.subr.bf16.mxu0 %v4024_v47  ;;  %772 = vmatprep.subr.bf16.mxu1 %v4027_v48  ;;  %v4882_v47 = vld [vmem:[%s5816_s8 + $0x4] ss:$16 sps:$4 sm:$0xff]   ;;  %v4887_v48 = vld [vmem:[%s5816_s8 + $0xc] ss:$16 sps:$4 sm:$0xff]  }
  0x37   :  { %370 = vmatmul.mubr.bf16.gmra.mrb[4].mxu0 %v4046_v49  ;;  %423 = vmatmul.mubr.bf16.gmra.mrb[4].mxu1 %v4046_v49  ;;  %v4896_v49 = vld [vmem:[%s5816_s8] ss:$16 sps:$4 sm:$0xff]  }
  0x38   :  { %720 = vmatpush1.bf16.msra.mxu0 %v4022_v50  ;;  %773 = vmatpush1.bf16.msra.mxu1 %v4025_v51  ;;  %v4901_v50 = vld [vmem:[%s5816_s8 + $0x8] ss:$16 sps:$4 sm:$0xff]   ;;  %v886_v51 = vpack.c.bf16 %v4877_v46, %v4877_v46 }
  0x39   :  { %721 = vmatprep.subr.bf16.mxu0 %v4030_v52  ;;  %774 = vmatprep.subr.bf16.mxu1 %v4033_v53  ;;  %v4908_v52 = vld [vmem:[%s5816_s8 + $0x24] ss:$16 sps:$4 sm:$0xff]   ;;  %v4913_v53 = vld [vmem:[%s5816_s8 + $0x2c] ss:$16 sps:$4 sm:$0xff]  }
  0x3a   :  { %747 = vmatprep.mubr.bf16.mxu0 %v5821_v4  ;;  %800 = vmatprep.mubr.bf16.mxu1 %v5821_v4 }
  0x3c   :  { %722 = vmatpush1.bf16.msra.mxu0 %v4028_v54  ;;  %775 = vmatpush1.bf16.msra.mxu1 %v4031_v55  ;;  %v4922_v54 = vld [vmem:[%s5816_s8 + $0x20] ss:$16 sps:$4 sm:$0xff]   ;;  %v4927_v55 = vld [vmem:[%s5816_s8 + $0x28] ss:$16 sps:$4 sm:$0xff]  }
  0x3d   :  { %723 = vmatprep.subr.bf16.mxu0 %v4036_v56  ;;  %776 = vmatprep.subr.bf16.mxu1 %v4039_v57  ;;  %v4932_v56 = vld [vmem:[%s5816_s8 + $0x44] ss:$16 sps:$4 sm:$0xff]   ;;  %v4937_v57 = vld [vmem:[%s5816_s8 + $0x4c] ss:$16 sps:$4 sm:$0xff]  }
  0x40   :  { %724 = vmatpush1.bf16.msra.mxu0 %v4034_v58  ;;  %777 = vmatpush1.bf16.msra.mxu1 %v4037_v59  ;;  %v4946_v58 = vld [vmem:[%s5816_s8 + $0x40] ss:$16 sps:$4 sm:$0xff]   ;;  %v4951_v59 = vld [vmem:[%s5816_s8 + $0x48] ss:$16 sps:$4 sm:$0xff]  }
  0x41   :  { %725 = vmatprep.subr.bf16.mxu0 %v4042_v60  ;;  %778 = vmatprep.subr.bf16.mxu1 %v4045_v61  ;;  %v4958_v60 = vld [vmem:[%s5816_s8 + $0x64] ss:$16 sps:$4 sm:$0xff]   ;;  %v4963_v61 = vld [vmem:[%s5816_s8 + $0x6c] ss:$16 sps:$4 sm:$0xff]  }
  0x44   :  { %726 = vmatpush1.bf16.msra.mxu0 %v4040_v62  ;;  %779 = vmatpush1.bf16.msra.mxu1 %v4043_v63  ;;  %v4972_v62 = vld [vmem:[%s5816_s8 + $0x60] ss:$16 sps:$4 sm:$0xff]   ;;  %v4977_v63 = vld [vmem:[%s5816_s8 + $0x68] ss:$16 sps:$4 sm:$0xff]  }
  0x45   :  { %727 = vmatprep.subr.bf16.mxu0 %v4049_v0  ;;  %780 = vmatprep.subr.bf16.mxu1 %v4052_v2  ;;  %v4982_v0 = vld [vmem:[%s5816_s8 + $0x84] ss:$16 sps:$4 sm:$0xff]   ;;  %v4987_v2 = vld [vmem:[%s5816_s8 + $0x8c] ss:$16 sps:$4 sm:$0xff]  }
  0x48   :  { %728 = vmatpush1.bf16.msra.mxu0 %v4047_v3  ;;  %781 = vmatpush1.bf16.msra.mxu1 %v4050_v5  ;;  %v4998_v3 = vld [vmem:[%s5816_s8 + $0x80] ss:$16 sps:$4 sm:$0xff]   ;;  %v5003_v5 = vld [vmem:[%s5816_s8 + $0x88] ss:$16 sps:$4 sm:$0xff]  }
  0x49   :  { %729 = vmatprep.subr.bf16.mxu0 %v4055_v6  ;;  %782 = vmatprep.subr.bf16.mxu1 %v4058_v7  ;;  %v5010_v6 = vld [vmem:[%s5816_s8 + $0xa4] ss:$16 sps:$4 sm:$0xff]   ;;  %v5015_v7 = vld [vmem:[%s5816_s8 + $0xac] ss:$16 sps:$4 sm:$0xff]  }
  0x4a   :  { %5852 = vst [vmem:[#allocation10_spill] sm:$0xff] %v5015_v7 }
  0x4c   :  { %730 = vmatpush1.bf16.msra.mxu0 %v4053_v8  ;;  %783 = vmatpush1.bf16.msra.mxu1 %v4056_v9  ;;  %v5022_v8 = vld [vmem:[%s5816_s8 + $0xa0] ss:$16 sps:$4 sm:$0xff]   ;;  %v5027_v9 = vld [vmem:[%s5816_s8 + $0xa8] ss:$16 sps:$4 sm:$0xff]  }
  0x4d   :  { %1079 = vmatprep.subr.bf16.mxu0 %v4684_v11  ;;  %1120 = vmatprep.subr.bf16.mxu1 %v4689_v12  ;;  %5853 = vst [vmem:[#allocation11_spill] sm:$0xff] %v5022_v8  ;;  %5854 = vst [vmem:[#allocation12_spill] sm:$0xff] %v5027_v9 }
  0x4f   :  { %748 = vmatmul.mubr.bf16.vlgmr.msra.gmra.mrb[8].mxu0 %v4059_v13  ;;  %801 = vmatmul.mubr.bf16.vlgmr.msra.gmra.mrb[8].mxu1 %v4059_v13  ;;  %v5034_v13 = vld [vmem:[%s5816_s8 + $0xc4] ss:$16 sps:$4 sm:$0xff]  }
  0x50   :  { %1080 = vmatpush1.bf16.msra.mxu0 %v4697_v14  ;;  %1121 = vmatpush1.bf16.msra.mxu1 %v4702_v15  ;;  %5855 = vst [vmem:[#allocation13_spill] sm:$0xff] %v5034_v13 }
  0x51   :  { %1081 = vmatprep.subr.bf16.mxu0 %v4707_v16  ;;  %1122 = vmatprep.subr.bf16.mxu1 %v4714_v17 }
  0x52   :  { %757 = vmatprep.mubr.bf16.mxu0 %v5821_v4  ;;  %810 = vmatprep.mubr.bf16.mxu1 %v5821_v4 }
  0x54   :  { %1082 = vmatpush1.bf16.msra.mxu0 %v4719_v18  ;;  %1123 = vmatpush1.bf16.msra.mxu1 %v4726_v19 }
  0x55   :  { %1083 = vmatprep.subr.bf16.mxu0 %v4733_v21  ;;  %1124 = vmatprep.subr.bf16.mxu1 %v4738_v22 }
  0x57   :  { %758 = vmatmul.mubr.bf16.gmra.mrb[12].mxu0 %v4096_v24  ;;  %811 = vmatmul.mubr.bf16.gmra.mrb[12].mxu1 %v4096_v24  ;;  %v5039_v24 = vld [vmem:[%s5816_s8 + $0xcc] ss:$16 sps:$4 sm:$0xff]  }
  0x58   :  { %1084 = vmatpush1.bf16.msra.mxu0 %v4743_v23  ;;  %1125 = vmatpush1.bf16.msra.mxu1 %v4755_v25  ;;  %5856 = vst [vmem:[#allocation14_spill] sm:$0xff] %v5039_v24 }
  0x59   :  { %1085 = vmatprep.subr.bf16.mxu0 %v4762_v26  ;;  %1126 = vmatprep.subr.bf16.mxu1 %v4767_v27 }
  0x5a   :  { %1111 = vmatprep.mubr.bf16.mxu0 %v5821_v4  ;;  %1152 = vmatprep.mubr.bf16.mxu1 %v5821_v4 }
  0x5c   :  { %1086 = vmatpush1.bf16.msra.mxu0 %v4772_v28  ;;  %1127 = vmatpush1.bf16.msra.mxu1 %v4779_v29 }
  0x5d   :  { %1087 = vmatprep.subr.bf16.mxu0 %v4786_v30  ;;  %1128 = vmatprep.subr.bf16.mxu1 %v4791_v31 }
  0x60   :  { %1088 = vmatpush1.bf16.msra.mxu0 %v4798_v32  ;;  %1129 = vmatpush1.bf16.msra.mxu1 %v4805_v33 }
  0x61   :  { %1089 = vmatprep.subr.bf16.mxu0 %v4812_v34  ;;  %1130 = vmatprep.subr.bf16.mxu1 %v4817_v35 }
  0x64   :  { %1090 = vmatpush1.bf16.msra.mxu0 %v4822_v36  ;;  %1131 = vmatpush1.bf16.msra.mxu1 %v4829_v37 }
  0x65   :  { %1091 = vmatprep.subr.bf16.mxu0 %v4836_v38  ;;  %1132 = vmatprep.subr.bf16.mxu1 %v4841_v39 }
  0x68   :  { %1092 = vmatpush1.bf16.msra.mxu0 %v4846_v40  ;;  %1133 = vmatpush1.bf16.msra.mxu1 %v4853_v41 }
  0x69   :  { %1093 = vmatprep.subr.bf16.mxu0 %v4860_v42  ;;  %1134 = vmatprep.subr.bf16.mxu1 %v4865_v43 }
  0x6c   :  { %1094 = vmatpush1.bf16.msra.mxu0 %v4870_v44  ;;  %1135 = vmatpush1.bf16.msra.mxu1 %v4875_v45 }
  0x6d   :  { %1407 = vmatprep.subr.bf16.mxu0 %v4882_v47  ;;  %1448 = vmatprep.subr.bf16.mxu1 %v4887_v48 }
  0x6f   :  { %1112 = vmatmul.mubr.bf16.vlgmr.msra.gmra.mrb[16].mxu0 %v886_v51  ;;  %1153 = vmatmul.mubr.bf16.vlgmr.msra.gmra.mrb[16].mxu1 %v886_v51  ;;  %v5046_v51 = vld [vmem:[%s5816_s8 + $0xc0] ss:$16 sps:$4 sm:$0xff]  }
  0x70   :  { %1408 = vmatpush1.bf16.msra.mxu0 %v4896_v49  ;;  %1449 = vmatpush1.bf16.msra.mxu1 %v4901_v50  ;;  %5857 = vst [vmem:[#allocation15_spill] sm:$0xff] %v5046_v51 }
  0x71   :  { %1409 = vmatprep.subr.bf16.mxu0 %v4908_v52  ;;  %1450 = vmatprep.subr.bf16.mxu1 %v4913_v53 }
  0x72   :  { %1439 = vmatprep.mubr.bf16.mxu0 %v5821_v4  ;;  %1480 = vmatprep.mubr.bf16.mxu1 %v5821_v4  ;;  %v5051_v4 = vld [vmem:[%s5816_s8 + $0xc8] ss:$16 sps:$4 sm:$0xff]  }
  0x74   :  { %1410 = vmatpush1.bf16.msra.mxu0 %v4922_v54  ;;  %1451 = vmatpush1.bf16.msra.mxu1 %v4927_v55 }
  0x75   :  { %1411 = vmatprep.subr.bf16.mxu0 %v4932_v56  ;;  %1452 = vmatprep.subr.bf16.mxu1 %v4937_v57 }
  0x78   :  { %1412 = vmatpush1.bf16.msra.mxu0 %v4946_v58  ;;  %1453 = vmatpush1.bf16.msra.mxu1 %v4951_v59 }
  0x79   :  { %1413 = vmatprep.subr.bf16.mxu0 %v4958_v60  ;;  %1454 = vmatprep.subr.bf16.mxu1 %v4963_v61 }
  0x7c   :  { %1414 = vmatpush1.bf16.msra.mxu0 %v4972_v62  ;;  %1455 = vmatpush1.bf16.msra.mxu1 %v4977_v63 }
  0x7d   :  { %1415 = vmatprep.subr.bf16.mxu0 %v4982_v0  ;;  %1456 = vmatprep.subr.bf16.mxu1 %v4987_v2 }
  0x80   :  { %1416 = vmatpush1.bf16.msra.mxu0 %v4998_v3  ;;  %1457 = vmatpush1.bf16.msra.mxu1 %v5003_v5 }
  0x81   :  { %1417 = vmatprep.subr.bf16.mxu0 %v5010_v6  ;;  %1458 = vmatprep.subr.bf16.mxu1 %v5015_v7  ;;  %v5077_v7 = vld [vmem:[#allocation6] sm:$0xff] }
  0x84   :  { %1418 = vmatpush1.bf16.msra.mxu0 %v5022_v8  ;;  %1459 = vmatpush1.bf16.msra.mxu1 %v5027_v9  ;;  %v5058_v8 = vld [vmem:[%s5816_s8 + $0xe4] ss:$16 sps:$4 sm:$0xff]   ;;  %v5063_v9 = vld [vmem:[%s5816_s8 + $0xec] ss:$16 sps:$4 sm:$0xff]  }
  0x85   :  { %1419 = vmatprep.subr.bf16.mxu0 %v5034_v13  ;;  %1460 = vmatprep.subr.bf16.mxu1 %v5039_v24  ;;  %5858 = vst [vmem:[#allocation16_spill] sm:$0xff] %v5063_v9  ;;  %v5070_v13 = vld [vmem:[%s5816_s8 + $0xe0] ss:$16 sps:$4 sm:$0xff]   ;;  %v5075_v24 = vld [vmem:[%s5816_s8 + $0xe8] ss:$16 sps:$4 sm:$0xff]  }
  0x88   :  { %1420 = vmatpush1.bf16.msra.mxu0 %v5046_v51  ;;  %1461 = vmatpush1.bf16.msra.mxu1 %v5051_v4  ;;  %v1214_v51 = vpack.c.bf16 %v5077_v7, %v5077_v7 }
  0x89   :  { %1421 = vmatprep.subr.bf16.mxu0 %v5058_v8  ;;  %1462 = vmatprep.subr.bf16.mxu1 %v5063_v9  ;;  %v5859_v9 = vmov 0  }
  0x8c   :  { %1422 = vmatpush1.bf16.msra.mxu0 %v5070_v13  ;;  %1463 = vmatpush1.bf16.msra.mxu1 %v5075_v24 }
  0x8d   :  { %1736 = vmatprep.subr.bf16.mxu0 %v4684_v11  ;;  %1777 = vmatprep.subr.bf16.mxu1 %v4689_v12  ;;  %v135_v11 = vlaneseq }
  0x8f   :  { %1440 = vmatmul.mubr.bf16.vlgmr.msra.gmra.mrb[20].mxu0 %v1214_v51  ;;  %1481 = vmatmul.mubr.bf16.vlgmr.msra.gmra.mrb[20].mxu1 %v1214_v51  ;;  %v136_v12 = vshrl.u32 %v135_v11, 7 }
  0x90   :  { %1737 = vmatpush1.bf16.msra.mxu0 %v4697_v14  ;;  %1778 = vmatpush1.bf16.msra.mxu1 %v4702_v15 }
  0x91   :  { %1738 = vmatprep.subr.bf16.mxu0 %v4707_v16  ;;  %1779 = vmatprep.subr.bf16.mxu1 %v4714_v17  ;;  %v137_v14 = vsub.s32 0, %v136_v12  ;;  %v145_v15 = vsub.s32 2, %v136_v12  ;;  %v133_v16 = vld [vmem:[%s5814_s6] sm:$0xf]  ;;  %v141_v17 = vsub.s32 1, %v136_v12 }
  0x92   :  { %1768 = vmatprep.mubr.bf16.mxu0 %v5859_v9  ;;  %1809 = vmatprep.mubr.bf16.mxu1 %v5859_v9 }
  0x94   :  { %1739 = vmatpush1.bf16.msra.mxu0 %v4719_v18  ;;  %1780 = vmatpush1.bf16.msra.mxu1 %v4726_v19  ;;  %v149_v18 = vsub.s32 3, %v136_v12  ;;  %v138_v19 = vrot.slane %v133_v16, %v137_v14 }
  0x95   :  { %1740 = vmatprep.subr.bf16.mxu0 %v4733_v21  ;;  %1781 = vmatprep.subr.bf16.mxu1 %v4738_v22  ;;  %v146_v21 = vrot.slane %v133_v16, %v145_v15  ;;  %v142_v22 = vrot.slane %v133_v16, %v141_v17 }
  0x98   :  { %1741 = vmatpush1.bf16.msra.mxu0 %v4743_v23  ;;  %1782 = vmatpush1.bf16.msra.mxu1 %v4755_v25  ;;  %v150_v23 = vrot.slane %v133_v16, %v149_v18 }
  0x99   :  { %1742 = vmatprep.subr.bf16.mxu0 %v4762_v26  ;;  %1783 = vmatprep.subr.bf16.mxu1 %v4767_v27 }
  0x9c   :  { %1743 = vmatpush1.bf16.msra.mxu0 %v4772_v28  ;;  %1784 = vmatpush1.bf16.msra.mxu1 %v4779_v29 }
  0x9d   :  { %1744 = vmatprep.subr.bf16.mxu0 %v4786_v30  ;;  %1785 = vmatprep.subr.bf16.mxu1 %v4791_v31 }
  0xa0   :  { %1745 = vmatpush1.bf16.msra.mxu0 %v4798_v32  ;;  %1786 = vmatpush1.bf16.msra.mxu1 %v4805_v33 }
  0xa1   :  { %1746 = vmatprep.subr.bf16.mxu0 %v4812_v34  ;;  %1787 = vmatprep.subr.bf16.mxu1 %v4817_v35 }
  0xa4   :  { %1747 = vmatpush1.bf16.msra.mxu0 %v4822_v36  ;;  %1788 = vmatpush1.bf16.msra.mxu1 %v4829_v37 }
  0xa5   :  { %1748 = vmatprep.subr.bf16.mxu0 %v4836_v38  ;;  %1789 = vmatprep.subr.bf16.mxu1 %v4841_v39 }
  0xa8   :  { %1749 = vmatpush1.bf16.msra.mxu0 %v4846_v40  ;;  %1790 = vmatpush1.bf16.msra.mxu1 %v4853_v41 }
  0xa9   :  { %1750 = vmatprep.subr.bf16.mxu0 %v4860_v42  ;;  %1791 = vmatprep.subr.bf16.mxu1 %v4865_v43 }
  0xac   :  { %1751 = vmatpush1.bf16.msra.mxu0 %v4870_v44  ;;  %1792 = vmatpush1.bf16.msra.mxu1 %v4875_v45 }
  0xad   :  { %2065 = vmatprep.subr.bf16.mxu0 %v4882_v47  ;;  %2106 = vmatprep.subr.bf16.mxu1 %v4887_v48 }
 0x102   :  { %v361_v25 = vpop.f32.mrb[0].mxu0  ;;  %v414_v26 = vpop.f32.mrb[0].mxu1 }
 0x103   :  { %v362_v27 = vadd.f32 %v361_v25, %v138_v19  ;;  %v363_v28 = vpop.f32.mrb[1].mxu0  ;;  %v415_v29 = vadd.f32 %v414_v26, %v146_v21  ;;  %v416_v30 = vpop.f32.mrb[1].mxu1 }
 0x104   :  { %v364_v31 = vadd.f32 %v363_v28, %v142_v22  ;;  %v365_v32 = vpop.f32.mrb[2].mxu0  ;;  %v417_v33 = vadd.f32 %v416_v30, %v150_v23  ;;  %v418_v34 = vpop.f32.mrb[2].mxu1 }
 0x105   :  { %v366_v35 = vadd.f32 %v365_v32, %v138_v19  ;;  %v367_v36 = vpop.f32.mrb[3].mxu0  ;;  %v419_v37 = vadd.f32 %v418_v34, %v146_v21  ;;  %v420_v38 = vpop.f32.mrb[3].mxu1 }
 0x106   :  { %v5124_v39 = vpack.c.bf16 %v364_v31, %v362_v27  ;;  %v368_v40 = vadd.f32 %v367_v36, %v142_v22  ;;  %v5126_v41 = vpack.c.bf16 %v417_v33, %v415_v29  ;;  %v421_v42 = vadd.f32 %v420_v38, %v150_v23 }
 0x107   :  { %v1847_v38 = vsel %vm3718_vm3, 1, %v5859_v9 }
 0x108   :  { %v5128_v43 = vpack.c.bf16 %v368_v40, %v366_v35  ;;  %v5130_v44 = vpack.c.bf16 %v421_v42, %v419_v37  ;;  %1849 = vperm.xlu1 %3960, %v1847_v38  }
 0x10a   :  { %v371_v45 = vpop.f32.mrb[4].mxu0  ;;  %v424_v47 = vpop.f32.mrb[4].mxu1 }
 0x10b   :  { %v372_v48 = vadd.f32 %v371_v45, %v138_v19  ;;  %v373_v51 = vpop.f32.mrb[5].mxu0  ;;  %v425_v11 = vadd.f32 %v424_v47, %v146_v21  ;;  %v426_v12 = vpop.f32.mrb[5].mxu1 }
 0x10c   :  { %v374_v16 = vadd.f32 %v373_v51, %v142_v22  ;;  %v375_v25 = vpop.f32.mrb[6].mxu0  ;;  %v427_v26 = vadd.f32 %v426_v12, %v150_v23  ;;  %v428_v28 = vpop.f32.mrb[6].mxu1  ;;  %2178 = vperm.xlu1 %3960, %v4521_v20  }
 0x10d   :  { %v376_v27 = vadd.f32 %v375_v25, %v138_v19  ;;  %v377_v30 = vpop.f32.mrb[7].mxu0  ;;  %v429_v31 = vadd.f32 %v428_v28, %v146_v21  ;;  %v430_v29 = vpop.f32.mrb[7].mxu1  ;;  %v521_v19 = vld [vmem:[%s5817_s9] sm:$0xf] }
 0x10e   :  { %v5132_v32 = vpack.c.bf16 %v374_v16, %v372_v48  ;;  %v378_v33 = vadd.f32 %v377_v30, %v142_v22  ;;  %v5134_v34 = vpack.c.bf16 %v427_v26, %v425_v11  ;;  %v431_v35 = vadd.f32 %v430_v29, %v150_v23 }
 0x10f   :  { %v526_v21 = vrot.slane %v521_v19, %v137_v14  ;;  %v534_v22 = vrot.slane %v521_v19, %v145_v15  ;;  %v530_v40 = vrot.slane %v521_v19, %v141_v17  ;;  %v538_v23 = vrot.slane %v521_v19, %v149_v18 }
 0x110   :  { %5860 = vst [vmem:[#allocation17_spill] sm:$0xff] %v5132_v32  ;;  %5861 = vst [vmem:[#allocation18_spill] sm:$0xff] %v5134_v34  ;;  %v5136_v36 = vpack.c.bf16 %v378_v33, %v376_v27  ;;  %v5138_v37 = vpack.c.bf16 %v431_v35, %v429_v31  ;;  %2836 = vperm.xlu1 %3960, %v1847_v38  }
 0x112   :  { %5862 = vst [vmem:[#allocation19_spill] sm:$0xff] %v5136_v36  ;;  %5863 = vst [vmem:[#allocation20_spill] sm:$0xff] %v5138_v37 }
 0x114   :  { %3492 = vperm.xlu1 %3960, %v4491_v10  }
 0x122   :  { %v749_v42 = vpop.f32.mrb[8].mxu0  ;;  %v802_v45 = vpop.f32.mrb[8].mxu1 }
 0x123   :  { %v750_v47 = vadd.f32 %v749_v42, %v526_v21  ;;  %v751_v1 = vpop.f32.mrb[9].mxu0  ;;  %v803_v48 = vadd.f32 %v802_v45, %v534_v22  ;;  %v804_v51 = vpop.f32.mrb[9].mxu1 }
 0x124   :  { %v752_v11 = vadd.f32 %v751_v1, %v530_v40  ;;  %v753_v12 = vpop.f32.mrb[10].mxu0  ;;  %v805_v20 = vadd.f32 %v804_v51, %v538_v23  ;;  %v806_v16 = vpop.f32.mrb[10].mxu1 }
 0x125   :  { %v754_v25 = vadd.f32 %v753_v12, %v526_v21  ;;  %v755_v26 = vpop.f32.mrb[11].mxu0  ;;  %v807_v28 = vadd.f32 %v806_v16, %v534_v22  ;;  %v808_v27 = vpop.f32.mrb[11].mxu1 }
 0x126   :  { %v5147_v14 = vpack.c.bf16 %v752_v11, %v750_v47  ;;  %v756_v15 = vadd.f32 %v755_v26, %v530_v40  ;;  %v5149_v17 = vpack.c.bf16 %v805_v20, %v803_v48  ;;  %v809_v18 = vadd.f32 %v808_v27, %v538_v23 }
 0x128   :  { %5864 = vst [vmem:[#allocation21_spill] sm:$0xff] %v5147_v14  ;;  %5865 = vst [vmem:[#allocation22_spill] sm:$0xff] %v5149_v17  ;;  %v5151_v30 = vpack.c.bf16 %v756_v15, %v754_v25  ;;  %v5153_v10 = vpack.c.bf16 %v809_v18, %v807_v28  ;;  %v881_v15 = vunpack.c.l.bf16 %v5124_v39  ;;  %v883_v18 = vunpack.c.l.bf16 %v5126_v41 }
 0x12a   :  { %5866 = vst [vmem:[#allocation23_spill] sm:$0xff] %v5151_v30  ;;  %5867 = vst [vmem:[#allocation24_spill] sm:$0xff] %v5153_v10  ;;  %v759_v31 = vpop.f32.mrb[12].mxu0  ;;  %v812_v29 = vpop.f32.mrb[12].mxu1 }
 0x12b   :  { %v760_v33 = vadd.f32 %v759_v31, %v526_v21  ;;  %v761_v35 = vpop.f32.mrb[13].mxu0  ;;  %v813_v38 = vadd.f32 %v812_v29, %v534_v22  ;;  %v814_v19 = vpop.f32.mrb[13].mxu1 }
 0x12c   :  { %v762_v42 = vadd.f32 %v761_v35, %v530_v40  ;;  %v763_v45 = vpop.f32.mrb[14].mxu0  ;;  %v815_v1 = vadd.f32 %v814_v19, %v538_v23  ;;  %v816_v51 = vpop.f32.mrb[14].mxu1  ;;  %v882_v35 = vunpack.c.h.bf16 %v5124_v39 }
 0x12d   :  { %v764_v47 = vadd.f32 %v763_v45, %v526_v21  ;;  %v765_v11 = vpop.f32.mrb[15].mxu0  ;;  %v817_v12 = vadd.f32 %v816_v51, %v534_v22  ;;  %v818_v48 = vpop.f32.mrb[15].mxu1  ;;  %v884_v21 = vunpack.c.h.bf16 %v5126_v41 }
 0x12e   :  { %v5155_v20 = vpack.c.bf16 %v762_v42, %v760_v33  ;;  %v766_v16 = vadd.f32 %v765_v11, %v530_v40  ;;  %v5157_v25 = vpack.c.bf16 %v815_v1, %v813_v38  ;;  %v819_v26 = vadd.f32 %v818_v48, %v538_v23 }
 0x130   :  { %v3954_v28 = vpack.c.bf16 %v766_v16, %v764_v47  ;;  %v3955_v27 = vpack.c.bf16 %v819_v26, %v817_v12 }
 0x142   :  { %v1113_v31 = vpop.f32.mrb[16].mxu0  ;;  %v1154_v29 = vpop.f32.mrb[16].mxu1 }
 0x143   :  { %v1161_v22 = vadd.f32 %v1113_v31, %v881_v15  ;;  %v1163_v19 = vadd.f32 %v1154_v29, %v883_v18  ;;  %v1115_v33 = vpop.f32.mrb[17].mxu0  ;;  %v1156_v42 = vpop.f32.mrb[17].mxu1  ;;  %v1165_v18 = vld [vmem:[#allocation5] sm:$0xff] }
 0x144   :  { %v1162_v40 = vadd.f32 %v1115_v33, %v882_v35  ;;  %v1164_v38 = vadd.f32 %v1156_v42, %v884_v21  ;;  %v1117_v45 = vpop.f32.mrb[18].mxu0  ;;  %v1158_v23 = vpop.f32.mrb[18].mxu1  ;;  %v1209_v42 = vunpack.c.l.bf16 %v3954_v28 }
 0x145   :  { %v3678_v1 = vmul.f32 -1.442695, %v1161_v22  ;;  %v1118_v51 = vpop.f32.mrb[19].mxu0  ;;  %v1159_v47 = vpop.f32.mrb[19].mxu1 }
 0x146   :  { %v3679_v11 = vmul.f32 -1.442695, %v1162_v40  ;;  %v3680_v12 = vmul.f32 -1.442695, %v1164_v38  ;;  %v1193_v29 = vpop.permute.xlu0 %1192  ;;  %v1211_v40 = vunpack.c.l.bf16 %v3955_v27 }
 0x147   :  { %4253 = vpow2.f32 %v3678_v1  ;;  %vm1194_vm4 = vcmp.eq.s32.totalorder %v1193_v29, 1  ;;  %v1210_v1 = vunpack.c.h.bf16 %v3954_v28  ;;  %v1493_v29 = vld [vmem:[#allocation7] sm:$0xff] }
 0x148   :  { %4255 = vpow2.f32 %v3679_v11 }
 0x149   :  { %4257 = vpow2.f32 %v3680_v12 }
 0x14a   :  { %4259 = vtanh.f32 %v1163_v19  ;;  %v1212_v19 = vunpack.c.h.bf16 %v3955_v27 }
 0x151   :  { %v4254_v48 = vpop.eup %4253 }
 0x152   :  { %v4256_v16 = vpop.eup %4255  ;;  %v1169_v39 = vadd.f32 1.0, %v4254_v48 }
 0x153   :  { %v1175_v41 = vadd.f32 1.0, %v4256_v16  ;;  %v4258_v26 = vpop.eup %4257 }
 0x154   :  { %4261 = vrcp.f32 %v1169_v39  ;;  %v4260_v15 = vpop.eup %4259  ;;  %v1182_v21 = vadd.f32 1.0, %v4258_v26 }
 0x155   :  { %4263 = vrcp.f32 %v1175_v41 }
 0x156   :  { %4265 = vrcp.f32 %v1182_v21 }
 0x15e   :  { %v4262_v31 = vpop.eup %4261 }
 0x15f   :  { %v4264_v35 = vpop.eup %4263  ;;  %v1186_v22 = vmul.f32 %v4262_v31, %v4260_v15 }
 0x160   :  { %v1185_v33 = vmul.f32 %v4264_v35, %v1165_v18  ;;  %v4266_v28 = vpop.eup %4265 }
 0x162   :  { %v1187_v38 = vadd.f32 %v1186_v22, %v1185_v33  ;;  %v1441_v45 = vpop.f32.mrb[20].mxu0  ;;  %v1482_v23 = vpop.f32.mrb[20].mxu1 }
 0x163   :  { %v1489_v51 = vadd.f32 %v1441_v45, %v1209_v42  ;;  %v1491_v47 = vadd.f32 %v1482_v23, %v1211_v40  ;;  %v1443_v11 = vpop.f32.mrb[21].mxu0  ;;  %v1484_v12 = vpop.f32.mrb[21].mxu1 }
 0x164   :  { %4267 = vtanh.f32 %v1187_v38  ;;  %v5164_v48 = vsel %vm1194_vm4, %v1187_v38, %v1165_v18  ;;  %v1490_v16 = vadd.f32 %v1443_v11, %v1210_v1  ;;  %v1492_v39 = vadd.f32 %v1484_v12, %v1212_v19  ;;  %v1445_v41 = vpop.f32.mrb[22].mxu0  ;;  %v1486_v26 = vpop.f32.mrb[22].mxu1  ;;  %v5250_v12 = vld [vmem:[%s5813_s5 + $0x20] ss:$16 sps:$4 sm:$0xff]  }
 0x165   :  { %v3714_v15 = vmul.f32 -1.442695, %v1489_v51  ;;  %v1446_v31 = vpop.f32.mrb[23].mxu0  ;;  %v1487_v35 = vpop.f32.mrb[23].mxu1  ;;  %v5265_v41 = vld [vmem:[%s5813_s5 + $0x2c] ss:$16 sps:$4 sm:$0xff]  }
 0x166   :  { %v3715_v22 = vmul.f32 -1.442695, %v1490_v16  ;;  %v3716_v21 = vmul.f32 -1.442695, %v1492_v39  ;;  %v5255_v16 = vld [vmem:[%s5813_s5 + $0x24] ss:$16 sps:$4 sm:$0xff]  }
 0x167   :  { %4269 = vpow2.f32 %v3714_v15  ;;  %v5260_v39 = vld [vmem:[%s5813_s5 + $0x28] ss:$16 sps:$4 sm:$0xff]   ;;  %v5274_v26 = vld [vmem:[%s5813_s5 + $0x44] ss:$16 sps:$4 sm:$0xff]   ;;  %v5279_v15 = vld [vmem:[%s5813_s5 + $0x4c] ss:$16 sps:$4 sm:$0xff]  }
 0x168   :  { %4271 = vpow2.f32 %v3715_v22  ;;  %v5284_v31 = vld [vmem:[%s5813_s5 + $0x40] ss:$16 sps:$4 sm:$0xff]   ;;  %v5289_v35 = vld [vmem:[%s5813_s5 + $0x48] ss:$16 sps:$4 sm:$0xff]   ;;  %v5298_v22 = vld [vmem:[%s5813_s5 + $0x64] ss:$16 sps:$4 sm:$0xff]  }
 0x169   :  { %4273 = vpow2.f32 %v3716_v21  ;;  %v5313_v21 = vld [vmem:[%s5813_s5 + $0x68] ss:$16 sps:$4 sm:$0xff]  }
 0x16a   :  { %4275 = vtanh.f32 %v1491_v47 }
 0x16e   :  { %v4268_v27 = vpop.eup %4267 }
 0x16f   :  { %v1189_v33 = vmul.f32 %v4268_v27, %v4266_v28  ;;  %v5303_v28 = vld [vmem:[%s5813_s5 + $0x6c] ss:$16 sps:$4 sm:$0xff]   ;;  %v5308_v27 = vld [vmem:[%s5813_s5 + $0x60] ss:$16 sps:$4 sm:$0xff]  }
 0x171   :  { %v4270_v42 = vpop.eup %4269  ;;  %v5168_v40 = vsel %vm1194_vm4, %v1189_v33, %v4877_v46  ;;  %v1200_v18 = vsel %vm1194_vm4, %v1189_v33, 0.0  ;;  %v5322_v33 = vld [vmem:[%s5813_s5 + $0x84] ss:$16 sps:$4 sm:$0xff]  }
 0x172   :  { %v4272_v38 = vpop.eup %4271  ;;  %v1201_v45 = vpack.c.bf16 %v1200_v18, %v1200_v18  ;;  %v1497_v23 = vadd.f32 1.0, %v4270_v42  ;;  %v1543_v1 = vpack.c.bf16 %v5168_v40, %v5168_v40  ;;  %v5327_v42 = vld [vmem:[%s5813_s5 + $0x8c] ss:$16 sps:$4 sm:$0xff]   ;;  %v5332_v18 = vld [vmem:[%s5813_s5 + $0x80] ss:$16 sps:$4 sm:$0xff]  }
 0x173   :  { %v1503_v19 = vadd.f32 1.0, %v4272_v38  ;;  %v4274_v46 = vpop.eup %4273  ;;  %v5337_v38 = vld [vmem:[%s5813_s5 + $0x88] ss:$16 sps:$4 sm:$0xff]  }
 0x174   :  { %1202 = vst [vmem:[%s5818_s10] sm:$0xf] %v1201_v45  ;;  %4277 = vrcp.f32 %v1497_v23  ;;  %1769 = vmatmul.mubr.bf16.vlgmr.msra.gmra.mrb[24].mxu0 %v1543_v1  ;;  %1810 = vmatmul.mubr.bf16.vlgmr.msra.gmra.mrb[24].mxu1 %v1543_v1  ;;  %v5346_v45 = vld [vmem:[%s5813_s5 + $0xa4] ss:$16 sps:$4 sm:$0xff]   ;;  %v5351_v23 = vld [vmem:[%s5813_s5 + $0xac] ss:$16 sps:$4 sm:$0xff]  }
 0x175   :  { %4279 = vrcp.f32 %v1503_v19  ;;  %2066 = vmatpush1.bf16.msra.mxu0 %v4896_v49  ;;  %2107 = vmatpush1.bf16.msra.mxu1 %v4901_v50  ;;  %v4276_v49 = vpop.eup %4275  ;;  %v5356_v1 = vld [vmem:[%s5813_s5 + $0xa0] ss:$16 sps:$4 sm:$0xff]   ;;  %v5361_v19 = vld [vmem:[%s5813_s5 + $0xa8] ss:$16 sps:$4 sm:$0xff]  }
 0x176   :  { %2067 = vmatprep.subr.bf16.mxu0 %v4908_v52  ;;  %2108 = vmatprep.subr.bf16.mxu1 %v4913_v53  ;;  %v1510_v53 = vadd.f32 1.0, %v4274_v46  ;;  %v5370_v46 = vld [vmem:[%s5813_s5 + $0xc4] ss:$16 sps:$4 sm:$0xff]  }
 0x177   :  { %2097 = vmatprep.mubr.bf16.mxu0 %v5859_v9  ;;  %2138 = vmatprep.mubr.bf16.mxu1 %v5859_v9 }
 0x178   :  { %4281 = vrcp.f32 %v1510_v53  ;;  %v5399_v53 = vld [vmem:[%s5813_s5 + $0xec] ss:$16 sps:$4 sm:$0xff]  }
 0x179   :  { %2068 = vmatpush1.bf16.msra.mxu0 %v4922_v54  ;;  %2109 = vmatpush1.bf16.msra.mxu1 %v4927_v55 }
 0x17a   :  { %2069 = vmatprep.subr.bf16.mxu0 %v4932_v56  ;;  %2110 = vmatprep.subr.bf16.mxu1 %v4937_v57  ;;  %v1521_v56 = vpop.permute.xlu0 %1520 }
 0x17b   :  { %vm1522_vm5 = vcmp.eq.s32.totalorder %v1521_v56, 1  ;;  %v5418_v56 = vld [vmem:[%s5816_s8 + $0x4] ss:$16 sps:$4 sm:$0xff]  }
 0x17d   :  { %2070 = vmatpush1.bf16.msra.mxu0 %v4946_v58  ;;  %2111 = vmatpush1.bf16.msra.mxu1 %v4951_v59  ;;  %v5868_v59 = vld [vmem:[#allocation10_spill] sm:$0xff] }
 0x17e   :  { %v4278_v50 = vpop.eup %4277  ;;  %2071 = vmatprep.subr.bf16.mxu0 %v4958_v60  ;;  %2112 = vmatprep.subr.bf16.mxu1 %v4963_v61  ;;  %v5869_v60 = vld [vmem:[#allocation11_spill] sm:$0xff]  ;;  %v5870_v61 = vld [vmem:[#allocation12_spill] sm:$0xff] }
 0x17f   :  { %v4280_v52 = vpop.eup %4279  ;;  %v1514_v54 = vmul.f32 %v4278_v50, %v4276_v49  ;;  %v5375_v49 = vld [vmem:[%s5813_s5 + $0xcc] ss:$16 sps:$4 sm:$0xff]   ;;  %v5385_v50 = vld [vmem:[%s5813_s5 + $0xc8] ss:$16 sps:$4 sm:$0xff]  }
 0x180   :  { %v1513_v55 = vmul.f32 %v4280_v52, %v1493_v29  ;;  %v5394_v52 = vld [vmem:[%s5813_s5 + $0xe4] ss:$16 sps:$4 sm:$0xff]  }
 0x181   :  { %2072 = vmatpush1.bf16.msra.mxu0 %v4972_v62  ;;  %2113 = vmatpush1.bf16.msra.mxu1 %v4977_v63  ;;  %v5871_v62 = vld [vmem:[#allocation13_spill] sm:$0xff]  ;;  %v5872_v63 = vld [vmem:[#allocation14_spill] sm:$0xff] }
 0x182   :  { %v1515_v57 = vadd.f32 %v1514_v54, %v1513_v55  ;;  %2073 = vmatprep.subr.bf16.mxu0 %v4982_v0  ;;  %2114 = vmatprep.subr.bf16.mxu1 %v4987_v2  ;;  %v4282_v0 = vpop.eup %4281  ;;  %v5873_v2 = vld [vmem:[#allocation15_spill] sm:$0xff]  ;;  %v5404_v54 = vld [vmem:[%s5813_s5 + $0xe0] ss:$16 sps:$4 sm:$0xff]  }
 0x183   :  { %v5409_v55 = vld [vmem:[%s5813_s5 + $0xe8] ss:$16 sps:$4 sm:$0xff]  }
 0x184   :  { %4283 = vtanh.f32 %v1515_v57  ;;  %v5195_v58 = vsel %vm1522_vm5, %v1515_v57, %v1493_v29  ;;  %v5380_v29 = vld [vmem:[%s5813_s5 + $0xc0] ss:$16 sps:$4 sm:$0xff]   ;;  %v5423_v57 = vld [vmem:[%s5816_s8 + $0xc] ss:$16 sps:$4 sm:$0xff]  }
 0x185   :  { %2074 = vmatpush1.bf16.msra.mxu0 %v4998_v3  ;;  %2115 = vmatpush1.bf16.msra.mxu1 %v5003_v5  ;;  %v5874_v5 = vld [vmem:[#allocation16_spill] sm:$0xff] }
 0x186   :  { %2075 = vmatprep.subr.bf16.mxu0 %v5010_v6  ;;  %2116 = vmatprep.subr.bf16.mxu1 %v5868_v59  ;;  %v1538_v59 = vunpack.c.l.bf16 %v5128_v43 }
 0x189   :  { %2076 = vmatpush1.bf16.msra.mxu0 %v5869_v60  ;;  %2117 = vmatpush1.bf16.msra.mxu1 %v5870_v61  ;;  %v1540_v60 = vunpack.c.l.bf16 %v5130_v44 }
 0x18a   :  { %2077 = vmatprep.subr.bf16.mxu0 %v5871_v62  ;;  %2118 = vmatprep.subr.bf16.mxu1 %v5872_v63  ;;  %v1539_v63 = vunpack.c.h.bf16 %v5128_v43 }
 0x18d   :  { %2078 = vmatpush1.bf16.msra.mxu0 %v5873_v2  ;;  %2119 = vmatpush1.bf16.msra.mxu1 %v5051_v4 }
 0x18e   :  { %v4284_v3 = vpop.eup %4283  ;;  %2079 = vmatprep.subr.bf16.mxu0 %v5058_v8  ;;  %2120 = vmatprep.subr.bf16.mxu1 %v5874_v5  ;;  %v5231_v8 = vld [vmem:[%s5813_s5 + $0xc] ss:$16 sps:$4 sm:$0xff]  }
 0x18f   :  { %v1517_v6 = vmul.f32 %v4284_v3, %v4282_v0  ;;  %v1541_v0 = vunpack.c.h.bf16 %v5130_v44 }
 0x191   :  { %v5211_v51 = vsel %vm1522_vm5, %v1517_v6, %v5077_v7  ;;  %v1528_v47 = vsel %vm1522_vm5, %v1517_v6, 0.0  ;;  %2080 = vmatpush1.bf16.msra.mxu0 %v5070_v13  ;;  %2121 = vmatpush1.bf16.msra.mxu1 %v5075_v24  ;;  %v5226_v7 = vld [vmem:[%s5813_s5 + $0x4] ss:$16 sps:$4 sm:$0xff]   ;;  %v5236_v13 = vld [vmem:[%s5813_s5] ss:$16 sps:$4 sm:$0xff]  }
 0x192   :  { %v1529_v11 = vpack.c.bf16 %v1528_v47, %v1528_v47  ;;  %v1872_v4 = vpack.c.bf16 %v5211_v51, %v5211_v51  ;;  %v5241_v24 = vld [vmem:[%s5813_s5 + $0x8] ss:$16 sps:$4 sm:$0xff]   ;;  %2394 = vmatprep.subr.bf16.mxu0 %v5226_v7  ;;  %2435 = vmatprep.subr.bf16.mxu1 %v5231_v8 }
 0x194   :  { %3717 = vst [vmem:[%s5819_s11 + $0xc] sm:$0xf] %v1529_v11  ;;  %2098 = vmatmul.mubr.bf16.vlgmr.msra.gmra.mrb[28].mxu0 %v1872_v4  ;;  %2139 = vmatmul.mubr.bf16.vlgmr.msra.gmra.mrb[28].mxu1 %v1872_v4 }
 0x195   :  { %2426 = vmatprep.mubr.bf16.mxu0 %v5859_v9  ;;  %2467 = vmatprep.mubr.bf16.mxu1 %v5859_v9 }
 0x196   :  { %2395 = vmatpush1.bf16.msra.mxu0 %v5236_v13  ;;  %2436 = vmatpush1.bf16.msra.mxu1 %v5241_v24 }
 0x197   :  { %2396 = vmatprep.subr.bf16.mxu0 %v5255_v16  ;;  %2437 = vmatprep.subr.bf16.mxu1 %v5265_v41 }
 0x19a   :  { %2397 = vmatpush1.bf16.msra.mxu0 %v5250_v12  ;;  %2438 = vmatpush1.bf16.msra.mxu1 %v5260_v39 }
 0x19b   :  { %2398 = vmatprep.subr.bf16.mxu0 %v5274_v26  ;;  %2439 = vmatprep.subr.bf16.mxu1 %v5279_v15 }
 0x19e   :  { %2399 = vmatpush1.bf16.msra.mxu0 %v5284_v31  ;;  %2440 = vmatpush1.bf16.msra.mxu1 %v5289_v35 }
 0x19f   :  { %2400 = vmatprep.subr.bf16.mxu0 %v5298_v22  ;;  %2441 = vmatprep.subr.bf16.mxu1 %v5303_v28 }
 0x1a2   :  { %2401 = vmatpush1.bf16.msra.mxu0 %v5308_v27  ;;  %2442 = vmatpush1.bf16.msra.mxu1 %v5313_v21 }
 0x1a3   :  { %2402 = vmatprep.subr.bf16.mxu0 %v5322_v33  ;;  %2443 = vmatprep.subr.bf16.mxu1 %v5327_v42 }
 0x1a6   :  { %2403 = vmatpush1.bf16.msra.mxu0 %v5332_v18  ;;  %2444 = vmatpush1.bf16.msra.mxu1 %v5337_v38 }
 0x1a7   :  { %2404 = vmatprep.subr.bf16.mxu0 %v5346_v45  ;;  %2445 = vmatprep.subr.bf16.mxu1 %v5351_v23 }
 0x1aa   :  { %2405 = vmatpush1.bf16.msra.mxu0 %v5356_v1  ;;  %2446 = vmatpush1.bf16.msra.mxu1 %v5361_v19 }
 0x1ab   :  { %2406 = vmatprep.subr.bf16.mxu0 %v5370_v46  ;;  %2447 = vmatprep.subr.bf16.mxu1 %v5375_v49 }
 0x1ae   :  { %2407 = vmatpush1.bf16.msra.mxu0 %v5380_v29  ;;  %2448 = vmatpush1.bf16.msra.mxu1 %v5385_v50 }
 0x1af   :  { %2408 = vmatprep.subr.bf16.mxu0 %v5394_v52  ;;  %2449 = vmatprep.subr.bf16.mxu1 %v5399_v53 }
 0x1b2   :  { %2409 = vmatpush1.bf16.msra.mxu0 %v5404_v54  ;;  %2450 = vmatpush1.bf16.msra.mxu1 %v5409_v55 }
 0x1b3   :  { %2723 = vmatprep.subr.bf16.mxu0 %v5418_v56  ;;  %2764 = vmatprep.subr.bf16.mxu1 %v5423_v57 }
 0x247   :  { %v1770_v61 = vpop.f32.mrb[24].mxu0  ;;  %v1811_v62 = vpop.f32.mrb[24].mxu1 }
 0x248   :  { %v1818_v2 = vadd.f32 %v1770_v61, %v1538_v59  ;;  %v1820_v3 = vadd.f32 %v1811_v62, %v1540_v60  ;;  %v1772_v5 = vpop.f32.mrb[25].mxu0  ;;  %v1813_v6 = vpop.f32.mrb[25].mxu1 }
 0x249   :  { %v1819_v47 = vadd.f32 %v1772_v5, %v1539_v63  ;;  %v1821_v11 = vadd.f32 %v1813_v6, %v1541_v0  ;;  %v1774_v4 = vpop.f32.mrb[26].mxu0  ;;  %v1815_v17 = vpop.f32.mrb[26].mxu1 }
 0x24a   :  { %v3751_v14 = vmul.f32 -1.442695, %v1818_v2  ;;  %v1775_v37 = vpop.f32.mrb[27].mxu0  ;;  %v1816_v36 = vpop.f32.mrb[27].mxu1  ;;  %v1870_v2 = vunpack.c.h.bf16 %v5157_v25 }
 0x24b   :  { %v3752_v10 = vmul.f32 -1.442695, %v1819_v47  ;;  %v3753_v30 = vmul.f32 -1.442695, %v1821_v11  ;;  %v1850_v62 = vpop.permute.xlu1 %1849 }
 0x24c   :  { %4285 = vpow2.f32 %v3751_v14  ;;  %vm1851_vm6 = vcmp.eq.s32.totalorder %v1850_v62, 1  ;;  %v1867_v14 = vunpack.c.l.bf16 %v5155_v20  ;;  %v5460_v62 = vld [vmem:[%s5816_s8 + $0x24] ss:$16 sps:$4 sm:$0xff]  }
 0x24d   :  { %4287 = vpow2.f32 %v3752_v10  ;;  %v1869_v10 = vunpack.c.l.bf16 %v5157_v25 }
 0x24e   :  { %4289 = vpow2.f32 %v3753_v30 }
 0x24f   :  { %4291 = vtanh.f32 %v1820_v3 }
 0x256   :  { %v4286_v34 = vpop.eup %4285 }
 0x257   :  { %v4288_v32 = vpop.eup %4287  ;;  %v1826_v43 = vadd.f32 1.0, %v4286_v34 }
 0x258   :  { %v1832_v44 = vadd.f32 1.0, %v4288_v32  ;;  %v4290_v59 = vpop.eup %4289  ;;  %v1868_v32 = vunpack.c.h.bf16 %v5155_v20 }
 0x259   :  { %4293 = vrcp.f32 %v1826_v43  ;;  %v4292_v60 = vpop.eup %4291  ;;  %v1839_v63 = vadd.f32 1.0, %v4290_v59 }
 0x25a   :  { %4295 = vrcp.f32 %v1832_v44 }
 0x25b   :  { %4297 = vrcp.f32 %v1839_v63 }
 0x263   :  { %v4294_v61 = vpop.eup %4293 }
 0x264   :  { %v4296_v17 = vpop.eup %4295  ;;  %v1843_v37 = vmul.f32 %v4294_v61, %v4292_v60 }
 0x265   :  { %v1842_v36 = vmul.f32 %v4296_v17, %v5164_v48  ;;  %v4298_v25 = vpop.eup %4297 }
 0x267   :  { %v1844_v34 = vadd.f32 %v1843_v37, %v1842_v36  ;;  %v2099_v30 = vpop.f32.mrb[28].mxu0  ;;  %v2140_v0 = vpop.f32.mrb[28].mxu1 }
 0x268   :  { %v2147_v3 = vadd.f32 %v2099_v30, %v1867_v14  ;;  %v2149_v5 = vadd.f32 %v2140_v0, %v1869_v10  ;;  %v2101_v6 = vpop.f32.mrb[29].mxu0  ;;  %v2142_v47 = vpop.f32.mrb[29].mxu1  ;;  %v5453_v30 = vld [vmem:[%s5816_s8 + $0x8] ss:$16 sps:$4 sm:$0xff]  }
 0x269   :  { %4299 = vtanh.f32 %v1844_v34  ;;  %v5438_v11 = vsel %vm1851_vm6, %v1844_v34, %v5164_v48  ;;  %v2148_v4 = vadd.f32 %v2101_v6, %v1868_v32  ;;  %v2150_v43 = vadd.f32 %v2142_v47, %v1870_v2  ;;  %v2103_v44 = vpop.f32.mrb[30].mxu0  ;;  %v2144_v59 = vpop.f32.mrb[30].mxu1  ;;  %v5448_v34 = vld [vmem:[%s5816_s8] ss:$16 sps:$4 sm:$0xff]  }
 0x26a   :  { %v3788_v60 = vmul.f32 -1.442695, %v2147_v3  ;;  %v2104_v61 = vpop.f32.mrb[31].mxu0  ;;  %v2145_v17 = vpop.f32.mrb[31].mxu1  ;;  %v5465_v3 = vld [vmem:[%s5816_s8 + $0x2c] ss:$16 sps:$4 sm:$0xff]  }
 0x26b   :  { %v3789_v20 = vmul.f32 -1.442695, %v2148_v4  ;;  %v3790_v37 = vmul.f32 -1.442695, %v2150_v43  ;;  %v5475_v47 = vld [vmem:[%s5816_s8 + $0x20] ss:$16 sps:$4 sm:$0xff]  }
 0x26c   :  { %4301 = vpow2.f32 %v3788_v60  ;;  %v5487_v4 = vld [vmem:[%s5816_s8 + $0x44] ss:$16 sps:$4 sm:$0xff]   ;;  %v5492_v43 = vld [vmem:[%s5816_s8 + $0x4c] ss:$16 sps:$4 sm:$0xff]   ;;  %v5501_v44 = vld [vmem:[%s5816_s8 + $0x40] ss:$16 sps:$4 sm:$0xff]  }
 0x26d   :  { %4303 = vpow2.f32 %v3789_v20  ;;  %v5506_v59 = vld [vmem:[%s5816_s8 + $0x48] ss:$16 sps:$4 sm:$0xff]   ;;  %v5513_v60 = vld [vmem:[%s5816_s8 + $0x64] ss:$16 sps:$4 sm:$0xff]   ;;  %v5518_v61 = vld [vmem:[%s5816_s8 + $0x6c] ss:$16 sps:$4 sm:$0xff]  }
 0x26e   :  { %4305 = vpow2.f32 %v3790_v37  ;;  %5875 = vst [vmem:[#allocation10_spill] sm:$0xff] %v5513_v60  ;;  %5876 = vst [vmem:[#allocation11_spill] sm:$0xff] %v5518_v61 }
 0x26f   :  { %4307 = vtanh.f32 %v2149_v5  ;;  %v5480_v5 = vld [vmem:[%s5816_s8 + $0x28] ss:$16 sps:$4 sm:$0xff]  }
 0x273   :  { %v4300_v63 = vpop.eup %4299 }
 0x274   :  { %v1846_v36 = vmul.f32 %v4300_v63, %v4298_v25  ;;  %v5525_v25 = vld [vmem:[%s5816_s8 + $0x60] ss:$16 sps:$4 sm:$0xff]   ;;  %v5530_v63 = vld [vmem:[%s5816_s8 + $0x68] ss:$16 sps:$4 sm:$0xff]  }
 0x276   :  { %v4302_v14 = vpop.eup %4301  ;;  %v5442_v10 = vsel %vm1851_vm6, %v1846_v36, %v5168_v40  ;;  %v1857_v48 = vsel %vm1851_vm6, %v1846_v36, 0.0  ;;  %v5537_v36 = vld [vmem:[%s5816_s8 + $0x84] ss:$16 sps:$4 sm:$0xff]  }
 0x277   :  { %v4304_v0 = vpop.eup %4303  ;;  %v1858_v32 = vpack.c.bf16 %v1857_v48, %v1857_v48  ;;  %v2155_v2 = vadd.f32 1.0, %v4302_v14  ;;  %v2201_v40 = vpack.c.bf16 %v5442_v10, %v5442_v10  ;;  %v5542_v14 = vld [vmem:[%s5816_s8 + $0x8c] ss:$16 sps:$4 sm:$0xff]  }
 0x278   :  { %v2161_v6 = vadd.f32 1.0, %v4304_v0  ;;  %v4306_v17 = vpop.eup %4305  ;;  %5877 = vst [vmem:[#allocation12_spill] sm:$0xff] %v5542_v14 }
 0x279   :  { %3754 = vst [vmem:[%s5818_s10 + $0x4] sm:$0xf] %v1858_v32  ;;  %4309 = vrcp.f32 %v2155_v2  ;;  %2427 = vmatmul.mubr.bf16.vlgmr.msra.gmra.mrb[32].mxu0 %v2201_v40  ;;  %2468 = vmatmul.mubr.bf16.vlgmr.msra.gmra.mrb[32].mxu1 %v2201_v40  ;;  %v4308_v20 = vpop.eup %4307  ;;  %v2168_v0 = vadd.f32 1.0, %v4306_v17  ;;  %v5550_v40 = vld [vmem:[%s5816_s8 + $0x80] ss:$16 sps:$4 sm:$0xff]  }
 0x27a   :  { %4311 = vrcp.f32 %v2161_v6  ;;  %2724 = vmatpush1.bf16.msra.mxu0 %v5448_v34  ;;  %2765 = vmatpush1.bf16.msra.mxu1 %v5453_v30  ;;  %5878 = vst [vmem:[#allocation13_spill] sm:$0xff] %v5550_v40  ;;  %v5555_v6 = vld [vmem:[%s5816_s8 + $0x88] ss:$16 sps:$4 sm:$0xff]   ;;  %v5562_v17 = vld [vmem:[%s5816_s8 + $0xa4] ss:$16 sps:$4 sm:$0xff]  }
 0x27b   :  { %2725 = vmatprep.subr.bf16.mxu0 %v5460_v62  ;;  %2766 = vmatprep.subr.bf16.mxu1 %v5465_v3  ;;  %5879 = vst [vmem:[#allocation14_spill] sm:$0xff] %v5555_v6  ;;  %5880 = vst [vmem:[#allocation15_spill] sm:$0xff] %v5562_v17  ;;  %4313 = vrcp.f32 %v2168_v0  ;;  %v5602_v0 = vld [vmem:[%s5816_s8 + $0xc0] ss:$16 sps:$4 sm:$0xff]  }
 0x27c   :  { %2755 = vmatprep.mubr.bf16.mxu0 %v5859_v9  ;;  %2796 = vmatprep.mubr.bf16.mxu1 %v5859_v9  ;;  %5886 = vst [vmem:[#allocation29_spill] sm:$0xff] %v5602_v0 }
 0x27e   :  { %2726 = vmatpush1.bf16.msra.mxu0 %v5475_v47  ;;  %2767 = vmatpush1.bf16.msra.mxu1 %v5480_v5 }
 0x27f   :  { %2727 = vmatprep.subr.bf16.mxu0 %v5487_v4  ;;  %2768 = vmatprep.subr.bf16.mxu1 %v5492_v43 }
 0x282   :  { %2728 = vmatpush1.bf16.msra.mxu0 %v5501_v44  ;;  %2769 = vmatpush1.bf16.msra.mxu1 %v5506_v59 }
 0x283   :  { %v4310_v37 = vpop.eup %4309  ;;  %2729 = vmatprep.subr.bf16.mxu0 %v5513_v60  ;;  %2770 = vmatprep.subr.bf16.mxu1 %v5518_v61  ;;  %v2179_v61 = vpop.permute.xlu1 %2178 }
 0x284   :  { %v4312_v48 = vpop.eup %4311  ;;  %v2172_v32 = vmul.f32 %v4310_v37, %v4308_v20  ;;  %v5567_v20 = vld [vmem:[%s5816_s8 + $0xac] ss:$16 sps:$4 sm:$0xff]   ;;  %vm2180_vm7 = vcmp.eq.s32.totalorder %v2179_v61, 1  ;;  %v5891_v61 = vld [vmem:[#allocation24_spill] sm:$0xff] }
 0x285   :  { %v2171_v2 = vmul.f32 %v4312_v48, %v5195_v58  ;;  %5881 = vst [vmem:[#allocation16_spill] sm:$0xff] %v5567_v20  ;;  %v5578_v48 = vld [vmem:[%s5816_s8 + $0xa0] ss:$16 sps:$4 sm:$0xff]  }
 0x286   :  { %2730 = vmatpush1.bf16.msra.mxu0 %v5525_v25  ;;  %2771 = vmatpush1.bf16.msra.mxu1 %v5530_v63  ;;  %5882 = vst [vmem:[#allocation25_spill] sm:$0xff] %v5578_v48 }
 0x287   :  { %v2173_v60 = vadd.f32 %v2172_v32, %v2171_v2  ;;  %2731 = vmatprep.subr.bf16.mxu0 %v5537_v36  ;;  %2772 = vmatprep.subr.bf16.mxu1 %v5542_v14  ;;  %v5583_v32 = vld [vmem:[%s5816_s8 + $0xa8] ss:$16 sps:$4 sm:$0xff]  }
 0x288   :  { %5883 = vst [vmem:[#allocation26_spill] sm:$0xff] %v5583_v32  ;;  %v5607_v2 = vld [vmem:[%s5816_s8 + $0xc8] ss:$16 sps:$4 sm:$0xff]  }
 0x289   :  { %4315 = vtanh.f32 %v2173_v60  ;;  %v5571_v37 = vsel %vm2180_vm7, %v2173_v60, %v5195_v58  ;;  %v5590_v58 = vld [vmem:[%s5816_s8 + $0xc4] ss:$16 sps:$4 sm:$0xff]   ;;  %v5595_v60 = vld [vmem:[%s5816_s8 + $0xcc] ss:$16 sps:$4 sm:$0xff]   ;;  %5887 = vst [vmem:[#allocation30_spill] sm:$0xff] %v5607_v2 }
 0x28a   :  { %2732 = vmatpush1.bf16.msra.mxu0 %v5550_v40  ;;  %2773 = vmatpush1.bf16.msra.mxu1 %v5555_v6  ;;  %5884 = vst [vmem:[#allocation27_spill] sm:$0xff] %v5590_v58  ;;  %5885 = vst [vmem:[#allocation28_spill] sm:$0xff] %v5595_v60 }
 0x28b   :  { %2733 = vmatprep.subr.bf16.mxu0 %v5562_v17  ;;  %2774 = vmatprep.subr.bf16.mxu1 %v5567_v20  ;;  %v4314_v20 = vpop.eup %4313 }
 0x28e   :  { %2734 = vmatpush1.bf16.msra.mxu0 %v5578_v48  ;;  %2775 = vmatpush1.bf16.msra.mxu1 %v5583_v32  ;;  %v5614_v48 = vld [vmem:[%s5816_s8 + $0xe4] ss:$16 sps:$4 sm:$0xff]   ;;  %v5619_v32 = vld [vmem:[%s5816_s8 + $0xec] ss:$16 sps:$4 sm:$0xff]  }
 0x28f   :  { %2735 = vmatprep.subr.bf16.mxu0 %v5590_v58  ;;  %2776 = vmatprep.subr.bf16.mxu1 %v5595_v60  ;;  %v5626_v58 = vld [vmem:[%s5816_s8 + $0xe0] ss:$16 sps:$4 sm:$0xff]   ;;  %v5631_v60 = vld [vmem:[%s5816_s8 + $0xe8] ss:$16 sps:$4 sm:$0xff]  }
 0x292   :  { %2736 = vmatpush1.bf16.msra.mxu0 %v5602_v0  ;;  %2777 = vmatpush1.bf16.msra.mxu1 %v5607_v2 }
 0x293   :  { %v4316_v17 = vpop.eup %4315  ;;  %2737 = vmatprep.subr.bf16.mxu0 %v5614_v48  ;;  %2778 = vmatprep.subr.bf16.mxu1 %v5619_v32 }
 0x294   :  { %v2175_v6 = vmul.f32 %v4316_v17, %v4314_v20 }
 0x296   :  { %v5637_v0 = vsel %vm2180_vm7, %v2175_v6, %v5211_v51  ;;  %v2186_v2 = vsel %vm2180_vm7, %v2175_v6, 0.0  ;;  %2738 = vmatpush1.bf16.msra.mxu0 %v5626_v58  ;;  %2779 = vmatpush1.bf16.msra.mxu1 %v5631_v60  ;;  %v5888_v51 = vld [vmem:[#allocation17_spill] sm:$0xff] }
 0x297   :  { %v2187_v40 = vpack.c.bf16 %v2186_v2, %v2186_v2  ;;  %v2530_v14 = vpack.c.bf16 %v5637_v0, %v5637_v0  ;;  %3052 = vmatprep.subr.bf16.mxu0 %v5226_v7  ;;  %3093 = vmatprep.subr.bf16.mxu1 %v5231_v8  ;;  %v2196_v7 = vunpack.c.l.bf16 %v5888_v51  ;;  %v5889_v8 = vld [vmem:[#allocation18_spill] sm:$0xff]  ;;  %v2528_v2 = vunpack.c.h.bf16 %v5891_v61 }
 0x299   :  { %3791 = vst [vmem:[%s5819_s11 + $0x8] sm:$0xf] %v2187_v40  ;;  %2756 = vmatmul.mubr.bf16.vlgmr.msra.gmra.mrb[36].mxu0 %v2530_v14  ;;  %2797 = vmatmul.mubr.bf16.vlgmr.msra.gmra.mrb[36].mxu1 %v2530_v14  ;;  %v2527_v14 = vunpack.c.l.bf16 %v5891_v61 }
 0x29a   :  { %3053 = vmatpush1.bf16.msra.mxu0 %v5236_v13  ;;  %3094 = vmatpush1.bf16.msra.mxu1 %v5241_v24  ;;  %v2198_v13 = vunpack.c.l.bf16 %v5889_v8 }
 0x29b   :  { %3054 = vmatprep.subr.bf16.mxu0 %v5255_v16  ;;  %3095 = vmatprep.subr.bf16.mxu1 %v5265_v41  ;;  %v2197_v16 = vunpack.c.h.bf16 %v5888_v51 }
 0x29c   :  { %3084 = vmatprep.mubr.bf16.mxu0 %v5859_v9  ;;  %3125 = vmatprep.mubr.bf16.mxu1 %v5859_v9 }
 0x29e   :  { %3055 = vmatpush1.bf16.msra.mxu0 %v5250_v12  ;;  %3096 = vmatpush1.bf16.msra.mxu1 %v5260_v39  ;;  %v2199_v39 = vunpack.c.h.bf16 %v5889_v8 }
 0x29f   :  { %3056 = vmatprep.subr.bf16.mxu0 %v5274_v26  ;;  %3097 = vmatprep.subr.bf16.mxu1 %v5279_v15 }
 0x2a2   :  { %3057 = vmatpush1.bf16.msra.mxu0 %v5284_v31  ;;  %3098 = vmatpush1.bf16.msra.mxu1 %v5289_v35 }
 0x2a3   :  { %3058 = vmatprep.subr.bf16.mxu0 %v5298_v22  ;;  %3099 = vmatprep.subr.bf16.mxu1 %v5303_v28 }
 0x2a6   :  { %3059 = vmatpush1.bf16.msra.mxu0 %v5308_v27  ;;  %3100 = vmatpush1.bf16.msra.mxu1 %v5313_v21 }
 0x2a7   :  { %3060 = vmatprep.subr.bf16.mxu0 %v5322_v33  ;;  %3101 = vmatprep.subr.bf16.mxu1 %v5327_v42 }
 0x2aa   :  { %3061 = vmatpush1.bf16.msra.mxu0 %v5332_v18  ;;  %3102 = vmatpush1.bf16.msra.mxu1 %v5337_v38 }
 0x2ab   :  { %3062 = vmatprep.subr.bf16.mxu0 %v5346_v45  ;;  %3103 = vmatprep.subr.bf16.mxu1 %v5351_v23 }
 0x2ae   :  { %3063 = vmatpush1.bf16.msra.mxu0 %v5356_v1  ;;  %3104 = vmatpush1.bf16.msra.mxu1 %v5361_v19 }
 0x2af   :  { %3064 = vmatprep.subr.bf16.mxu0 %v5370_v46  ;;  %3105 = vmatprep.subr.bf16.mxu1 %v5375_v49 }
 0x2b2   :  { %3065 = vmatpush1.bf16.msra.mxu0 %v5380_v29  ;;  %3106 = vmatpush1.bf16.msra.mxu1 %v5385_v50 }
 0x2b3   :  { %3066 = vmatprep.subr.bf16.mxu0 %v5394_v52  ;;  %3107 = vmatprep.subr.bf16.mxu1 %v5399_v53 }
 0x2b6   :  { %3067 = vmatpush1.bf16.msra.mxu0 %v5404_v54  ;;  %3108 = vmatpush1.bf16.msra.mxu1 %v5409_v55  ;;  %v2508_v55 = vpop.permute.xlu0 %2507 }
 0x2b7   :  { %3379 = vmatprep.subr.bf16.mxu0 %v5418_v56  ;;  %3420 = vmatprep.subr.bf16.mxu1 %v5423_v57  ;;  %v5890_v56 = vld [vmem:[#allocation23_spill] sm:$0xff]  ;;  %vm2509_vm8 = vcmp.eq.s32.totalorder %v2508_v55, 1 }
 0x2b8   :  { %v2525_v57 = vunpack.c.l.bf16 %v5890_v56  ;;  %v2526_v20 = vunpack.c.h.bf16 %v5890_v56 }
 0x34c   :  { %v2428_v24 = vpop.f32.mrb[32].mxu0  ;;  %v2469_v12 = vpop.f32.mrb[32].mxu1 }
 0x34d   :  { %v2476_v41 = vadd.f32 %v2428_v24, %v2196_v7  ;;  %v2478_v26 = vadd.f32 %v2469_v12, %v2198_v13  ;;  %v2430_v15 = vpop.f32.mrb[33].mxu0  ;;  %v2471_v31 = vpop.f32.mrb[33].mxu1 }
 0x34e   :  { %v2477_v35 = vadd.f32 %v2430_v15, %v2197_v16  ;;  %v2479_v22 = vadd.f32 %v2471_v31, %v2199_v39  ;;  %v2432_v28 = vpop.f32.mrb[34].mxu0  ;;  %v2473_v27 = vpop.f32.mrb[34].mxu1 }
 0x34f   :  { %v3825_v21 = vmul.f32 -1.442695, %v2476_v41  ;;  %v2433_v33 = vpop.f32.mrb[35].mxu0  ;;  %v2474_v42 = vpop.f32.mrb[35].mxu1 }
 0x350   :  { %v3826_v18 = vmul.f32 -1.442695, %v2477_v35  ;;  %v3827_v38 = vmul.f32 -1.442695, %v2479_v22 }
 0x351   :  { %4317 = vpow2.f32 %v3825_v21 }
 0x352   :  { %4319 = vpow2.f32 %v3826_v18 }
 0x353   :  { %4321 = vpow2.f32 %v3827_v38 }
 0x354   :  { %4323 = vtanh.f32 %v2478_v26 }
 0x35b   :  { %v4318_v45 = vpop.eup %4317 }
 0x35c   :  { %v4320_v23 = vpop.eup %4319  ;;  %v2484_v1 = vadd.f32 1.0, %v4318_v45 }
 0x35d   :  { %v2490_v19 = vadd.f32 1.0, %v4320_v23  ;;  %v4322_v46 = vpop.eup %4321 }
 0x35e   :  { %4325 = vrcp.f32 %v2484_v1  ;;  %v4324_v49 = vpop.eup %4323  ;;  %v2497_v53 = vadd.f32 1.0, %v4322_v46  ;;  %v5895_v46 = vld [vmem:[#allocation13_spill] sm:$0xff] }
 0x35f   :  { %4327 = vrcp.f32 %v2490_v19 }
 0x360   :  { %4329 = vrcp.f32 %v2497_v53 }
 0x368   :  { %v4326_v29 = vpop.eup %4325 }
 0x369   :  { %v4328_v50 = vpop.eup %4327  ;;  %v2501_v52 = vmul.f32 %v4326_v29, %v4324_v49  ;;  %v5896_v49 = vld [vmem:[#allocation14_spill] sm:$0xff]  ;;  %v5899_v29 = vld [vmem:[#allocation25_spill] sm:$0xff] }
 0x36a   :  { %v2500_v54 = vmul.f32 %v4328_v50, %v5438_v11  ;;  %v4330_v22 = vpop.eup %4329  ;;  %v5901_v50 = vld [vmem:[#allocation27_spill] sm:$0xff] }
 0x36c   :  { %v2502_v40 = vadd.f32 %v2501_v52, %v2500_v54  ;;  %v2757_v6 = vpop.f32.mrb[36].mxu0  ;;  %v2798_v17 = vpop.f32.mrb[36].mxu1  ;;  %v5902_v52 = vld [vmem:[#allocation28_spill] sm:$0xff]  ;;  %v5903_v54 = vld [vmem:[#allocation29_spill] sm:$0xff] }
 0x36d   :  { %v2805_v51 = vadd.f32 %v2757_v6, %v2525_v57  ;;  %v2807_v7 = vadd.f32 %v2798_v17, %v2527_v14  ;;  %v2759_v8 = vpop.f32.mrb[37].mxu0  ;;  %v2800_v13 = vpop.f32.mrb[37].mxu1 }
 0x36e   :  { %4331 = vtanh.f32 %v2502_v40  ;;  %v5694_v24 = vsel %vm2509_vm8, %v2502_v40, %v5438_v11  ;;  %v2806_v12 = vadd.f32 %v2759_v8, %v2526_v20  ;;  %v2808_v16 = vadd.f32 %v2800_v13, %v2528_v2  ;;  %v2761_v39 = vpop.f32.mrb[38].mxu0  ;;  %v2802_v41 = vpop.f32.mrb[38].mxu1 }
 0x36f   :  { %v3862_v26 = vmul.f32 -1.442695, %v2805_v51  ;;  %v2762_v15 = vpop.f32.mrb[39].mxu0  ;;  %v2803_v31 = vpop.f32.mrb[39].mxu1 }
 0x370   :  { %v3863_v35 = vmul.f32 -1.442695, %v2806_v12  ;;  %v3864_v27 = vmul.f32 -1.442695, %v2808_v16 }
 0x371   :  { %4333 = vpow2.f32 %v3862_v26 }
 0x372   :  { %4335 = vpow2.f32 %v3863_v35 }
 0x373   :  { %4337 = vpow2.f32 %v3864_v27 }
 0x374   :  { %4339 = vtanh.f32 %v2807_v7 }
 0x378   :  { %v4332_v28 = vpop.eup %4331 }
 0x379   :  { %v2504_v21 = vmul.f32 %v4332_v28, %v4330_v22 }
 0x37b   :  { %v4334_v33 = vpop.eup %4333  ;;  %v5698_v42 = vsel %vm2509_vm8, %v2504_v21, %v5442_v10  ;;  %v2515_v11 = vsel %vm2509_vm8, %v2504_v21, 0.0 }
 0x37c   :  { %v4336_v18 = vpop.eup %4335  ;;  %v2516_v38 = vpack.c.bf16 %v2515_v11, %v2515_v11  ;;  %v2813_v45 = vadd.f32 1.0, %v4334_v33  ;;  %v2859_v23 = vpack.c.bf16 %v5698_v42, %v5698_v42 }
 0x37d   :  { %v2819_v1 = vadd.f32 1.0, %v4336_v18  ;;  %v4338_v10 = vpop.eup %4337 }
 0x37e   :  { %3828 = vst [vmem:[%s5818_s10 + $0x8] sm:$0xf] %v2516_v38  ;;  %4341 = vrcp.f32 %v2813_v45  ;;  %3085 = vmatmul.mubr.bf16.vlgmr.msra.gmra.mrb[40].mxu0 %v2859_v23  ;;  %3126 = vmatmul.mubr.bf16.vlgmr.msra.gmra.mrb[40].mxu1 %v2859_v23 }
 0x37f   :  { %4343 = vrcp.f32 %v2819_v1  ;;  %3380 = vmatpush1.bf16.msra.mxu0 %v5448_v34  ;;  %3421 = vmatpush1.bf16.msra.mxu1 %v5453_v30  ;;  %v4340_v34 = vpop.eup %4339  ;;  %v3166_v1 = vpop.permute.xlu0 %3165 }
 0x380   :  { %3381 = vmatprep.subr.bf16.mxu0 %v5460_v62  ;;  %3422 = vmatprep.subr.bf16.mxu1 %v5465_v3  ;;  %v5892_v62 = vld [vmem:[#allocation10_spill] sm:$0xff]  ;;  %v5893_v3 = vld [vmem:[#allocation11_spill] sm:$0xff]  ;;  %vm3167_vm10 = vcmp.eq.s32.totalorder %v3166_v1, 1 }
 0x381   :  { %3411 = vmatprep.mubr.bf16.mxu0 %v5859_v9  ;;  %3452 = vmatprep.mubr.bf16.mxu1 %v5859_v9 }
 0x383   :  { %3382 = vmatpush1.bf16.msra.mxu0 %v5475_v47  ;;  %3423 = vmatpush1.bf16.msra.mxu1 %v5480_v5  ;;  %v2826_v47 = vadd.f32 1.0, %v4338_v10 }
 0x384   :  { %3383 = vmatprep.subr.bf16.mxu0 %v5487_v4  ;;  %3424 = vmatprep.subr.bf16.mxu1 %v5492_v43  ;;  %v2837_v4 = vpop.permute.xlu1 %2836 }
 0x385   :  { %vm2838_vm9 = vcmp.eq.s32.totalorder %v2837_v4, 1  ;;  %4345 = vrcp.f32 %v2826_v47 }
 0x387   :  { %3384 = vmatpush1.bf16.msra.mxu0 %v5501_v44  ;;  %3425 = vmatpush1.bf16.msra.mxu1 %v5506_v59  ;;  %v5894_v44 = vld [vmem:[#allocation12_spill] sm:$0xff] }
 0x388   :  { %v4342_v30 = vpop.eup %4341  ;;  %3385 = vmatprep.subr.bf16.mxu0 %v5892_v62  ;;  %3426 = vmatprep.subr.bf16.mxu1 %v5893_v3  ;;  %v5908_v62 = vld [vmem:[#allocation22_spill] sm:$0xff] }
 0x389   :  { %v4344_v9 = vpop.eup %4343  ;;  %v2830_v19 = vmul.f32 %v4342_v30, %v4340_v34  ;;  %v5907_v34 = vld [vmem:[#allocation21_spill] sm:$0xff]  ;;  %v3183_v3 = vunpack.c.l.bf16 %v5908_v62  ;;  %v3184_v4 = vunpack.c.h.bf16 %v5908_v62 }
 0x38a   :  { %v2829_v5 = vmul.f32 %v4344_v9, %v5571_v37  ;;  %v3181_v30 = vunpack.c.l.bf16 %v5907_v34 }
 0x38b   :  { %3386 = vmatpush1.bf16.msra.mxu0 %v5525_v25  ;;  %3427 = vmatpush1.bf16.msra.mxu1 %v5530_v63  ;;  %v5897_v25 = vld [vmem:[#allocation15_spill] sm:$0xff]  ;;  %v5898_v63 = vld [vmem:[#allocation16_spill] sm:$0xff] }
 0x38c   :  { %v2831_v43 = vadd.f32 %v2830_v19, %v2829_v5  ;;  %3387 = vmatprep.subr.bf16.mxu0 %v5537_v36  ;;  %3428 = vmatprep.subr.bf16.mxu1 %v5894_v44  ;;  %v5900_v36 = vld [vmem:[#allocation26_spill] sm:$0xff]  ;;  %v3182_v5 = vunpack.c.h.bf16 %v5907_v34 }
 0x38e   :  { %4347 = vtanh.f32 %v2831_v43  ;;  %v5727_v59 = vsel %vm2838_vm9, %v2831_v43, %v5571_v37  ;;  %v5904_v37 = vld [vmem:[#allocation30_spill] sm:$0xff] }
 0x38f   :  { %3388 = vmatpush1.bf16.msra.mxu0 %v5895_v46  ;;  %3429 = vmatpush1.bf16.msra.mxu1 %v5896_v49  ;;  %v4346_v53 = vpop.eup %4345 }
 0x390   :  { %3389 = vmatprep.subr.bf16.mxu0 %v5897_v25  ;;  %3430 = vmatprep.subr.bf16.mxu1 %v5898_v63 }
 0x393   :  { %3390 = vmatpush1.bf16.msra.mxu0 %v5899_v29  ;;  %3431 = vmatpush1.bf16.msra.mxu1 %v5900_v36 }
 0x394   :  { %3391 = vmatprep.subr.bf16.mxu0 %v5901_v50  ;;  %3432 = vmatprep.subr.bf16.mxu1 %v5902_v52 }
 0x397   :  { %3392 = vmatpush1.bf16.msra.mxu0 %v5903_v54  ;;  %3433 = vmatpush1.bf16.msra.mxu1 %v5904_v37 }
 0x398   :  { %v4348_v55 = vpop.eup %4347  ;;  %3393 = vmatprep.subr.bf16.mxu0 %v5614_v48  ;;  %3434 = vmatprep.subr.bf16.mxu1 %v5619_v32  ;;  %v5905_v48 = vld [vmem:[#allocation19_spill] sm:$0xff] }
 0x399   :  { %v2833_v56 = vmul.f32 %v4348_v55, %v4346_v53  ;;  %v2854_v32 = vunpack.c.l.bf16 %v5905_v48 }
 0x39b   :  { %v5743_v57 = vsel %vm2838_vm9, %v2833_v56, %v5637_v0  ;;  %v2844_v61 = vsel %vm2838_vm9, %v2833_v56, 0.0  ;;  %3394 = vmatpush1.bf16.msra.mxu0 %v5626_v58  ;;  %3435 = vmatpush1.bf16.msra.mxu1 %v5631_v60  ;;  %v5906_v0 = vld [vmem:[#allocation20_spill] sm:$0xff]  ;;  %v2855_v58 = vunpack.c.h.bf16 %v5905_v48 }
 0x39c   :  { %v2845_v14 = vpack.c.bf16 %v2844_v61, %v2844_v61  ;;  %v3186_v40 = vpack.c.bf16 %v5743_v57, %v5743_v57  ;;  %v2856_v6 = vunpack.c.l.bf16 %v5906_v0  ;;  %v2857_v60 = vunpack.c.h.bf16 %v5906_v0 }
 0x39e   :  { %3865 = vst [vmem:[%s5819_s11 + $0x4] sm:$0xf] %v2845_v14  ;;  %3412 = vmatmul.mubr.bf16.vlgmr.msra.gmra.mrb[44].mxu0 %v3186_v40  ;;  %3453 = vmatmul.mubr.bf16.vlgmr.msra.gmra.mrb[44].mxu1 %v3186_v40 }
 0x451   :  { %v3086_v17 = vpop.f32.mrb[40].mxu0  ;;  %v3127_v20 = vpop.f32.mrb[40].mxu1 }
 0x452   :  { %v3134_v2 = vadd.f32 %v3086_v17, %v2854_v32  ;;  %v3136_v51 = vadd.f32 %v3127_v20, %v2856_v6  ;;  %v3088_v7 = vpop.f32.mrb[41].mxu0  ;;  %v3129_v8 = vpop.f32.mrb[41].mxu1 }
 0x453   :  { %v3135_v13 = vadd.f32 %v3088_v7, %v2855_v58  ;;  %v3137_v12 = vadd.f32 %v3129_v8, %v2857_v60  ;;  %v3090_v16 = vpop.f32.mrb[42].mxu0  ;;  %v3131_v39 = vpop.f32.mrb[42].mxu1 }
 0x454   :  { %v3899_v41 = vmul.f32 -1.442695, %v3134_v2  ;;  %v3091_v26 = vpop.f32.mrb[43].mxu0  ;;  %v3132_v15 = vpop.f32.mrb[43].mxu1 }
 0x455   :  { %v3900_v31 = vmul.f32 -1.442695, %v3135_v13  ;;  %v3901_v35 = vmul.f32 -1.442695, %v3137_v12  ;;  %v3493_v7 = vpop.permute.xlu1 %3492 }
 0x456   :  { %4349 = vpow2.f32 %v3899_v41  ;;  %vm3494_vm11 = vcmp.eq.s32.totalorder %v3493_v7, 1 }
 0x457   :  { %4351 = vpow2.f32 %v3900_v31 }
 0x458   :  { %4353 = vpow2.f32 %v3901_v35 }
 0x459   :  { %4355 = vtanh.f32 %v3136_v51 }
 0x460   :  { %v4350_v22 = vpop.eup %4349 }
 0x461   :  { %v4352_v28 = vpop.eup %4351  ;;  %v3142_v27 = vadd.f32 1.0, %v4350_v22 }
 0x462   :  { %v3148_v21 = vadd.f32 1.0, %v4352_v28  ;;  %v4354_v33 = vpop.eup %4353 }
 0x463   :  { %4357 = vrcp.f32 %v3142_v27  ;;  %v4356_v11 = vpop.eup %4355  ;;  %v3155_v23 = vadd.f32 1.0, %v4354_v33 }
 0x464   :  { %4359 = vrcp.f32 %v3148_v21 }
 0x465   :  { %4361 = vrcp.f32 %v3155_v23 }
 0x46d   :  { %v4358_v18 = vpop.eup %4357 }
 0x46e   :  { %v4360_v38 = vpop.eup %4359  ;;  %v3159_v45 = vmul.f32 %v4358_v18, %v4356_v11 }
 0x46f   :  { %v3158_v10 = vmul.f32 %v4360_v38, %v5694_v24  ;;  %v4362_v55 = vpop.eup %4361 }
 0x471   :  { %v3160_v9 = vadd.f32 %v3159_v45, %v3158_v10  ;;  %v3413_v19 = vpop.f32.mrb[44].mxu0  ;;  %v3454_v47 = vpop.f32.mrb[44].mxu1 }
 0x472   :  { %v3461_v43 = vadd.f32 %v3413_v19, %v3181_v30  ;;  %v3463_v44 = vadd.f32 %v3454_v47, %v3183_v3  ;;  %v3415_v46 = vpop.f32.mrb[45].mxu0  ;;  %v3456_v49 = vpop.f32.mrb[45].mxu1 }
 0x473   :  { %4363 = vtanh.f32 %v3160_v9  ;;  %v3171_v25 = vsel %vm3167_vm10, %v3160_v9, %v5694_v24  ;;  %v3462_v63 = vadd.f32 %v3415_v46, %v3182_v5  ;;  %v3464_v29 = vadd.f32 %v3456_v49, %v3184_v4  ;;  %v3417_v36 = vpop.f32.mrb[46].mxu0  ;;  %v3458_v50 = vpop.f32.mrb[46].mxu1 }
 0x474   :  { %3172 = vst [vmem:[#allocation5] sm:$0xff] %v3171_v25  ;;  %v3936_v52 = vmul.f32 -1.442695, %v3461_v43  ;;  %v3418_v53 = vpop.f32.mrb[47].mxu0  ;;  %v3459_v54 = vpop.f32.mrb[47].mxu1 }
 0x475   :  { %v3937_v37 = vmul.f32 -1.442695, %v3462_v63  ;;  %v3938_v61 = vmul.f32 -1.442695, %v3464_v29 }
 0x476   :  { %4365 = vpow2.f32 %v3936_v52 }
 0x477   :  { %4367 = vpow2.f32 %v3937_v37 }
 0x478   :  { %4369 = vpow2.f32 %v3938_v61 }
 0x479   :  { %4371 = vtanh.f32 %v3463_v44 }
 0x47d   :  { %v4364_v56 = vpop.eup %4363 }
 0x47e   :  { %v3162_v14 = vmul.f32 %v4364_v56, %v4362_v55 }
 0x480   :  { %v4366_v40 = vpop.eup %4365  ;;  %v3168_v48 = vsel %vm3167_vm10, %v3162_v14, %v5698_v42  ;;  %v3173_v24 = vsel %vm3167_vm10, %v3162_v14, 0.0 }
 0x481   :  { %v4368_v32 = vpop.eup %4367  ;;  %3169 = vst [vmem:[#allocation4] sm:$0xff] %v3168_v48  ;;  %v3174_v0 = vpack.c.bf16 %v3173_v24, %v3173_v24  ;;  %v3469_v6 = vadd.f32 1.0, %v4366_v40 }
 0x482   :  { %v3475_v17 = vadd.f32 1.0, %v4368_v32  ;;  %v4370_v20 = vpop.eup %4369 }
 0x483   :  { %3902 = vst [vmem:[%s5818_s10 + $0xc] sm:$0xf] %v3174_v0  ;;  %4373 = vrcp.f32 %v3469_v6  ;;  %v4372_v58 = vpop.eup %4371  ;;  %v3482_v51 = vadd.f32 1.0, %v4370_v20 }
 0x484   :  { %4375 = vrcp.f32 %v3475_v17 }
 0x485   :  { %4377 = vrcp.f32 %v3482_v51 }
 0x48d   :  { %v4374_v60 = vpop.eup %4373 }
 0x48e   :  { %v4376_v2 = vpop.eup %4375  ;;  %v3486_v42 = vmul.f32 %v4374_v60, %v4372_v58 }
 0x48f   :  { %v3485_v8 = vmul.f32 %v4376_v2, %v5727_v59  ;;  %v4378_v16 = vpop.eup %4377 }
 0x491   :  { %v3487_v13 = vadd.f32 %v3486_v42, %v3485_v8 }
 0x493   :  { %4379 = vtanh.f32 %v3487_v13  ;;  %v3498_v12 = vsel %vm3494_vm11, %v3487_v13, %v5727_v59 }
 0x494   :  { %3499 = vst [vmem:[#allocation7] sm:$0xff] %v3498_v12 }
 0x49d   :  { %v4380_v39 = vpop.eup %4379 }
 0x49e   :  { %v3489_v41 = vmul.f32 %v4380_v39, %v4378_v16 }
 0x4a0   :  { %v3495_v26 = vsel %vm3494_vm11, %v3489_v41, %v5743_v57  ;;  %v3500_v15 = vsel %vm3494_vm11, %v3489_v41, 0.0 }
 0x4a1   :  { %3496 = vst [vmem:[#allocation6] sm:$0xff] %v3495_v26  ;;  %v3501_v31 = vpack.c.bf16 %v3500_v15, %v3500_v15 }
 0x4a3   :  { %3502 = vst [vmem:[%s5819_s11] sm:$0xf] %v3501_v31 }
 0x4a4 PF:  { %3505 = sbr.rel (%p4457_p1) target bundleno = 1195 (0x4ab), region = 49  ;;  %v4383_v35 = vmov (!%p4457_p1), 0  }
 0x4a5   :  { %3506 = vst [vmem:[%s5818_s10] sm:$0xf] (!%p4457_p1), %v4383_v35  ;;  %3507 = vst [vmem:[%s5818_s10 + $0x4] sm:$0xf] (!%p4457_p1), %v4383_v35 }
 0x4a6   :  { %3508 = vst [vmem:[%s5818_s10 + $0x8] sm:$0xf] (!%p4457_p1), %v4383_v35  ;;  %3509 = vst [vmem:[%s5818_s10 + $0xc] sm:$0xf] (!%p4457_p1), %v4383_v35 }
 0x4a7   :  { %3510 = vst [vmem:[%s5819_s11] sm:$0xf] (!%p4457_p1), %v4383_v35  ;;  %3511 = vst [vmem:[%s5819_s11 + $0x4] sm:$0xf] (!%p4457_p1), %v4383_v35 }
 0x4a8   :  { %3512 = vst [vmem:[%s5819_s11 + $0x8] sm:$0xf] (!%p4457_p1), %v4383_v35  ;;  %3513 = vst [vmem:[%s5819_s11 + $0xc] sm:$0xf] (!%p4457_p1), %v4383_v35 }
 0x4ab PF:  { %v3514_v59 = vld [vmem:[#allocation4] sm:$0xff]  ;;  %v3516_v57 = vld [vmem:[#allocation6] sm:$0xff] }
 0x4ac   :  { %3515 = vst [vmem:[%s5820_s12] sm:$0xff] %v3514_v59  ;;  %3939 = vst [vmem:[%s5820_s12 + $0x8] sm:$0xff] %v3516_v57 }

</bundles_post_ra>
